<compile_context>
chip_gen: v7x
topology: tpu7x:2x2x1
jax: 0.10.0
libtpu: 0.0.40
codegen_flags: <defaults>
</compile_context>

<pallas_src>
import functools

import jax
import jax.numpy as jnp
from jax.experimental import pallas as pl
from jax.experimental.pallas import tpu as pltpu

LANE = 128
EPS = 1e-5
# Known-safe scoped VMEM across v5e/v6e/v7x; raise toward 64-100 MiB on
# v5e/v6e (128 MiB physical) together with the tile budgets below (review #9).
VMEM_LIMIT = 32 * 1024 * 1024


def _round_up(x, m):
    return (x + m - 1) // m * m


def _pick_th(h, w, cin_pad, cout_pad, budget=6 << 20):
    """Largest divisor of h whose per-step working set fits the VMEM budget."""
    best = 1
    for th in range(1, h + 1):
        if h % th:
            continue
        halo = (th + 2) * w * cin_pad
        body = th * w * cout_pad
        est = (2 * (halo * 2 + body * 2)   # double-buffered bf16 in/out blocks
               + 3 * halo * 4              # f32 center / left / right copies
               + body * 4)                 # f32 accumulator
        if est <= budget:
            best = th
    return best


def _pick_rows(h, w, c_pad, budget=8 << 20):
    """Row-chunk for the BN+ReLU epilogue (big blocks, review #12)."""
    best = 1
    for th in range(1, h + 1):
        if h % th == 0 and th * w * c_pad * 14 <= budget:
            best = th
    return best


# ----------------------------- Pallas kernels ------------------------------ #

def _conv_kernel(top_ref, mid_ref, bot_ref, w_ref, scale_ref, shift_ref,
                 y_ref, stats_ref, *, TH, W, CIN, COUT, apply_act):
    """[BN+ReLU of previous layer] -> 3x3 conv as 9 accumulated bf16 tap matmuls
    -> bf16 output tile + f32 per-channel sum/sumsq partials (accumulated in the
    resident stats block across the H grid axis)."""
    i = pl.program_id(1)
    n_h = pl.num_programs(1)
    f32 = jnp.float32

    top = top_ref[0].astype(f32)   # (1,  W, CIN) row above the tile (clamped)
    mid = mid_ref[0].astype(f32)   # (TH, W, CIN) the tile's rows
    bot = bot_ref[0].astype(f32)   # (1,  W, CIN) row below the tile (clamped)

    if apply_act:
        # Previous layer's BN+ReLU fused into this layer's input load.
        s = scale_ref[...].reshape(1, 1, CIN)
        b = shift_ref[...].reshape(1, 1, CIN)
        top = jnp.maximum(top * s + b, 0.0)
        mid = jnp.maximum(mid * s + b, 0.0)
        bot = jnp.maximum(bot * s + b, 0.0)

    # Fused "same" padding: zero the halo rows that fall outside the image
    # (must happen AFTER the activation fold -- padding is zeros post-ReLU).
    top = top * (i > 0).astype(f32)
    bot = bot * (i < n_h - 1).astype(f32)

    rows = jnp.concatenate([top, mid, bot], axis=0)          # (TH+2, W, CIN)

    # Column neighbours with the zero border column folded in.  Each result is
    # width W, so every later slice/reshape stays (8,128)-aligned.
    zcol = jnp.zeros((TH + 2, 1, CIN), f32)
    left_nb = jnp.concatenate([zcol, rows[:, :W - 1, :]], axis=1)  # input col w-1
    right_nb = jnp.concatenate([rows[:, 1:, :], zcol], axis=1)     # input col w+1

    # dx = 0, 1, 2 sources, flattened to (rows*W, CIN) so dy bands are
    # contiguous, aligned sublane slices at offsets dy*W.
    srcs = tuple(a.reshape((TH + 2) * W, CIN)
                 for a in (left_nb, rows, right_nb))

    acc = jnp.zeros((TH * W, COUT), f32)
    for dy in range(3):
        for dx in range(3):
            tap = srcs[dx][dy * W:dy * W + TH * W, :].astype(jnp.bfloat16)
            acc = acc + jnp.dot(tap, w_ref[3 * dy + dx],
                                preferred_element_type=f32)

    y_ref[...] = acc.reshape(y_ref.shape).astype(y_ref.dtype)

    # Per-channel partial BatchNorm statistics, accumulated in the resident
    # output block across the (sequential) H grid axis.
    # TODO(synk): E[x^2]-E[x]^2 in f32 can cancel for huge activations; use
    # centered/Welford partials if this outgrows toy magnitudes.
    ssum = jnp.sum(acc, axis=0, keepdims=True)
    ssq = jnp.sum(acc * acc, axis=0, keepdims=True)
    part = jnp.concatenate([ssum, ssq], axis=0).reshape(1, 2, COUT)

    @pl.when(i == 0)
    def _():
        stats_ref[...] = part

    @pl.when(i > 0)
    def _():
        stats_ref[...] = stats_ref[...] + part


def _bn_relu_kernel(y_ref, scale_ref, shift_ref, o_ref, *, cout):
    c = scale_ref.shape[-1]
    s = scale_ref[...].reshape(1, 1, 1, c)
    b = shift_ref[...].reshape(1, 1, 1, c)
    v = jnp.maximum(y_ref[...].astype(jnp.float32) * s + b, 0.0)
    # Fused channel un-pad: store only the real channels (lane-masked store).
    o_ref[...] = v[..., :cout]


# ------------------------------ host wrappers ------------------------------ #

def conv3x3_bn_stats(x, w_taps, scale, shift, *, TH, apply_act):
    """x: (N,H,W,CINp) bf16. w_taps: (9,CINp,COUTp) bf16.
    Returns conv output (N,H,W,COUTp) bf16 and per-image stats (N,2,COUTp) f32."""
    N, H, W, CIN = x.shape
    COUT = w_taps.shape[-1]
    nH = H // TH
    kern = functools.partial(_conv_kernel, TH=TH, W=W, CIN=CIN, COUT=COUT,
                             apply_act=apply_act)
    return pl.pallas_call(
        kern,
        grid=(N, nH),
        in_specs=[
            # halo row above (clamped at the border, zeroed in-kernel)
            pl.BlockSpec((1, 1, W, CIN),
                         lambda n, i: (n, jnp.maximum(i * TH - 1, 0), 0, 0)),
            # the tile's TH rows
            pl.BlockSpec((1, TH, W, CIN), lambda n, i: (n, i, 0, 0)),
            # halo row below (clamped at the border, zeroed in-kernel)
            pl.BlockSpec((1, 1, W, CIN),
                         lambda n, i: (n, jnp.minimum(i * TH + TH, H - 1), 0, 0)),
            # weights + previous-layer BN scale/shift, resident in VMEM
            pl.BlockSpec((9, CIN, COUT), lambda n, i: (0, 0, 0)),
            pl.BlockSpec((1, CIN), lambda n, i: (0, 0)),
            pl.BlockSpec((1, CIN), lambda n, i: (0, 0)),
        ],
        out_specs=[
            pl.BlockSpec((1, TH, W, COUT), lambda n, i: (n, i, 0, 0)),
            # constant block index along i -> resident accumulator block
            pl.BlockSpec((1, 2, COUT), lambda n, i: (n, 0, 0)),
        ],
        out_shape=[
            jax.ShapeDtypeStruct((N, H, W, COUT), jnp.bfloat16),
            jax.ShapeDtypeStruct((N, 2, COUT), jnp.float32),
        ],
        compiler_params=pltpu.CompilerParams(
            dimension_semantics=("parallel", "arbitrary"),
            vmem_limit_bytes=VMEM_LIMIT),
    )(x, x, x, w_taps, scale, shift)


def bn_relu(y, scale, shift, cout, *, TH):
    """Final BN+ReLU epilogue; emits only the real channels (f32)."""
    N, H, W, C = y.shape
    nH = H // TH
    kern = functools.partial(_bn_relu_kernel, cout=cout)
    return pl.pallas_call(
        kern,
        grid=(N, nH),
        in_specs=[
            pl.BlockSpec((1, TH, W, C), lambda n, i: (n, i, 0, 0)),
            pl.BlockSpec((1, C), lambda n, i: (0, 0)),
            pl.BlockSpec((1, C), lambda n, i: (0, 0)),
        ],
        out_specs=pl.BlockSpec((1, TH, W, cout), lambda n, i: (n, i, 0, 0)),
        out_shape=jax.ShapeDtypeStruct((N, H, W, cout), jnp.float32),
        compiler_params=pltpu.CompilerParams(
            dimension_semantics=("parallel", "parallel"),
            vmem_limit_bytes=VMEM_LIMIT),
    )(y, scale, shift)


def _pack_weights(w_hwio, cin_pad, cout_pad):
    """(3,3,Cin,Cout) HWIO -> (9, Cin_pad, Cout_pad) bf16, tap-major."""
    kh, kw, cin, cout = w_hwio.shape
    wp = jnp.zeros((kh * kw, cin_pad, cout_pad), jnp.float32)
    wp = wp.at[:, :cin, :cout].set(
        w_hwio.astype(jnp.float32).reshape(kh * kw, cin, cout))
    return wp.astype(jnp.bfloat16)


def _fold_bn(stats, gamma_pad, beta_pad, m_total, eps):
    """Reduce per-image partials -> per-channel scale/shift (tiny host compute)."""
    sums = jnp.sum(stats, axis=0)                            # (2, C)
    mean = sums[0] / m_total
    var = jnp.maximum(sums[1] / m_total - mean * mean, 0.0)  # biased variance
    scale = gamma_pad * jax.lax.rsqrt(var + eps)
    shift = beta_pad - mean * scale
    return scale[None, :], shift[None, :]


@jax.jit
def double_conv_forward(x_nchw, params):
    """DoubleConv.forward: (conv3x3 -> BN -> ReLU) x 2, NCHW in / NCHW out."""
    N, Cin, H, W = x_nchw.shape
    Cout = params["w1"].shape[-1]
    assert W % 8 == 0, "W must be a multiple of the 8-row sublane tile"
    C1 = _round_up(Cin, LANE)    # lane-padded conv1 input channels
    C2 = _round_up(Cout, LANE)   # lane-padded conv1/conv2 output channels
    TH = _pick_th(H, W, max(C1, C2), C2)
    TH2 = _pick_rows(H, W, C2)
    m_total = N * H * W

    # NCHW -> NHWC, pad channels to a 128-lane multiple, store bf16.
    x = jnp.transpose(x_nchw, (0, 2, 3, 1)).astype(jnp.float32)
    x = jnp.pad(x, ((0, 0), (0, 0), (0, 0), (0, C1 - Cin))).astype(jnp.bfloat16)

    w1p = _pack_weights(params["w1"], C1, C2)
    w2p = _pack_weights(params["w2"], C2, C2)
    g1 = jnp.pad(params["g1"].astype(jnp.float32), (0, C2 - Cout))
    b1 = jnp.pad(params["be1"].astype(jnp.float32), (0, C2 - Cout))
    g2 = jnp.pad(params["g2"].astype(jnp.float32), (0, C2 - Cout))
    b2 = jnp.pad(params["be2"].astype(jnp.float32), (0, C2 - Cout))

    # Conv biases (params["b1"], params["b2"]) are intentionally not applied:
    # training-mode BN's mean subtraction cancels them exactly.
    ident_s = jnp.ones((1, C1), jnp.float32)
    ident_b = jnp.zeros((1, C1), jnp.float32)

    # Block 1: conv + per-image BN partials.
    y1, st1 = conv3x3_bn_stats(x, w1p, ident_s, ident_b, TH=TH, apply_act=False)
    s1, sh1 = _fold_bn(st1, g1, b1, m_total, EPS)

    # Block 2: BN1+ReLU fused into conv2's input load, conv + partials.
    y2, st2 = conv3x3_bn_stats(y1, w2p, s1, sh1, TH=TH, apply_act=True)
    s2, sh2 = _fold_bn(st2, g2, b2, m_total, EPS)

    # Final BN2 + ReLU epilogue (real channels emitted in-kernel).
    out = bn_relu(y2, s2, sh2, Cout, TH=TH2)

    # NHWC (real channels) -> NCHW; transpose acts on the real-sized array only.
    return jnp.transpose(out, (0, 3, 1, 2))


# ------------------------------ parameter init ------------------------------ #

def init_params(key, in_channels, out_channels):
    """Conv2d-style uniform init; BN gamma=1, beta=0 (fresh PyTorch module)."""
    k1, k2, k3, k4 = jax.random.split(key, 4)

    def conv_init(kw, kb, cin, cout):
        fan_in = cin * 9
        bound = 1.0 / (fan_in ** 0.5)
        w = jax.random.uniform(kw, (3, 3, cin, cout), jnp.float32, -bound, bound)
        b = jax.random.uniform(kb, (cout,), jnp.float32, -bound, bound)
        return w, b

    w1, b1 = conv_init(k1, k2, in_channels, out_channels)
    w2, b2 = conv_init(k3, k4, out_channels, out_channels)
    ones = jnp.ones((out_channels,), jnp.float32)
    zeros = jnp.zeros((out_channels,), jnp.float32)
    return dict(w1=w1, b1=b1, g1=ones, be1=zeros,
                w2=w2, b2=b2, g2=ones, be2=zeros)


# --------------------------- pure-JAX reference ----------------------------- #

def double_conv_reference(x_nchw, params, eps=EPS):
    x = jnp.transpose(x_nchw, (0, 2, 3, 1))

    def block(x, w, b, g, be):
        y = jax.lax.conv_general_dilated(
            x, w, (1, 1), "SAME",
            dimension_numbers=("NHWC", "HWIO", "NHWC")) + b
        mean = jnp.mean(y, axis=(0, 1, 2), keepdims=True)
        var = jnp.mean((y - mean) ** 2, axis=(0, 1, 2), keepdims=True)
        y = (y - mean) * jax.lax.rsqrt(var + eps) * g + be
        return jnp.maximum(y, 0.0)

    x = block(x, params["w1"], params["b1"], params["g1"], params["be1"])
    x = block(x, params["w2"], params["b2"], params["g2"], params["be2"])
    return jnp.transpose(x, (0, 3, 1, 2))


# ----------------------------------- main ----------------------------------- #

if __name__ == "__main__":
    key = jax.random.PRNGKey(0)
    kx, kp = jax.random.split(key)

    in_channels, out_channels = 4, 8
    x = jax.random.normal(kx, (2, in_channels, 16, 16), jnp.float32)  # NCHW
    params = init_params(kp, in_channels, out_channels)

    out = jax.block_until_ready(double_conv_forward(x, params))
    assert out.shape == (2, out_channels, 16, 16), out.shape

    ref = jax.block_until_ready(double_conv_reference(x, params))
    max_err = float(jnp.max(jnp.abs(out - ref)))
    mean_err = float(jnp.mean(jnp.abs(out - ref)))
    # bf16 MXU operands + bf16 inter-layer storage -> ~1e-2-level differences
    # vs. the all-f32 reference; a structurally wrong kernel would be O(1) off.
    assert max_err < 1.2e-1, (max_err, mean_err)
    assert mean_err < 2e-2, (max_err, mean_err)

    print("KERNEL_OK")
</pallas_src>

<mosaic_0001>
module attributes {stable_mosaic.version = 11 : i64} {
  func.func @_conv_kernel(%arg0: i32, %arg1: i32, %arg2: memref<1x1x16x128xbf16, #tpu.memory_space<vmem>>, %arg3: memref<1x16x16x128xbf16, #tpu.memory_space<vmem>>, %arg4: memref<1x1x16x128xbf16, #tpu.memory_space<vmem>>, %arg5: memref<9x128x128xbf16, #tpu.memory_space<vmem>>, %arg6: memref<1x128xf32, #tpu.memory_space<vmem>>, %arg7: memref<1x128xf32, #tpu.memory_space<vmem>>, %arg8: memref<1x16x16x128xbf16, #tpu.memory_space<vmem>>, %arg9: memref<1x2x128xf32, #tpu.memory_space<vmem>>) attributes {dimension_semantics = [#tpu.dimension_semantics<parallel>, #tpu.dimension_semantics<arbitrary>], iteration_bounds = array<i64: 2, 1>, scalar_prefetch = 0 : i64, scratch_operands = 0 : i64, tpu.core_type = #tpu.core_type<tc>, window_params = [{transform_indices = @transform_0, window_bounds = array<i64: 1, 1, 16, 128>}, {transform_indices = @transform_1, window_bounds = array<i64: 1, 16, 16, 128>}, {transform_indices = @transform_2, window_bounds = array<i64: 1, 1, 16, 128>}, {pipeline_mode = #tpu.pipeline_mode<synchronous>, transform_indices = @transform_3, window_bounds = array<i64: 9, 128, 128>}, {pipeline_mode = #tpu.pipeline_mode<synchronous>, transform_indices = @transform_4, window_bounds = array<i64: 1, 128>}, {pipeline_mode = #tpu.pipeline_mode<synchronous>, transform_indices = @transform_5, window_bounds = array<i64: 1, 128>}, {transform_indices = @transform_6, window_bounds = array<i64: 1, 16, 16, 128>}, {transform_indices = @transform_7, window_bounds = array<i64: 1, 2, 128>}]} {
    %c0 = arith.constant 0 : index
    %c0_0 = arith.constant 0 : index
    %c0_1 = arith.constant 0 : index
    %c0_2 = arith.constant 0 : index
    %0 = vector.load %arg2[%c0, %c0_0, %c0_1, %c0_2] : memref<1x1x16x128xbf16, #tpu.memory_space<vmem>>, vector<1x1x16x128xbf16>
    %1 = vector.shape_cast %0 : vector<1x1x16x128xbf16> to vector<1x16x128xbf16>
    %2 = arith.extf %1 : vector<1x16x128xbf16> to vector<1x16x128xf32>
    %c0_3 = arith.constant 0 : index
    %c0_4 = arith.constant 0 : index
    %c0_5 = arith.constant 0 : index
    %c0_6 = arith.constant 0 : index
    %3 = vector.load %arg3[%c0_3, %c0_4, %c0_5, %c0_6] : memref<1x16x16x128xbf16, #tpu.memory_space<vmem>>, vector<1x16x16x128xbf16>
    %4 = vector.shape_cast %3 : vector<1x16x16x128xbf16> to vector<16x16x128xbf16>
    %5 = arith.extf %4 : vector<16x16x128xbf16> to vector<16x16x128xf32>
    %c0_7 = arith.constant 0 : index
    %c0_8 = arith.constant 0 : index
    %c0_9 = arith.constant 0 : index
    %c0_10 = arith.constant 0 : index
    %6 = vector.load %arg4[%c0_7, %c0_8, %c0_9, %c0_10] : memref<1x1x16x128xbf16, #tpu.memory_space<vmem>>, vector<1x1x16x128xbf16>
    %7 = vector.shape_cast %6 : vector<1x1x16x128xbf16> to vector<1x16x128xbf16>
    %8 = arith.extf %7 : vector<1x16x128xbf16> to vector<1x16x128xf32>
    %c0_i32 = arith.constant 0 : i32
    %9 = arith.cmpi sgt, %arg1, %c0_i32 : i32
    %10 = arith.extui %9 : i1 to i32
    %11 = arith.sitofp %10 : i32 to f32
    %12 = vector.broadcast %11 : f32 to vector<1x16x128xf32>
    %13 = arith.mulf %2, %12 : vector<1x16x128xf32>
    %c0_i32_11 = arith.constant 0 : i32
    %14 = arith.cmpi slt, %arg1, %c0_i32_11 : i32
    %15 = arith.extui %14 : i1 to i32
    %16 = arith.sitofp %15 : i32 to f32
    %17 = vector.broadcast %16 : f32 to vector<1x16x128xf32>
    %18 = arith.mulf %8, %17 : vector<1x16x128xf32>
    %19 = tpu.concatenate %13, %5, %18 in 0 : vector<1x16x128xf32>, vector<16x16x128xf32>, vector<1x16x128xf32> -> vector<18x16x128xf32>
    %cst = arith.constant 0.000000e+00 : f32
    %20 = vector.broadcast %cst : f32 to vector<18x1x128xf32>
    %21 = vector.extract_strided_slice %19 {offsets = [0, 0, 0], sizes = [18, 15, 128], strides = [1, 1, 1]} : vector<18x16x128xf32> to vector<18x15x128xf32>
    %22 = tpu.concatenate %20, %21 in 1 : vector<18x1x128xf32>, vector<18x15x128xf32> -> vector<18x16x128xf32>
    %23 = vector.extract_strided_slice %19 {offsets = [0, 1, 0], sizes = [18, 15, 128], strides = [1, 1, 1]} : vector<18x16x128xf32> to vector<18x15x128xf32>
    %24 = tpu.concatenate %23, %20 in 1 : vector<18x15x128xf32>, vector<18x1x128xf32> -> vector<18x16x128xf32>
    %25 = vector.shape_cast %22 : vector<18x16x128xf32> to vector<288x128xf32>
    %26 = vector.shape_cast %19 : vector<18x16x128xf32> to vector<288x128xf32>
    %27 = vector.shape_cast %24 : vector<18x16x128xf32> to vector<288x128xf32>
    %cst_12 = arith.constant 0.000000e+00 : f32
    %28 = vector.broadcast %cst_12 : f32 to vector<256x128xf32>
    %29 = vector.extract_strided_slice %25 {offsets = [0, 0], sizes = [256, 128], strides = [1, 1]} : vector<288x128xf32> to vector<256x128xf32>
    %30 = arith.truncf %29 : vector<256x128xf32> to vector<256x128xbf16>
    %c0_13 = arith.constant 0 : index
    %c0_14 = arith.constant 0 : index
    %c0_15 = arith.constant 0 : index
    %31 = vector.load %arg5[%c0_13, %c0_14, %c0_15] : memref<9x128x128xbf16, #tpu.memory_space<vmem>>, vector<1x128x128xbf16>
    %32 = vector.shape_cast %31 : vector<1x128x128xbf16> to vector<128x128xbf16>
    %cst_16 = arith.constant dense<0.000000e+00> : vector<256x128xf32>
    %33 = tpu.matmul %30, %32, %cst_16 {dimension_numbers = #tpu.dot_dimension_numbers<[1], [0], [0], [1], [0, 0, 1, 1], [], []>} : vector<256x128xbf16>, vector<128x128xbf16>, vector<256x128xf32> -> vector<256x128xf32>
    %34 = arith.addf %28, %33 : vector<256x128xf32>
    %35 = vector.extract_strided_slice %26 {offsets = [0, 0], sizes = [256, 128], strides = [1, 1]} : vector<288x128xf32> to vector<256x128xf32>
    %36 = arith.truncf %35 : vector<256x128xf32> to vector<256x128xbf16>
    %c1 = arith.constant 1 : index
    %c0_17 = arith.constant 0 : index
    %c0_18 = arith.constant 0 : index
    %37 = vector.load %arg5[%c1, %c0_17, %c0_18] : memref<9x128x128xbf16, #tpu.memory_space<vmem>>, vector<1x128x128xbf16>
    %38 = vector.shape_cast %37 : vector<1x128x128xbf16> to vector<128x128xbf16>
    %cst_19 = arith.constant dense<0.000000e+00> : vector<256x128xf32>
    %39 = tpu.matmul %36, %38, %cst_19 {dimension_numbers = #tpu.dot_dimension_numbers<[1], [0], [0], [1], [0, 0, 1, 1], [], []>} : vector<256x128xbf16>, vector<128x128xbf16>, vector<256x128xf32> -> vector<256x128xf32>
    %40 = arith.addf %34, %39 : vector<256x128xf32>
    %41 = vector.extract_strided_slice %27 {offsets = [0, 0], sizes = [256, 128], strides = [1, 1]} : vector<288x128xf32> to vector<256x128xf32>
    %42 = arith.truncf %41 : vector<256x128xf32> to vector<256x128xbf16>
    %c2 = arith.constant 2 : index
    %c0_20 = arith.constant 0 : index
    %c0_21 = arith.constant 0 : index
    %43 = vector.load %arg5[%c2, %c0_20, %c0_21] : memref<9x128x128xbf16, #tpu.memory_space<vmem>>, vector<1x128x128xbf16>
    %44 = vector.shape_cast %43 : vector<1x128x128xbf16> to vector<128x128xbf16>
    %cst_22 = arith.constant dense<0.000000e+00> : vector<256x128xf32>
    %45 = tpu.matmul %42, %44, %cst_22 {dimension_numbers = #tpu.dot_dimension_numbers<[1], [0], [0], [1], [0, 0, 1, 1], [], []>} : vector<256x128xbf16>, vector<128x128xbf16>, vector<256x128xf32> -> vector<256x128xf32>
    %46 = arith.addf %40, %45 : vector<256x128xf32>
    %47 = vector.extract_strided_slice %25 {offsets = [16, 0], sizes = [256, 128], strides = [1, 1]} : vector<288x128xf32> to vector<256x128xf32>
    %48 = arith.truncf %47 : vector<256x128xf32> to vector<256x128xbf16>
    %c3 = arith.constant 3 : index
    %c0_23 = arith.constant 0 : index
    %c0_24 = arith.constant 0 : index
    %49 = vector.load %arg5[%c3, %c0_23, %c0_24] : memref<9x128x128xbf16, #tpu.memory_space<vmem>>, vector<1x128x128xbf16>
    %50 = vector.shape_cast %49 : vector<1x128x128xbf16> to vector<128x128xbf16>
    %cst_25 = arith.constant dense<0.000000e+00> : vector<256x128xf32>
    %51 = tpu.matmul %48, %50, %cst_25 {dimension_numbers = #tpu.dot_dimension_numbers<[1], [0], [0], [1], [0, 0, 1, 1], [], []>} : vector<256x128xbf16>, vector<128x128xbf16>, vector<256x128xf32> -> vector<256x128xf32>
    %52 = arith.addf %46, %51 : vector<256x128xf32>
    %53 = vector.extract_strided_slice %26 {offsets = [16, 0], sizes = [256, 128], strides = [1, 1]} : vector<288x128xf32> to vector<256x128xf32>
    %54 = arith.truncf %53 : vector<256x128xf32> to vector<256x128xbf16>
    %c4 = arith.constant 4 : index
    %c0_26 = arith.constant 0 : index
    %c0_27 = arith.constant 0 : index
    %55 = vector.load %arg5[%c4, %c0_26, %c0_27] : memref<9x128x128xbf16, #tpu.memory_space<vmem>>, vector<1x128x128xbf16>
    %56 = vector.shape_cast %55 : vector<1x128x128xbf16> to vector<128x128xbf16>
    %cst_28 = arith.constant dense<0.000000e+00> : vector<256x128xf32>
    %57 = tpu.matmul %54, %56, %cst_28 {dimension_numbers = #tpu.dot_dimension_numbers<[1], [0], [0], [1], [0, 0, 1, 1], [], []>} : vector<256x128xbf16>, vector<128x128xbf16>, vector<256x128xf32> -> vector<256x128xf32>
    %58 = arith.addf %52, %57 : vector<256x128xf32>
    %59 = vector.extract_strided_slice %27 {offsets = [16, 0], sizes = [256, 128], strides = [1, 1]} : vector<288x128xf32> to vector<256x128xf32>
    %60 = arith.truncf %59 : vector<256x128xf32> to vector<256x128xbf16>
    %c5 = arith.constant 5 : index
    %c0_29 = arith.constant 0 : index
    %c0_30 = arith.constant 0 : index
    %61 = vector.load %arg5[%c5, %c0_29, %c0_30] : memref<9x128x128xbf16, #tpu.memory_space<vmem>>, vector<1x128x128xbf16>
    %62 = vector.shape_cast %61 : vector<1x128x128xbf16> to vector<128x128xbf16>
    %cst_31 = arith.constant dense<0.000000e+00> : vector<256x128xf32>
    %63 = tpu.matmul %60, %62, %cst_31 {dimension_numbers = #tpu.dot_dimension_numbers<[1], [0], [0], [1], [0, 0, 1, 1], [], []>} : vector<256x128xbf16>, vector<128x128xbf16>, vector<256x128xf32> -> vector<256x128xf32>
    %64 = arith.addf %58, %63 : vector<256x128xf32>
    %65 = vector.extract_strided_slice %25 {offsets = [32, 0], sizes = [256, 128], strides = [1, 1]} : vector<288x128xf32> to vector<256x128xf32>
    %66 = arith.truncf %65 : vector<256x128xf32> to vector<256x128xbf16>
    %c6 = arith.constant 6 : index
    %c0_32 = arith.constant 0 : index
    %c0_33 = arith.constant 0 : index
    %67 = vector.load %arg5[%c6, %c0_32, %c0_33] : memref<9x128x128xbf16, #tpu.memory_space<vmem>>, vector<1x128x128xbf16>
    %68 = vector.shape_cast %67 : vector<1x128x128xbf16> to vector<128x128xbf16>
    %cst_34 = arith.constant dense<0.000000e+00> : vector<256x128xf32>
    %69 = tpu.matmul %66, %68, %cst_34 {dimension_numbers = #tpu.dot_dimension_numbers<[1], [0], [0], [1], [0, 0, 1, 1], [], []>} : vector<256x128xbf16>, vector<128x128xbf16>, vector<256x128xf32> -> vector<256x128xf32>
    %70 = arith.addf %64, %69 : vector<256x128xf32>
    %71 = vector.extract_strided_slice %26 {offsets = [32, 0], sizes = [256, 128], strides = [1, 1]} : vector<288x128xf32> to vector<256x128xf32>
    %72 = arith.truncf %71 : vector<256x128xf32> to vector<256x128xbf16>
    %c7 = arith.constant 7 : index
    %c0_35 = arith.constant 0 : index
    %c0_36 = arith.constant 0 : index
    %73 = vector.load %arg5[%c7, %c0_35, %c0_36] : memref<9x128x128xbf16, #tpu.memory_space<vmem>>, vector<1x128x128xbf16>
    %74 = vector.shape_cast %73 : vector<1x128x128xbf16> to vector<128x128xbf16>
    %cst_37 = arith.constant dense<0.000000e+00> : vector<256x128xf32>
    %75 = tpu.matmul %72, %74, %cst_37 {dimension_numbers = #tpu.dot_dimension_numbers<[1], [0], [0], [1], [0, 0, 1, 1], [], []>} : vector<256x128xbf16>, vector<128x128xbf16>, vector<256x128xf32> -> vector<256x128xf32>
    %76 = arith.addf %70, %75 : vector<256x128xf32>
    %77 = vector.extract_strided_slice %27 {offsets = [32, 0], sizes = [256, 128], strides = [1, 1]} : vector<288x128xf32> to vector<256x128xf32>
    %78 = arith.truncf %77 : vector<256x128xf32> to vector<256x128xbf16>
    %c8 = arith.constant 8 : index
    %c0_38 = arith.constant 0 : index
    %c0_39 = arith.constant 0 : index
    %79 = vector.load %arg5[%c8, %c0_38, %c0_39] : memref<9x128x128xbf16, #tpu.memory_space<vmem>>, vector<1x128x128xbf16>
    %80 = vector.shape_cast %79 : vector<1x128x128xbf16> to vector<128x128xbf16>
    %cst_40 = arith.constant dense<0.000000e+00> : vector<256x128xf32>
    %81 = tpu.matmul %78, %80, %cst_40 {dimension_numbers = #tpu.dot_dimension_numbers<[1], [0], [0], [1], [0, 0, 1, 1], [], []>} : vector<256x128xbf16>, vector<128x128xbf16>, vector<256x128xf32> -> vector<256x128xf32>
    %82 = arith.addf %76, %81 : vector<256x128xf32>
    %83 = vector.shape_cast %82 : vector<256x128xf32> to vector<1x16x16x128xf32>
    %84 = arith.truncf %83 : vector<1x16x16x128xf32> to vector<1x16x16x128xbf16>
    %c0_41 = arith.constant 0 : index
    %c0_42 = arith.constant 0 : index
    %c0_43 = arith.constant 0 : index
    %c0_44 = arith.constant 0 : index
    %85 = vector.load %arg8[%c0_41, %c0_42, %c0_43, %c0_44] : memref<1x16x16x128xbf16, #tpu.memory_space<vmem>>, vector<1x16x16x128xbf16>
    tpu.vector_store %arg8[%c0_41, %c0_42, %c0_43, %c0_44], %84 {strides = array<i32>} : memref<1x16x16x128xbf16, #tpu.memory_space<vmem>>, vector<1x16x16x128xbf16>,
    %cst_45 = arith.constant dense<0.000000e+00> : vector<128xf32>
    %86 = vector.multi_reduction <add>, %82, %cst_45 [0] : vector<256x128xf32> to vector<128xf32>
    %87 = vector.shape_cast %86 : vector<128xf32> to vector<1x128xf32>
    %88 = arith.mulf %82, %82 : vector<256x128xf32>
    %cst_46 = arith.constant dense<0.000000e+00> : vector<128xf32>
    %89 = vector.multi_reduction <add>, %88, %cst_46 [0] : vector<256x128xf32> to vector<128xf32>
    %90 = vector.shape_cast %89 : vector<128xf32> to vector<1x128xf32>
    %91 = tpu.concatenate %87, %90 in 0 : vector<1x128xf32>, vector<1x128xf32> -> vector<2x128xf32>
    %92 = vector.shape_cast %91 : vector<2x128xf32> to vector<1x2x128xf32>
    %c0_i32_47 = arith.constant 0 : i32
    %93 = arith.cmpi eq, %arg1, %c0_i32_47 : i32
    %94 = arith.extui %93 : i1 to i32
    %c0_i32_48 = arith.constant 0 : i32
    %95 = arith.cmpi ne, %94, %c0_i32_48 : i32
    scf.if %95 {
      %c0_51 = arith.constant 0 : index
      %c0_52 = arith.constant 0 : index
      %c0_53 = arith.constant 0 : index
      %99 = vector.load %arg9[%c0_51, %c0_52, %c0_53] : memref<1x2x128xf32, #tpu.memory_space<vmem>>, vector<1x2x128xf32>
      tpu.vector_store %arg9[%c0_51, %c0_52, %c0_53], %92 {strides = array<i32>} : memref<1x2x128xf32, #tpu.memory_space<vmem>>, vector<1x2x128xf32>,
    } else {
    }
    %c0_i32_49 = arith.constant 0 : i32
    %96 = arith.cmpi sgt, %arg1, %c0_i32_49 : i32
    %97 = arith.extui %96 : i1 to i32
    %c0_i32_50 = arith.constant 0 : i32
    %98 = arith.cmpi ne, %97, %c0_i32_50 : i32
    scf.if %98 {
      %c0_51 = arith.constant 0 : index
      %c0_52 = arith.constant 0 : index
      %c0_53 = arith.constant 0 : index
      %99 = vector.load %arg9[%c0_51, %c0_52, %c0_53] : memref<1x2x128xf32, #tpu.memory_space<vmem>>, vector<1x2x128xf32>
      %100 = arith.addf %99, %92 : vector<1x2x128xf32>
      %c0_54 = arith.constant 0 : index
      %c0_55 = arith.constant 0 : index
      %c0_56 = arith.constant 0 : index
      %101 = vector.load %arg9[%c0_54, %c0_55, %c0_56] : memref<1x2x128xf32, #tpu.memory_space<vmem>>, vector<1x2x128xf32>
      tpu.vector_store %arg9[%c0_54, %c0_55, %c0_56], %100 {strides = array<i32>} : memref<1x2x128xf32, #tpu.memory_space<vmem>>, vector<1x2x128xf32>,
    } else {
    }
    return
  }
  func.func @transform_0(%arg0: i32, %arg1: i32) -> (i32, i32, i32, i32) {
    %c16_i32 = arith.constant 16 : i32
    %0 = arith.muli %arg1, %c16_i32 : i32
    %c1_i32 = arith.constant 1 : i32
    %1 = arith.subi %0, %c1_i32 : i32
    %c0_i32 = arith.constant 0 : i32
    %2 = arith.maxsi %1, %c0_i32 : i32
    %c0_i32_0 = arith.constant 0 : i32
    %c0_i32_1 = arith.constant 0 : i32
    %c0_i32_2 = arith.constant 0 : i32
    return %arg0, %2, %c0_i32_0, %c0_i32_1 : i32, i32, i32, i32
  }
  func.func @transform_1(%arg0: i32, %arg1: i32) -> (i32, i32, i32, i32) {
    %c0_i32 = arith.constant 0 : i32
    %c0_i32_0 = arith.constant 0 : i32
    %c0_i32_1 = arith.constant 0 : i32
    return %arg0, %arg1, %c0_i32, %c0_i32_0 : i32, i32, i32, i32
  }
  func.func @transform_2(%arg0: i32, %arg1: i32) -> (i32, i32, i32, i32) {
    %c16_i32 = arith.constant 16 : i32
    %0 = arith.muli %arg1, %c16_i32 : i32
    %c16_i32_0 = arith.constant 16 : i32
    %1 = arith.addi %0, %c16_i32_0 : i32
    %c15_i32 = arith.constant 15 : i32
    %2 = arith.minsi %1, %c15_i32 : i32
    %c0_i32 = arith.constant 0 : i32
    %c0_i32_1 = arith.constant 0 : i32
    %c0_i32_2 = arith.constant 0 : i32
    return %arg0, %2, %c0_i32, %c0_i32_1 : i32, i32, i32, i32
  }
  func.func @transform_3(%arg0: i32, %arg1: i32) -> (i32, i32, i32) {
    %c0_i32 = arith.constant 0 : i32
    %c0_i32_0 = arith.constant 0 : i32
    %c0_i32_1 = arith.constant 0 : i32
    %c0_i32_2 = arith.constant 0 : i32
    return %c0_i32, %c0_i32_0, %c0_i32_1 : i32, i32, i32
  }
  func.func @transform_4(%arg0: i32, %arg1: i32) -> (i32, i32) {
    %c0_i32 = arith.constant 0 : i32
    %c0_i32_0 = arith.constant 0 : i32
    %c0_i32_1 = arith.constant 0 : i32
    return %c0_i32, %c0_i32_0 : i32, i32
  }
  func.func @transform_5(%arg0: i32, %arg1: i32) -> (i32, i32) {
    %c0_i32 = arith.constant 0 : i32
    %c0_i32_0 = arith.constant 0 : i32
    %c0_i32_1 = arith.constant 0 : i32
    return %c0_i32, %c0_i32_0 : i32, i32
  }
  func.func @transform_6(%arg0: i32, %arg1: i32) -> (i32, i32, i32, i32) {
    %c0_i32 = arith.constant 0 : i32
    %c0_i32_0 = arith.constant 0 : i32
    %c0_i32_1 = arith.constant 0 : i32
    return %arg0, %arg1, %c0_i32, %c0_i32_0 : i32, i32, i32, i32
  }
  func.func @transform_7(%arg0: i32, %arg1: i32) -> (i32, i32, i32) {
    %c0_i32 = arith.constant 0 : i32
    %c0_i32_0 = arith.constant 0 : i32
    %c0_i32_1 = arith.constant 0 : i32
    return %arg0, %c0_i32, %c0_i32_0 : i32, i32, i32
  }
}

module attributes {stable_mosaic.version = 11 : i64} {
  func.func @_conv_kernel(%arg0: i32, %arg1: i32, %arg2: memref<1x1x16x128xbf16, #tpu.memory_space<vmem>>, %arg3: memref<1x16x16x128xbf16, #tpu.memory_space<vmem>>, %arg4: memref<1x1x16x128xbf16, #tpu.memory_space<vmem>>, %arg5: memref<9x128x128xbf16, #tpu.memory_space<vmem>>, %arg6: memref<1x128xf32, #tpu.memory_space<vmem>>, %arg7: memref<1x128xf32, #tpu.memory_space<vmem>>, %arg8: memref<1x16x16x128xbf16, #tpu.memory_space<vmem>>, %arg9: memref<1x2x128xf32, #tpu.memory_space<vmem>>) attributes {dimension_semantics = [#tpu.dimension_semantics<parallel>, #tpu.dimension_semantics<arbitrary>], iteration_bounds = array<i64: 2, 1>, scalar_prefetch = 0 : i64, scratch_operands = 0 : i64, tpu.core_type = #tpu.core_type<tc>, window_params = [{transform_indices = @transform_0, window_bounds = array<i64: 1, 1, 16, 128>}, {transform_indices = @transform_1, window_bounds = array<i64: 1, 16, 16, 128>}, {transform_indices = @transform_2, window_bounds = array<i64: 1, 1, 16, 128>}, {pipeline_mode = #tpu.pipeline_mode<synchronous>, transform_indices = @transform_3, window_bounds = array<i64: 9, 128, 128>}, {pipeline_mode = #tpu.pipeline_mode<synchronous>, transform_indices = @transform_4, window_bounds = array<i64: 1, 128>}, {pipeline_mode = #tpu.pipeline_mode<synchronous>, transform_indices = @transform_5, window_bounds = array<i64: 1, 128>}, {transform_indices = @transform_6, window_bounds = array<i64: 1, 16, 16, 128>}, {transform_indices = @transform_7, window_bounds = array<i64: 1, 2, 128>}]} {
    %c0 = arith.constant 0 : index
    %c0_0 = arith.constant 0 : index
    %c0_1 = arith.constant 0 : index
    %c0_2 = arith.constant 0 : index
    %0 = vector.load %arg2[%c0, %c0_0, %c0_1, %c0_2] : memref<1x1x16x128xbf16, #tpu.memory_space<vmem>>, vector<1x1x16x128xbf16>
    %1 = vector.shape_cast %0 : vector<1x1x16x128xbf16> to vector<1x16x128xbf16>
    %2 = arith.extf %1 : vector<1x16x128xbf16> to vector<1x16x128xf32>
    %c0_3 = arith.constant 0 : index
    %c0_4 = arith.constant 0 : index
    %c0_5 = arith.constant 0 : index
    %c0_6 = arith.constant 0 : index
    %3 = vector.load %arg3[%c0_3, %c0_4, %c0_5, %c0_6] : memref<1x16x16x128xbf16, #tpu.memory_space<vmem>>, vector<1x16x16x128xbf16>
    %4 = vector.shape_cast %3 : vector<1x16x16x128xbf16> to vector<16x16x128xbf16>
    %5 = arith.extf %4 : vector<16x16x128xbf16> to vector<16x16x128xf32>
    %c0_7 = arith.constant 0 : index
    %c0_8 = arith.constant 0 : index
    %c0_9 = arith.constant 0 : index
    %c0_10 = arith.constant 0 : index
    %6 = vector.load %arg4[%c0_7, %c0_8, %c0_9, %c0_10] : memref<1x1x16x128xbf16, #tpu.memory_space<vmem>>, vector<1x1x16x128xbf16>
    %7 = vector.shape_cast %6 : vector<1x1x16x128xbf16> to vector<1x16x128xbf16>
    %8 = arith.extf %7 : vector<1x16x128xbf16> to vector<1x16x128xf32>
    %c0_11 = arith.constant 0 : index
    %c0_12 = arith.constant 0 : index
    %9 = vector.load %arg6[%c0_11, %c0_12] : memref<1x128xf32, #tpu.memory_space<vmem>>, vector<1x128xf32>
    %10 = vector.shape_cast %9 : vector<1x128xf32> to vector<1x1x128xf32>
    %c0_13 = arith.constant 0 : index
    %c0_14 = arith.constant 0 : index
    %11 = vector.load %arg7[%c0_13, %c0_14] : memref<1x128xf32, #tpu.memory_space<vmem>>, vector<1x128xf32>
    %12 = vector.shape_cast %11 : vector<1x128xf32> to vector<1x1x128xf32>
    %13 = vector.broadcast %10 : vector<1x1x128xf32> to vector<1x16x128xf32>
    %14 = arith.mulf %2, %13 : vector<1x16x128xf32>
    %15 = vector.broadcast %12 : vector<1x1x128xf32> to vector<1x16x128xf32>
    %16 = arith.addf %14, %15 : vector<1x16x128xf32>
    %cst = arith.constant 0.000000e+00 : f32
    %17 = vector.broadcast %cst : f32 to vector<1x16x128xf32>
    %18 = arith.maximumf %16, %17 : vector<1x16x128xf32>
    %19 = vector.broadcast %10 : vector<1x1x128xf32> to vector<16x16x128xf32>
    %20 = arith.mulf %5, %19 : vector<16x16x128xf32>
    %21 = vector.broadcast %12 : vector<1x1x128xf32> to vector<16x16x128xf32>
    %22 = arith.addf %20, %21 : vector<16x16x128xf32>
    %cst_15 = arith.constant 0.000000e+00 : f32
    %23 = vector.broadcast %cst_15 : f32 to vector<16x16x128xf32>
    %24 = arith.maximumf %22, %23 : vector<16x16x128xf32>
    %25 = vector.broadcast %10 : vector<1x1x128xf32> to vector<1x16x128xf32>
    %26 = arith.mulf %8, %25 : vector<1x16x128xf32>
    %27 = vector.broadcast %12 : vector<1x1x128xf32> to vector<1x16x128xf32>
    %28 = arith.addf %26, %27 : vector<1x16x128xf32>
    %cst_16 = arith.constant 0.000000e+00 : f32
    %29 = vector.broadcast %cst_16 : f32 to vector<1x16x128xf32>
    %30 = arith.maximumf %28, %29 : vector<1x16x128xf32>
    %c0_i32 = arith.constant 0 : i32
    %31 = arith.cmpi sgt, %arg1, %c0_i32 : i32
    %32 = arith.extui %31 : i1 to i32
    %33 = arith.sitofp %32 : i32 to f32
    %34 = vector.broadcast %33 : f32 to vector<1x16x128xf32>
    %35 = arith.mulf %18, %34 : vector<1x16x128xf32>
    %c0_i32_17 = arith.constant 0 : i32
    %36 = arith.cmpi slt, %arg1, %c0_i32_17 : i32
    %37 = arith.extui %36 : i1 to i32
    %38 = arith.sitofp %37 : i32 to f32
    %39 = vector.broadcast %38 : f32 to vector<1x16x128xf32>
    %40 = arith.mulf %30, %39 : vector<1x16x128xf32>
    %41 = tpu.concatenate %35, %24, %40 in 0 : vector<1x16x128xf32>, vector<16x16x128xf32>, vector<1x16x128xf32> -> vector<18x16x128xf32>
    %cst_18 = arith.constant 0.000000e+00 : f32
    %42 = vector.broadcast %cst_18 : f32 to vector<18x1x128xf32>
    %43 = vector.extract_strided_slice %41 {offsets = [0, 0, 0], sizes = [18, 15, 128], strides = [1, 1, 1]} : vector<18x16x128xf32> to vector<18x15x128xf32>
    %44 = tpu.concatenate %42, %43 in 1 : vector<18x1x128xf32>, vector<18x15x128xf32> -> vector<18x16x128xf32>
    %45 = vector.extract_strided_slice %41 {offsets = [0, 1, 0], sizes = [18, 15, 128], strides = [1, 1, 1]} : vector<18x16x128xf32> to vector<18x15x128xf32>
    %46 = tpu.concatenate %45, %42 in 1 : vector<18x15x128xf32>, vector<18x1x128xf32> -> vector<18x16x128xf32>
    %47 = vector.shape_cast %44 : vector<18x16x128xf32> to vector<288x128xf32>
    %48 = vector.shape_cast %41 : vector<18x16x128xf32> to vector<288x128xf32>
    %49 = vector.shape_cast %46 : vector<18x16x128xf32> to vector<288x128xf32>
    %cst_19 = arith.constant 0.000000e+00 : f32
    %50 = vector.broadcast %cst_19 : f32 to vector<256x128xf32>
    %51 = vector.extract_strided_slice %47 {offsets = [0, 0], sizes = [256, 128], strides = [1, 1]} : vector<288x128xf32> to vector<256x128xf32>
    %52 = arith.truncf %51 : vector<256x128xf32> to vector<256x128xbf16>
    %c0_20 = arith.constant 0 : index
    %c0_21 = arith.constant 0 : index
    %c0_22 = arith.constant 0 : index
    %53 = vector.load %arg5[%c0_20, %c0_21, %c0_22] : memref<9x128x128xbf16, #tpu.memory_space<vmem>>, vector<1x128x128xbf16>
    %54 = vector.shape_cast %53 : vector<1x128x128xbf16> to vector<128x128xbf16>
    %cst_23 = arith.constant dense<0.000000e+00> : vector<256x128xf32>
    %55 = tpu.matmul %52, %54, %cst_23 {dimension_numbers = #tpu.dot_dimension_numbers<[1], [0], [0], [1], [0, 0, 1, 1], [], []>} : vector<256x128xbf16>, vector<128x128xbf16>, vector<256x128xf32> -> vector<256x128xf32>
    %56 = arith.addf %50, %55 : vector<256x128xf32>
    %57 = vector.extract_strided_slice %48 {offsets = [0, 0], sizes = [256, 128], strides = [1, 1]} : vector<288x128xf32> to vector<256x128xf32>
    %58 = arith.truncf %57 : vector<256x128xf32> to vector<256x128xbf16>
    %c1 = arith.constant 1 : index
    %c0_24 = arith.constant 0 : index
    %c0_25 = arith.constant 0 : index
    %59 = vector.load %arg5[%c1, %c0_24, %c0_25] : memref<9x128x128xbf16, #tpu.memory_space<vmem>>, vector<1x128x128xbf16>
    %60 = vector.shape_cast %59 : vector<1x128x128xbf16> to vector<128x128xbf16>
    %cst_26 = arith.constant dense<0.000000e+00> : vector<256x128xf32>
    %61 = tpu.matmul %58, %60, %cst_26 {dimension_numbers = #tpu.dot_dimension_numbers<[1], [0], [0], [1], [0, 0, 1, 1], [], []>} : vector<256x128xbf16>, vector<128x128xbf16>, vector<256x128xf32> -> vector<256x128xf32>
    %62 = arith.addf %56, %61 : vector<256x128xf32>
    %63 = vector.extract_strided_slice %49 {offsets = [0, 0], sizes = [256, 128], strides = [1, 1]} : vector<288x128xf32> to vector<256x128xf32>
    %64 = arith.truncf %63 : vector<256x128xf32> to vector<256x128xbf16>
    %c2 = arith.constant 2 : index
    %c0_27 = arith.constant 0 : index
    %c0_28 = arith.constant 0 : index
    %65 = vector.load %arg5[%c2, %c0_27, %c0_28] : memref<9x128x128xbf16, #tpu.memory_space<vmem>>, vector<1x128x128xbf16>
    %66 = vector.shape_cast %65 : vector<1x128x128xbf16> to vector<128x128xbf16>
    %cst_29 = arith.constant dense<0.000000e+00> : vector<256x128xf32>
    %67 = tpu.matmul %64, %66, %cst_29 {dimension_numbers = #tpu.dot_dimension_numbers<[1], [0], [0], [1], [0, 0, 1, 1], [], []>} : vector<256x128xbf16>, vector<128x128xbf16>, vector<256x128xf32> -> vector<256x128xf32>
    %68 = arith.addf %62, %67 : vector<256x128xf32>
    %69 = vector.extract_strided_slice %47 {offsets = [16, 0], sizes = [256, 128], strides = [1, 1]} : vector<288x128xf32> to vector<256x128xf32>
    %70 = arith.truncf %69 : vector<256x128xf32> to vector<256x128xbf16>
    %c3 = arith.constant 3 : index
    %c0_30 = arith.constant 0 : index
    %c0_31 = arith.constant 0 : index
    %71 = vector.load %arg5[%c3, %c0_30, %c0_31] : memref<9x128x128xbf16, #tpu.memory_space<vmem>>, vector<1x128x128xbf16>
    %72 = vector.shape_cast %71 : vector<1x128x128xbf16> to vector<128x128xbf16>
    %cst_32 = arith.constant dense<0.000000e+00> : vector<256x128xf32>
    %73 = tpu.matmul %70, %72, %cst_32 {dimension_numbers = #tpu.dot_dimension_numbers<[1], [0], [0], [1], [0, 0, 1, 1], [], []>} : vector<256x128xbf16>, vector<128x128xbf16>, vector<256x128xf32> -> vector<256x128xf32>
    %74 = arith.addf %68, %73 : vector<256x128xf32>
    %75 = vector.extract_strided_slice %48 {offsets = [16, 0], sizes = [256, 128], strides = [1, 1]} : vector<288x128xf32> to vector<256x128xf32>
    %76 = arith.truncf %75 : vector<256x128xf32> to vector<256x128xbf16>
    %c4 = arith.constant 4 : index
    %c0_33 = arith.constant 0 : index
    %c0_34 = arith.constant 0 : index
    %77 = vector.load %arg5[%c4, %c0_33, %c0_34] : memref<9x128x128xbf16, #tpu.memory_space<vmem>>, vector<1x128x128xbf16>
    %78 = vector.shape_cast %77 : vector<1x128x128xbf16> to vector<128x128xbf16>
    %cst_35 = arith.constant dense<0.000000e+00> : vector<256x128xf32>
    %79 = tpu.matmul %76, %78, %cst_35 {dimension_numbers = #tpu.dot_dimension_numbers<[1], [0], [0], [1], [0, 0, 1, 1], [], []>} : vector<256x128xbf16>, vector<128x128xbf16>, vector<256x128xf32> -> vector<256x128xf32>
    %80 = arith.addf %74, %79 : vector<256x128xf32>
    %81 = vector.extract_strided_slice %49 {offsets = [16, 0], sizes = [256, 128], strides = [1, 1]} : vector<288x128xf32> to vector<256x128xf32>
    %82 = arith.truncf %81 : vector<256x128xf32> to vector<256x128xbf16>
    %c5 = arith.constant 5 : index
    %c0_36 = arith.constant 0 : index
    %c0_37 = arith.constant 0 : index
    %83 = vector.load %arg5[%c5, %c0_36, %c0_37] : memref<9x128x128xbf16, #tpu.memory_space<vmem>>, vector<1x128x128xbf16>
    %84 = vector.shape_cast %83 : vector<1x128x128xbf16> to vector<128x128xbf16>
    %cst_38 = arith.constant dense<0.000000e+00> : vector<256x128xf32>
    %85 = tpu.matmul %82, %84, %cst_38 {dimension_numbers = #tpu.dot_dimension_numbers<[1], [0], [0], [1], [0, 0, 1, 1], [], []>} : vector<256x128xbf16>, vector<128x128xbf16>, vector<256x128xf32> -> vector<256x128xf32>
    %86 = arith.addf %80, %85 : vector<256x128xf32>
    %87 = vector.extract_strided_slice %47 {offsets = [32, 0], sizes = [256, 128], strides = [1, 1]} : vector<288x128xf32> to vector<256x128xf32>
    %88 = arith.truncf %87 : vector<256x128xf32> to vector<256x128xbf16>
    %c6 = arith.constant 6 : index
    %c0_39 = arith.constant 0 : index
    %c0_40 = arith.constant 0 : index
    %89 = vector.load %arg5[%c6, %c0_39, %c0_40] : memref<9x128x128xbf16, #tpu.memory_space<vmem>>, vector<1x128x128xbf16>
    %90 = vector.shape_cast %89 : vector<1x128x128xbf16> to vector<128x128xbf16>
    %cst_41 = arith.constant dense<0.000000e+00> : vector<256x128xf32>
    %91 = tpu.matmul %88, %90, %cst_41 {dimension_numbers = #tpu.dot_dimension_numbers<[1], [0], [0], [1], [0, 0, 1, 1], [], []>} : vector<256x128xbf16>, vector<128x128xbf16>, vector<256x128xf32> -> vector<256x128xf32>
    %92 = arith.addf %86, %91 : vector<256x128xf32>
    %93 = vector.extract_strided_slice %48 {offsets = [32, 0], sizes = [256, 128], strides = [1, 1]} : vector<288x128xf32> to vector<256x128xf32>
    %94 = arith.truncf %93 : vector<256x128xf32> to vector<256x128xbf16>
    %c7 = arith.constant 7 : index
    %c0_42 = arith.constant 0 : index
    %c0_43 = arith.constant 0 : index
    %95 = vector.load %arg5[%c7, %c0_42, %c0_43] : memref<9x128x128xbf16, #tpu.memory_space<vmem>>, vector<1x128x128xbf16>
    %96 = vector.shape_cast %95 : vector<1x128x128xbf16> to vector<128x128xbf16>
    %cst_44 = arith.constant dense<0.000000e+00> : vector<256x128xf32>
    %97 = tpu.matmul %94, %96, %cst_44 {dimension_numbers = #tpu.dot_dimension_numbers<[1], [0], [0], [1], [0, 0, 1, 1], [], []>} : vector<256x128xbf16>, vector<128x128xbf16>, vector<256x128xf32> -> vector<256x128xf32>
    %98 = arith.addf %92, %97 : vector<256x128xf32>
    %99 = vector.extract_strided_slice %49 {offsets = [32, 0], sizes = [256, 128], strides = [1, 1]} : vector<288x128xf32> to vector<256x128xf32>
    %100 = arith.truncf %99 : vector<256x128xf32> to vector<256x128xbf16>
    %c8 = arith.constant 8 : index
    %c0_45 = arith.constant 0 : index
    %c0_46 = arith.constant 0 : index
    %101 = vector.load %arg5[%c8, %c0_45, %c0_46] : memref<9x128x128xbf16, #tpu.memory_space<vmem>>, vector<1x128x128xbf16>
    %102 = vector.shape_cast %101 : vector<1x128x128xbf16> to vector<128x128xbf16>
    %cst_47 = arith.constant dense<0.000000e+00> : vector<256x128xf32>
    %103 = tpu.matmul %100, %102, %cst_47 {dimension_numbers = #tpu.dot_dimension_numbers<[1], [0], [0], [1], [0, 0, 1, 1], [], []>} : vector<256x128xbf16>, vector<128x128xbf16>, vector<256x128xf32> -> vector<256x128xf32>
    %104 = arith.addf %98, %103 : vector<256x128xf32>
    %105 = vector.shape_cast %104 : vector<256x128xf32> to vector<1x16x16x128xf32>
    %106 = arith.truncf %105 : vector<1x16x16x128xf32> to vector<1x16x16x128xbf16>
    %c0_48 = arith.constant 0 : index
    %c0_49 = arith.constant 0 : index
    %c0_50 = arith.constant 0 : index
    %c0_51 = arith.constant 0 : index
    %107 = vector.load %arg8[%c0_48, %c0_49, %c0_50, %c0_51] : memref<1x16x16x128xbf16, #tpu.memory_space<vmem>>, vector<1x16x16x128xbf16>
    tpu.vector_store %arg8[%c0_48, %c0_49, %c0_50, %c0_51], %106 {strides = array<i32>} : memref<1x16x16x128xbf16, #tpu.memory_space<vmem>>, vector<1x16x16x128xbf16>,
    %cst_52 = arith.constant dense<0.000000e+00> : vector<128xf32>
    %108 = vector.multi_reduction <add>, %104, %cst_52 [0] : vector<256x128xf32> to vector<128xf32>
    %109 = vector.shape_cast %108 : vector<128xf32> to vector<1x128xf32>
    %110 = arith.mulf %104, %104 : vector<256x128xf32>
    %cst_53 = arith.constant dense<0.000000e+00> : vector<128xf32>
    %111 = vector.multi_reduction <add>, %110, %cst_53 [0] : vector<256x128xf32> to vector<128xf32>
    %112 = vector.shape_cast %111 : vector<128xf32> to vector<1x128xf32>
    %113 = tpu.concatenate %109, %112 in 0 : vector<1x128xf32>, vector<1x128xf32> -> vector<2x128xf32>
    %114 = vector.shape_cast %113 : vector<2x128xf32> to vector<1x2x128xf32>
    %c0_i32_54 = arith.constant 0 : i32
    %115 = arith.cmpi eq, %arg1, %c0_i32_54 : i32
    %116 = arith.extui %115 : i1 to i32
    %c0_i32_55 = arith.constant 0 : i32
    %117 = arith.cmpi ne, %116, %c0_i32_55 : i32
    scf.if %117 {
      %c0_58 = arith.constant 0 : index
      %c0_59 = arith.constant 0 : index
      %c0_60 = arith.constant 0 : index
      %121 = vector.load %arg9[%c0_58, %c0_59, %c0_60] : memref<1x2x128xf32, #tpu.memory_space<vmem>>, vector<1x2x128xf32>
      tpu.vector_store %arg9[%c0_58, %c0_59, %c0_60], %114 {strides = array<i32>} : memref<1x2x128xf32, #tpu.memory_space<vmem>>, vector<1x2x128xf32>,
    } else {
    }
    %c0_i32_56 = arith.constant 0 : i32
    %118 = arith.cmpi sgt, %arg1, %c0_i32_56 : i32
    %119 = arith.extui %118 : i1 to i32
    %c0_i32_57 = arith.constant 0 : i32
    %120 = arith.cmpi ne, %119, %c0_i32_57 : i32
    scf.if %120 {
      %c0_58 = arith.constant 0 : index
      %c0_59 = arith.constant 0 : index
      %c0_60 = arith.constant 0 : index
      %121 = vector.load %arg9[%c0_58, %c0_59, %c0_60] : memref<1x2x128xf32, #tpu.memory_space<vmem>>, vector<1x2x128xf32>
      %122 = arith.addf %121, %114 : vector<1x2x128xf32>
      %c0_61 = arith.constant 0 : index
      %c0_62 = arith.constant 0 : index
      %c0_63 = arith.constant 0 : index
      %123 = vector.load %arg9[%c0_61, %c0_62, %c0_63] : memref<1x2x128xf32, #tpu.memory_space<vmem>>, vector<1x2x128xf32>
      tpu.vector_store %arg9[%c0_61, %c0_62, %c0_63], %122 {strides = array<i32>} : memref<1x2x128xf32, #tpu.memory_space<vmem>>, vector<1x2x128xf32>,
    } else {
    }
    return
  }
  func.func @transform_0(%arg0: i32, %arg1: i32) -> (i32, i32, i32, i32) {
    %c16_i32 = arith.constant 16 : i32
    %0 = arith.muli %arg1, %c16_i32 : i32
    %c1_i32 = arith.constant 1 : i32
    %1 = arith.subi %0, %c1_i32 : i32
    %c0_i32 = arith.constant 0 : i32
    %2 = arith.maxsi %1, %c0_i32 : i32
    %c0_i32_0 = arith.constant 0 : i32
    %c0_i32_1 = arith.constant 0 : i32
    %c0_i32_2 = arith.constant 0 : i32
    return %arg0, %2, %c0_i32_0, %c0_i32_1 : i32, i32, i32, i32
  }
  func.func @transform_1(%arg0: i32, %arg1: i32) -> (i32, i32, i32, i32) {
    %c0_i32 = arith.constant 0 : i32
    %c0_i32_0 = arith.constant 0 : i32
    %c0_i32_1 = arith.constant 0 : i32
    return %arg0, %arg1, %c0_i32, %c0_i32_0 : i32, i32, i32, i32
  }
  func.func @transform_2(%arg0: i32, %arg1: i32) -> (i32, i32, i32, i32) {
    %c16_i32 = arith.constant 16 : i32
    %0 = arith.muli %arg1, %c16_i32 : i32
    %c16_i32_0 = arith.constant 16 : i32
    %1 = arith.addi %0, %c16_i32_0 : i32
    %c15_i32 = arith.constant 15 : i32
    %2 = arith.minsi %1, %c15_i32 : i32
    %c0_i32 = arith.constant 0 : i32
    %c0_i32_1 = arith.constant 0 : i32
    %c0_i32_2 = arith.constant 0 : i32
    return %arg0, %2, %c0_i32, %c0_i32_1 : i32, i32, i32, i32
  }
  func.func @transform_3(%arg0: i32, %arg1: i32) -> (i32, i32, i32) {
    %c0_i32 = arith.constant 0 : i32
    %c0_i32_0 = arith.constant 0 : i32
    %c0_i32_1 = arith.constant 0 : i32
    %c0_i32_2 = arith.constant 0 : i32
    return %c0_i32, %c0_i32_0, %c0_i32_1 : i32, i32, i32
  }
  func.func @transform_4(%arg0: i32, %arg1: i32) -> (i32, i32) {
    %c0_i32 = arith.constant 0 : i32
    %c0_i32_0 = arith.constant 0 : i32
    %c0_i32_1 = arith.constant 0 : i32
    return %c0_i32, %c0_i32_0 : i32, i32
  }
  func.func @transform_5(%arg0: i32, %arg1: i32) -> (i32, i32) {
    %c0_i32 = arith.constant 0 : i32
    %c0_i32_0 = arith.constant 0 : i32
    %c0_i32_1 = arith.constant 0 : i32
    return %c0_i32, %c0_i32_0 : i32, i32
  }
  func.func @transform_6(%arg0: i32, %arg1: i32) -> (i32, i32, i32, i32) {
    %c0_i32 = arith.constant 0 : i32
    %c0_i32_0 = arith.constant 0 : i32
    %c0_i32_1 = arith.constant 0 : i32
    return %arg0, %arg1, %c0_i32, %c0_i32_0 : i32, i32, i32, i32
  }
  func.func @transform_7(%arg0: i32, %arg1: i32) -> (i32, i32, i32) {
    %c0_i32 = arith.constant 0 : i32
    %c0_i32_0 = arith.constant 0 : i32
    %c0_i32_1 = arith.constant 0 : i32
    return %arg0, %c0_i32, %c0_i32_0 : i32, i32, i32
  }
}

module attributes {stable_mosaic.version = 11 : i64} {
  func.func @_bn_relu_kernel(%arg0: i32, %arg1: i32, %arg2: memref<1x16x16x128xbf16, #tpu.memory_space<vmem>>, %arg3: memref<1x128xf32, #tpu.memory_space<vmem>>, %arg4: memref<1x128xf32, #tpu.memory_space<vmem>>, %arg5: memref<1x16x16x8xf32, #tpu.memory_space<vmem>>) attributes {dimension_semantics = [#tpu.dimension_semantics<parallel>, #tpu.dimension_semantics<parallel>], iteration_bounds = array<i64: 2, 1>, scalar_prefetch = 0 : i64, scratch_operands = 0 : i64, tpu.core_type = #tpu.core_type<tc>, window_params = [{transform_indices = @transform_0, window_bounds = array<i64: 1, 16, 16, 128>}, {pipeline_mode = #tpu.pipeline_mode<synchronous>, transform_indices = @transform_1, window_bounds = array<i64: 1, 128>}, {pipeline_mode = #tpu.pipeline_mode<synchronous>, transform_indices = @transform_2, window_bounds = array<i64: 1, 128>}, {transform_indices = @transform_3, window_bounds = array<i64: 1, 16, 16, 8>}]} {
    %c0 = arith.constant 0 : index
    %c0_0 = arith.constant 0 : index
    %0 = vector.load %arg3[%c0, %c0_0] : memref<1x128xf32, #tpu.memory_space<vmem>>, vector<1x128xf32>
    %1 = vector.shape_cast %0 : vector<1x128xf32> to vector<1x1x1x128xf32>
    %c0_1 = arith.constant 0 : index
    %c0_2 = arith.constant 0 : index
    %2 = vector.load %arg4[%c0_1, %c0_2] : memref<1x128xf32, #tpu.memory_space<vmem>>, vector<1x128xf32>
    %3 = vector.shape_cast %2 : vector<1x128xf32> to vector<1x1x1x128xf32>
    %c0_3 = arith.constant 0 : index
    %c0_4 = arith.constant 0 : index
    %c0_5 = arith.constant 0 : index
    %c0_6 = arith.constant 0 : index
    %4 = vector.load %arg2[%c0_3, %c0_4, %c0_5, %c0_6] : memref<1x16x16x128xbf16, #tpu.memory_space<vmem>>, vector<1x16x16x128xbf16>
    %5 = arith.extf %4 : vector<1x16x16x128xbf16> to vector<1x16x16x128xf32>
    %6 = vector.broadcast %1 : vector<1x1x1x128xf32> to vector<1x16x16x128xf32>
    %7 = arith.mulf %5, %6 : vector<1x16x16x128xf32>
    %8 = vector.broadcast %3 : vector<1x1x1x128xf32> to vector<1x16x16x128xf32>
    %9 = arith.addf %7, %8 : vector<1x16x16x128xf32>
    %cst = arith.constant 0.000000e+00 : f32
    %10 = vector.broadcast %cst : f32 to vector<1x16x16x128xf32>
    %11 = arith.maximumf %9, %10 : vector<1x16x16x128xf32>
    %12 = vector.extract_strided_slice %11 {offsets = [0, 0, 0, 0], sizes = [1, 16, 16, 8], strides = [1, 1, 1, 1]} : vector<1x16x16x128xf32> to vector<1x16x16x8xf32>
    %c0_7 = arith.constant 0 : index
    %c0_8 = arith.constant 0 : index
    %c0_9 = arith.constant 0 : index
    %c0_10 = arith.constant 0 : index
    %13 = vector.load %arg5[%c0_7, %c0_8, %c0_9, %c0_10] : memref<1x16x16x8xf32, #tpu.memory_space<vmem>>, vector<1x16x16x8xf32>
    tpu.vector_store %arg5[%c0_7, %c0_8, %c0_9, %c0_10], %12 {strides = array<i32>} : memref<1x16x16x8xf32, #tpu.memory_space<vmem>>, vector<1x16x16x8xf32>,
    return
  }
  func.func @transform_0(%arg0: i32, %arg1: i32) -> (i32, i32, i32, i32) {
    %c0_i32 = arith.constant 0 : i32
    %c0_i32_0 = arith.constant 0 : i32
    %c0_i32_1 = arith.constant 0 : i32
    return %arg0, %arg1, %c0_i32, %c0_i32_0 : i32, i32, i32, i32
  }
  func.func @transform_1(%arg0: i32, %arg1: i32) -> (i32, i32) {
    %c0_i32 = arith.constant 0 : i32
    %c0_i32_0 = arith.constant 0 : i32
    %c0_i32_1 = arith.constant 0 : i32
    return %c0_i32, %c0_i32_0 : i32, i32
  }
  func.func @transform_2(%arg0: i32, %arg1: i32) -> (i32, i32) {
    %c0_i32 = arith.constant 0 : i32
    %c0_i32_0 = arith.constant 0 : i32
    %c0_i32_1 = arith.constant 0 : i32
    return %c0_i32, %c0_i32_0 : i32, i32
  }
  func.func @transform_3(%arg0: i32, %arg1: i32) -> (i32, i32, i32, i32) {
    %c0_i32 = arith.constant 0 : i32
    %c0_i32_0 = arith.constant 0 : i32
    %c0_i32_1 = arith.constant 0 : i32
    return %arg0, %arg1, %c0_i32, %c0_i32_0 : i32, i32, i32, i32
  }
}

</mosaic_0001>

<bundles_post_ra>
// kernel: double_conv_forward.5
= control target key start
LH: loop header
LB: loop body
LE: loop exit
PB: predicated region body
PF: predicated region fallthrough
CT: control target
= control target key end

     0   :  { %s680_s12 = smov 0   ;;  %s682_s13 = smov 0   ;;  %s875_s0 = inlined_call_operand.vmem [shape: bf16[2,16,16,128], index: 0, kind: input, shape index: {}]   ;;  %s876_s1 = inlined_call_operand.vmem [shape: f32[1,128], index: 1, kind: input, shape index: {}]   ;;  %s877_s2 = inlined_call_operand.vmem [shape: f32[1,128], index: 2, kind: input, shape index: {}]   ;;  %s878_s3 = inlined_call_operand.vmem [shape: f32[2,16,16,8], index: 3, kind: output, shape index: {}]  }
   0x1   :  { %s684_s14 = smov 0  }
   0x2 LB: > { %s25_s15 = sadd.s32 1, %s654_s13  ;;  %p522_p0 = scmp.ge.s32.totalorder %s658_s14, 1  ;;  %s658_s14 = sphi %s684_s14, %s13_s14   ;;  %s654_s13 = sphi %s682_s13, %s880_s13   ;;  %s650_s12 = sphi %s680_s12, %s879_s12  }
   0x3   : > { %p27_p1 = scmp.ge.s32.totalorder %s25_s15, 2  ;;  %p159_p2 = scmp.lt.s32.totalorder %s658_s14, 3 }
   0x5   : > { %s882_s15 = smov (%p27_p1, %s25_s15), 0  ;;  %p160_p3 = pnand %p522_p0, %p159_p2 }
   0x6   : > { %p194_p4 = scmp.lt.s32.totalorder (!%p160_p3), %s650_s12, 1  ;;  %v709_v0 = vld [vmem:[%s876_s1] ss:$0 sm:$0xff] (!%p160_p3)  ;;  %vm389_vm0 = vcmask (!%p160_p3), 64512  }
   0x7   : > { %163 = sbr.rel (%p160_p3) target bundleno = 54 (0x36), region = 32  ;;  %v718_v9 = vld [vmem:[%s877_s2] ss:$0 sm:$0xff] (!%p160_p3) }
   0xe   : > { %s884_s12 = smov (!%p194_p4, %s650_s12), 1 }
   0xf   : > { %s531_s16 = sshll.u32 %s884_s12, 7  ;;  %s532_s24 = sshll.u32 %s884_s12, 8 }
  0x10   : > { %s704_s19 = scalar_lea.vmem %s875_s0, %s531_s16  ;;  %s736_s27 = scalar_lea.vmem %s878_s3, %s532_s24 }
  0x11   : > { %v534_v1 = vld [vmem:[%s704_s19] sm:$0xff]   ;;  %v597_v2 = vld [vmem:[%s704_s19 + $0x8] sm:$0xff]   ;;  %v598_v3 = vld [vmem:[%s704_s19 + $0x10] sm:$0xff]  }
  0x12   : > { %v535_v4 = vunpack.c.l.bf16 %v534_v1  ;;  %v536_v5 = vunpack.c.h.bf16 %v534_v1  ;;  %v539_v6 = vunpack.c.l.bf16 %v597_v2  ;;  %v540_v7 = vunpack.c.h.bf16 %v597_v2  ;;  %v599_v8 = vld [vmem:[%s704_s19 + $0x18] sm:$0xff]   ;;  %v600_v30 = vld [vmem:[%s704_s19 + $0x20] sm:$0xff]   ;;  %v601_v31 = vld [vmem:[%s704_s19 + $0x28] sm:$0xff]  }
  0x13   : > { %v543_v10 = vunpack.c.l.bf16 %v598_v3  ;;  %v544_v11 = vunpack.c.h.bf16 %v598_v3  ;;  %v547_v12 = vunpack.c.l.bf16 %v599_v8  ;;  %v548_v13 = vunpack.c.h.bf16 %v599_v8  ;;  %v602_v36 = vld [vmem:[%s704_s19 + $0x30] sm:$0xff]   ;;  %v603_v37 = vld [vmem:[%s704_s19 + $0x38] sm:$0xff]   ;;  %v604_v3 = vld [vmem:[%s704_s19 + $0x40] sm:$0xff]  }
  0x14   : > { %v287_v14 = vmul.f32 %v535_v4, %v709_v0  ;;  %v288_v15 = vmul.f32 %v536_v5, %v709_v0  ;;  %v289_v16 = vmul.f32 %v539_v6, %v709_v0  ;;  %v290_v17 = vmul.f32 %v540_v7, %v709_v0  ;;  %v605_v4 = vld [vmem:[%s704_s19 + $0x48] sm:$0xff]  }
  0x15   : > { %v291_v18 = vmul.f32 %v543_v10, %v709_v0  ;;  %v292_v19 = vmul.f32 %v544_v11, %v709_v0  ;;  %v293_v20 = vmul.f32 %v547_v12, %v709_v0  ;;  %v294_v21 = vmul.f32 %v548_v13, %v709_v0  ;;  %v606_v10 = vld [vmem:[%s704_s19 + $0x50] sm:$0xff]   ;;  %v607_v11 = vld [vmem:[%s704_s19 + $0x58] sm:$0xff]  }
  0x16   : > { %v325_v22 = vadd.f32 %v718_v9, %v287_v14  ;;  %v326_v23 = vadd.f32 %v718_v9, %v288_v15  ;;  %v327_v24 = vadd.f32 %v718_v9, %v289_v16  ;;  %v328_v25 = vadd.f32 %v718_v9, %v290_v17 }
  0x17   : > { %v329_v26 = vadd.f32 %v718_v9, %v291_v18  ;;  %v330_v27 = vadd.f32 %v718_v9, %v292_v19  ;;  %v331_v28 = vadd.f32 %v718_v9, %v293_v20  ;;  %v332_v29 = vadd.f32 %v718_v9, %v294_v21 }
  0x18   : > { %v357_v32 = vmax.f32 %v325_v22, 0.0  ;;  %v358_v33 = vmax.f32 %v326_v23, 0.0  ;;  %v359_v34 = vmax.f32 %v327_v24, 0.0  ;;  %v360_v35 = vmax.f32 %v328_v25, 0.0 }
  0x19   : > { %v361_v38 = vmax.f32 %v329_v26, 0.0  ;;  %v362_v39 = vmax.f32 %v330_v27, 0.0  ;;  %v363_v40 = vmax.f32 %v331_v28, 0.0  ;;  %v364_v41 = vmax.f32 %v332_v29, 0.0 }
  0x1a   : > { %390 = vst.msk [vmem:[%s736_s27] sm:$0xff] %vm389_vm0, %v357_v32  ;;  %391 = vst.msk [vmem:[%s736_s27 + $0x8] sm:$0xff] %vm389_vm0, %v358_v33  ;;  %v551_v42 = vunpack.c.l.bf16 %v600_v30  ;;  %v552_v43 = vunpack.c.h.bf16 %v600_v30  ;;  %v555_v44 = vunpack.c.l.bf16 %v601_v31  ;;  %v556_v45 = vunpack.c.h.bf16 %v601_v31 }
  0x1b   : > { %392 = vst.msk [vmem:[%s736_s27 + $0x10] sm:$0xff] %vm389_vm0, %v359_v34  ;;  %393 = vst.msk [vmem:[%s736_s27 + $0x18] sm:$0xff] %vm389_vm0, %v360_v35  ;;  %v559_v46 = vunpack.c.l.bf16 %v602_v36  ;;  %v560_v47 = vunpack.c.h.bf16 %v602_v36  ;;  %v563_v48 = vunpack.c.l.bf16 %v603_v37  ;;  %v564_v49 = vunpack.c.h.bf16 %v603_v37 }
  0x1c   : > { %394 = vst.msk [vmem:[%s736_s27 + $0x20] sm:$0xff] %vm389_vm0, %v361_v38  ;;  %395 = vst.msk [vmem:[%s736_s27 + $0x28] sm:$0xff] %vm389_vm0, %v362_v39  ;;  %v295_v50 = vmul.f32 %v551_v42, %v709_v0  ;;  %v296_v51 = vmul.f32 %v552_v43, %v709_v0  ;;  %v297_v52 = vmul.f32 %v555_v44, %v709_v0  ;;  %v567_v16 = vunpack.c.l.bf16 %v604_v3 }
  0x1d   : > { %396 = vst.msk [vmem:[%s736_s27 + $0x30] sm:$0xff] %vm389_vm0, %v363_v40  ;;  %397 = vst.msk [vmem:[%s736_s27 + $0x38] sm:$0xff] %vm389_vm0, %v364_v41  ;;  %v298_v53 = vmul.f32 %v556_v45, %v709_v0  ;;  %v299_v54 = vmul.f32 %v559_v46, %v709_v0  ;;  %v300_v55 = vmul.f32 %v560_v47, %v709_v0  ;;  %v568_v17 = vunpack.c.h.bf16 %v604_v3  ;;  %v608_v40 = vld [vmem:[%s704_s19 + $0x60] sm:$0xff]   ;;  %v609_v41 = vld [vmem:[%s704_s19 + $0x68] sm:$0xff]  }
  0x1e   : > { %v301_v56 = vmul.f32 %v563_v48, %v709_v0  ;;  %v302_v57 = vmul.f32 %v564_v49, %v709_v0  ;;  %v333_v58 = vadd.f32 %v718_v9, %v295_v50  ;;  %v334_v59 = vadd.f32 %v718_v9, %v296_v51  ;;  %v610_v46 = vld [vmem:[%s704_s19 + $0x70] sm:$0xff]   ;;  %v611_v47 = vld [vmem:[%s704_s19 + $0x78] sm:$0xff]  }
  0x1f   : > { %v335_v60 = vadd.f32 %v718_v9, %v297_v52  ;;  %v336_v61 = vadd.f32 %v718_v9, %v298_v53  ;;  %v337_v62 = vadd.f32 %v718_v9, %v299_v54  ;;  %v338_v63 = vadd.f32 %v718_v9, %v300_v55 }
  0x20   : > { %v339_v1 = vadd.f32 %v718_v9, %v301_v56  ;;  %v340_v2 = vadd.f32 %v718_v9, %v302_v57  ;;  %v365_v5 = vmax.f32 %v333_v58, 0.0  ;;  %v366_v6 = vmax.f32 %v334_v59, 0.0 }
  0x21   : > { %v367_v7 = vmax.f32 %v335_v60, 0.0  ;;  %v368_v8 = vmax.f32 %v336_v61, 0.0  ;;  %v369_v12 = vmax.f32 %v337_v62, 0.0  ;;  %v370_v13 = vmax.f32 %v338_v63, 0.0 }
  0x22   : > { %v371_v14 = vmax.f32 %v339_v1, 0.0  ;;  %v372_v15 = vmax.f32 %v340_v2, 0.0  ;;  %398 = vst.msk [vmem:[%s736_s27 + $0x40] sm:$0xff] %vm389_vm0, %v365_v5  ;;  %399 = vst.msk [vmem:[%s736_s27 + $0x48] sm:$0xff] %vm389_vm0, %v366_v6  ;;  %v571_v18 = vunpack.c.l.bf16 %v605_v4  ;;  %v572_v19 = vunpack.c.h.bf16 %v605_v4 }
  0x23   : > { %400 = vst.msk [vmem:[%s736_s27 + $0x50] sm:$0xff] %vm389_vm0, %v367_v7  ;;  %401 = vst.msk [vmem:[%s736_s27 + $0x58] sm:$0xff] %vm389_vm0, %v368_v8  ;;  %v575_v20 = vunpack.c.l.bf16 %v606_v10  ;;  %v576_v21 = vunpack.c.h.bf16 %v606_v10  ;;  %v579_v22 = vunpack.c.l.bf16 %v607_v11  ;;  %v580_v23 = vunpack.c.h.bf16 %v607_v11 }
  0x24   : > { %402 = vst.msk [vmem:[%s736_s27 + $0x60] sm:$0xff] %vm389_vm0, %v369_v12  ;;  %403 = vst.msk [vmem:[%s736_s27 + $0x68] sm:$0xff] %vm389_vm0, %v370_v13  ;;  %v303_v24 = vmul.f32 %v567_v16, %v709_v0  ;;  %v304_v25 = vmul.f32 %v568_v17, %v709_v0  ;;  %v305_v26 = vmul.f32 %v571_v18, %v709_v0  ;;  %v583_v52 = vunpack.c.l.bf16 %v608_v40 }
  0x25   : > { %404 = vst.msk [vmem:[%s736_s27 + $0x70] sm:$0xff] %vm389_vm0, %v371_v14  ;;  %405 = vst.msk [vmem:[%s736_s27 + $0x78] sm:$0xff] %vm389_vm0, %v372_v15  ;;  %v306_v27 = vmul.f32 %v572_v19, %v709_v0  ;;  %v307_v28 = vmul.f32 %v575_v20, %v709_v0  ;;  %v308_v29 = vmul.f32 %v576_v21, %v709_v0  ;;  %v584_v53 = vunpack.c.h.bf16 %v608_v40 }
  0x26   : > { %v309_v30 = vmul.f32 %v579_v22, %v709_v0  ;;  %v310_v31 = vmul.f32 %v580_v23, %v709_v0  ;;  %v341_v32 = vadd.f32 %v718_v9, %v303_v24  ;;  %v342_v33 = vadd.f32 %v718_v9, %v304_v25 }
  0x27   : > { %v343_v34 = vadd.f32 %v718_v9, %v305_v26  ;;  %v344_v35 = vadd.f32 %v718_v9, %v306_v27  ;;  %v345_v36 = vadd.f32 %v718_v9, %v307_v28  ;;  %v346_v37 = vadd.f32 %v718_v9, %v308_v29 }
  0x28   : > { %v347_v38 = vadd.f32 %v718_v9, %v309_v30  ;;  %v348_v39 = vadd.f32 %v718_v9, %v310_v31  ;;  %v373_v42 = vmax.f32 %v341_v32, 0.0  ;;  %v374_v43 = vmax.f32 %v342_v33, 0.0 }
  0x29   : > { %v375_v44 = vmax.f32 %v343_v34, 0.0  ;;  %v376_v45 = vmax.f32 %v344_v35, 0.0  ;;  %v377_v48 = vmax.f32 %v345_v36, 0.0  ;;  %v378_v49 = vmax.f32 %v346_v37, 0.0 }
  0x2a   : > { %v379_v50 = vmax.f32 %v347_v38, 0.0  ;;  %v380_v51 = vmax.f32 %v348_v39, 0.0  ;;  %406 = vst.msk [vmem:[%s736_s27 + $0x80] sm:$0xff] %vm389_vm0, %v373_v42  ;;  %407 = vst.msk [vmem:[%s736_s27 + $0x88] sm:$0xff] %vm389_vm0, %v374_v43  ;;  %v587_v54 = vunpack.c.l.bf16 %v609_v41  ;;  %v588_v55 = vunpack.c.h.bf16 %v609_v41 }
  0x2b   : > { %408 = vst.msk [vmem:[%s736_s27 + $0x90] sm:$0xff] %vm389_vm0, %v375_v44  ;;  %409 = vst.msk [vmem:[%s736_s27 + $0x98] sm:$0xff] %vm389_vm0, %v376_v45  ;;  %v591_v56 = vunpack.c.l.bf16 %v610_v46  ;;  %v592_v57 = vunpack.c.h.bf16 %v610_v46  ;;  %v595_v58 = vunpack.c.l.bf16 %v611_v47  ;;  %v596_v59 = vunpack.c.h.bf16 %v611_v47 }
  0x2c   : > { %410 = vst.msk [vmem:[%s736_s27 + $0xa0] sm:$0xff] %vm389_vm0, %v377_v48  ;;  %411 = vst.msk [vmem:[%s736_s27 + $0xa8] sm:$0xff] %vm389_vm0, %v378_v49  ;;  %v311_v60 = vmul.f32 %v583_v52, %v709_v0  ;;  %v312_v61 = vmul.f32 %v584_v53, %v709_v0  ;;  %v313_v62 = vmul.f32 %v587_v54, %v709_v0 }
  0x2d   : > { %412 = vst.msk [vmem:[%s736_s27 + $0xb0] sm:$0xff] %vm389_vm0, %v379_v50  ;;  %413 = vst.msk [vmem:[%s736_s27 + $0xb8] sm:$0xff] %vm389_vm0, %v380_v51  ;;  %v314_v63 = vmul.f32 %v588_v55, %v709_v0  ;;  %v315_v1 = vmul.f32 %v591_v56, %v709_v0  ;;  %v316_v2 = vmul.f32 %v592_v57, %v709_v0 }
  0x2e   : > { %v317_v3 = vmul.f32 %v595_v58, %v709_v0  ;;  %v318_v4 = vmul.f32 %v596_v59, %v709_v0  ;;  %v349_v5 = vadd.f32 %v718_v9, %v311_v60  ;;  %v350_v6 = vadd.f32 %v718_v9, %v312_v61 }
  0x2f   : > { %v351_v7 = vadd.f32 %v718_v9, %v313_v62  ;;  %v352_v8 = vadd.f32 %v718_v9, %v314_v63  ;;  %v353_v10 = vadd.f32 %v718_v9, %v315_v1  ;;  %v354_v11 = vadd.f32 %v718_v9, %v316_v2 }
  0x30   : > { %v355_v0 = vadd.f32 %v718_v9, %v317_v3  ;;  %v356_v12 = vadd.f32 %v718_v9, %v318_v4  ;;  %v381_v13 = vmax.f32 %v349_v5, 0.0  ;;  %v382_v14 = vmax.f32 %v350_v6, 0.0 }
  0x31   : > { %v383_v15 = vmax.f32 %v351_v7, 0.0  ;;  %v384_v16 = vmax.f32 %v352_v8, 0.0  ;;  %v385_v17 = vmax.f32 %v353_v10, 0.0  ;;  %v386_v18 = vmax.f32 %v354_v11, 0.0 }
  0x32   : > { %v387_v19 = vmax.f32 %v355_v0, 0.0  ;;  %v388_v20 = vmax.f32 %v356_v12, 0.0  ;;  %414 = vst.msk [vmem:[%s736_s27 + $0xc0] sm:$0xff] %vm389_vm0, %v381_v13  ;;  %415 = vst.msk [vmem:[%s736_s27 + $0xc8] sm:$0xff] %vm389_vm0, %v382_v14 }
  0x33   : > { %416 = vst.msk [vmem:[%s736_s27 + $0xd0] sm:$0xff] %vm389_vm0, %v383_v15  ;;  %417 = vst.msk [vmem:[%s736_s27 + $0xd8] sm:$0xff] %vm389_vm0, %v384_v16 }
  0x34   : > { %418 = vst.msk [vmem:[%s736_s27 + $0xe0] sm:$0xff] %vm389_vm0, %v385_v17  ;;  %419 = vst.msk [vmem:[%s736_s27 + $0xe8] sm:$0xff] %vm389_vm0, %v386_v18 }
  0x35   : > { %420 = vst.msk [vmem:[%s736_s27 + $0xf0] sm:$0xff] %vm389_vm0, %v387_v19  ;;  %421 = vst.msk [vmem:[%s736_s27 + $0xf8] sm:$0xff] %vm389_vm0, %v388_v20 }
  0x36 PF: > { %s13_s14 = sadd.s32 1, %s658_s14   ;;  %s879_s12 = smov %s654_s13 }
  0x37   : > { %p10_p5 = scmp.ge.s32.totalorder %s13_s14, 4   ;;  %s880_s13 = smov %s882_s15 }
  0x39   :  { %12 = sbr.rel (!%p10_p5) target bundleno = 2 (0x2), region = 62 }

// kernel: double_conv_forward.4
= control target key start
LH: loop header
LB: loop body
LE: loop exit
PB: predicated region body
PF: predicated region fallthrough
CT: control target
= control target key end

     0   :  { %s5575_s24 = smov 0   ;;  %s5577_s25 = smov 0   ;;  %s6669_s0 = inlined_call_operand.vmem [shape: bf16[2,16,16,128], index: 0, kind: input, shape index: {}, may-alias: {0,1,2}]   ;;  %s6670_s1 = inlined_call_operand.vmem [shape: bf16[2,16,16,128], index: 1, kind: input, shape index: {}, may-alias: {0,1,2}]   ;;  %s6671_s2 = inlined_call_operand.vmem [shape: bf16[2,16,16,128], index: 2, kind: input, shape index: {}, may-alias: {0,1,2}]   ;;  %s6672_s3 = inlined_call_operand.vmem [shape: bf16[9,128,128], index: 3, kind: input, shape index: {}]   ;;  %s6673_s4 = inlined_call_operand.vmem [shape: f32[1,128], index: 4, kind: input, shape index: {}]   ;;  %s6674_s5 = inlined_call_operand.vmem [shape: f32[1,128], index: 5, kind: input, shape index: {}]   ;;  %s6675_s6 = inlined_call_operand.vmem [shape: bf16[2,16,16,128], index: 6, kind: output, shape index: {0}]   ;;  %s6676_s7 = inlined_call_operand.vmem [shape: f32[2,2,128], index: 7, kind: output, shape index: {1}]  }
   0x1   :  { %s5579_s26 = smov 0  }
   0x2 LB: > { %s30_s27 = sadd.s32 1, %s5528_s25  ;;  %p3681_p0 = scmp.ge.s32.totalorder %s5532_s26, 1  ;;  %s5532_s26 = sphi %s5579_s26, %s18_s26   ;;  %s5528_s25 = sphi %s5577_s25, %s6716_s25   ;;  %s5524_s24 = sphi %s5575_s24, %s6715_s24  }
   0x3   : > { %p32_p1 = scmp.ge.s32.totalorder %s30_s27, 2  ;;  %p326_p2 = scmp.lt.s32.totalorder %s5532_s26, 3 }
   0x5   : > { %s6718_s27 = smov (%p32_p1, %s30_s27), 0  ;;  %p327_p3 = pnand %p3681_p0, %p326_p2 }
   0x7   : > { %330 = sbr.rel (%p327_p3) target bundleno = 567 (0x237), region = 44 }
   0xe   : > { %v5428_v0 = vld [vmem:[%s6672_s3 + $0x40] sm:$0xff]   ;;  %v5430_v2 = vld [vmem:[%s6672_s3 + $0x48] sm:$0xff]   ;;  %p402_p4 = scmp.lt.s32.totalorder %s5524_s24, 1  ;;  %v5432_v4 = vld [vmem:[%s6672_s3 + $0x50] sm:$0xff]   ;;  %vm701_vm0 = vcmask 1040384   ;;  %vm810_vm1 = vcmask 1046528  }
   0xf   : > { %v5429_v1 = vld [vmem:[%s6672_s3 + $0x100] sm:$0xff]   ;;  %4699 = vmatprep.subr.bf16.mxu1 %v5428_v0  ;;  %v5431_v3 = vld [vmem:[%s6672_s3 + $0x108] sm:$0xff]   ;;  %v5433_v5 = vld [vmem:[%s6672_s3 + $0x110] sm:$0xff]   ;;  %vm5534_vm2 = vmmov 1  }
  0x10   : > { %4891 = vmatprep.subr.bf16.mxu0 %v5429_v1  ;;  %4700 = vmatpush3.bf16.msra.mxu1 %v5428_v0  ;;  %s6720_s24 = smov (!%p402_p4, %s5524_s24), 1  ;;  %v5434_v6 = vld [vmem:[%s6672_s3 + $0x58] sm:$0xff]   ;;  %v5436_v8 = vld [vmem:[%s6672_s3 + $0x60] sm:$0xff]   ;;  %v5438_v10 = vld [vmem:[%s6672_s3 + $0x68] sm:$0xff]  }
  0x11   : > { %4892 = vmatpush3.bf16.msra.mxu0 %v5429_v1  ;;  %4701 = vmatprep.subr.bf16.mxu1 %v5430_v2  ;;  %v5435_v7 = vld [vmem:[%s6672_s3 + $0x118] sm:$0xff]   ;;  %s5620_s21 = sshll.u32 %s6720_s24, 7  ;;  %v5437_v9 = vld [vmem:[%s6672_s3 + $0x120] sm:$0xff]   ;;  %v5439_v13 = vld [vmem:[%s6672_s3 + $0x128] sm:$0xff]  }
  0x12   : > { %4893 = vmatprep.subr.bf16.mxu0 %v5431_v3  ;;  %s410_s9 = scalar_lea.vmem %s6669_s0, %s5620_s21  ;;  %s5636_s12 = scalar_lea.vmem %s6670_s1, %s5620_s21  ;;  %v5644_v12 = vld [vmem:[%s6673_s4] ss:$0 sm:$0xff]  ;;  %v5440_v23 = vld [vmem:[%s6672_s3 + $0x70] sm:$0xff]   ;;  %v5442_v40 = vld [vmem:[%s6672_s3 + $0x78] sm:$0xff]  }
  0x13   : > { %v4301_v11 = vld [vmem:[%s410_s9] sm:$0xff]   ;;  %v4453_v22 = vld [vmem:[%s5636_s12 + $0x8] sm:$0xff]   ;;  %v5441_v28 = vld [vmem:[%s6672_s3 + $0x130] sm:$0xff]   ;;  %s4266_s20 = sadd.s32 120, %s5620_s21  ;;  %s6633_s8 = scalar_lea.vmem %s6675_s6, %s5620_s21 }
  0x14   : > { %4702 = vmatpush3.bf16.msra.mxu1 %v5430_v2  ;;  %v4302_v14 = vunpack.c.l.bf16 %v4301_v11  ;;  %v4303_v15 = vunpack.c.h.bf16 %v4301_v11  ;;  %v4305_v16 = vld [vmem:[%s5636_s12] sm:$0xff]   ;;  %v4310_v26 = vunpack.c.l.bf16 %v4453_v22  ;;  %v4311_v27 = vunpack.c.h.bf16 %v4453_v22  ;;  %v4454_v35 = vld [vmem:[%s5636_s12 + $0x10] sm:$0xff]   ;;  %v5443_v41 = vld [vmem:[%s6672_s3 + $0x138] sm:$0xff]   ;;  %s438_s30 = scalar_lea.vmem %s6671_s2, %s4266_s20  ;;  %s3690_s21 = sshll.u32 %s6720_s24, 1 }
  0x15   : > { %4894 = vmatpush3.bf16.msra.mxu0 %v5431_v3  ;;  %4703 = vmatprep.subr.bf16.mxu1 %v5432_v4  ;;  %v5653_v17 = vld [vmem:[%s6674_s5] ss:$0 sm:$0xff]  ;;  %v4306_v18 = vunpack.c.l.bf16 %v4305_v16  ;;  %v4307_v19 = vunpack.c.h.bf16 %v4305_v16  ;;  %v4314_v38 = vunpack.c.l.bf16 %v4454_v35  ;;  %v4315_v39 = vunpack.c.h.bf16 %v4454_v35  ;;  %v4455_v53 = vld [vmem:[%s5636_s12 + $0x18] sm:$0xff]   ;;  %v4457_v1 = vld [vmem:[%s5636_s12 + $0x28] sm:$0xff]   ;;  %s457_s11 = scalar_lea.vmem %s6676_s7, %s3690_s21 }
  0x16   : > { %4895 = vmatprep.subr.bf16.mxu0 %v5433_v5  ;;  %v539_v20 = vmul.f32 %v4302_v14, %v5644_v12  ;;  %v540_v21 = vmul.f32 %v4303_v15, %v5644_v12  ;;  %v553_v33 = vmul.f32 %v4310_v26, %v5644_v12  ;;  %v554_v34 = vmul.f32 %v4311_v27, %v5644_v12  ;;  %v5444_v54 = vld [vmem:[%s6672_s3] sm:$0xff]   ;;  %v4458_v11 = vld [vmem:[%s5636_s12 + $0x30] sm:$0xff]   ;;  %vm5865_vm3 = vmpackc.low %vm810_vm1, %vm5534_vm2 }
  0x17   : > { %v551_v24 = vmul.f32 %v4306_v18, %v5644_v12  ;;  %v552_v25 = vmul.f32 %v4307_v19, %v5644_v12  ;;  %v555_v48 = vmul.f32 %v4314_v38, %v5644_v12  ;;  %v556_v49 = vmul.f32 %v4315_v39, %v5644_v12  ;;  %v5445_v59 = vld [vmem:[%s6672_s3 + $0x140] sm:$0xff]   ;;  %v5447_v18 = vld [vmem:[%s6672_s3 + $0x8] sm:$0xff]   ;;  %vm3725_vm4 = vmneg %vm701_vm0 }
  0x18   : > { %4704 = vmatpush3.bf16.msra.mxu1 %v5432_v4  ;;  %v547_v29 = vadd.f32 %v5653_v17, %v539_v20  ;;  %v548_v30 = vadd.f32 %v5653_v17, %v540_v21  ;;  %v585_v44 = vadd.f32 %v5653_v17, %v553_v33  ;;  %v586_v45 = vadd.f32 %v5653_v17, %v554_v34  ;;  %v4456_v60 = vld [vmem:[%s5636_s12 + $0x20] sm:$0xff]   ;;  %vm6065_vm5 = vmpackc.low %vm5534_vm2, %vm3725_vm4 }
  0x19   : > { %4896 = vmatpush3.bf16.msra.mxu0 %v5433_v5  ;;  %4705 = vmatprep.subr.bf16.mxu1 %v5434_v6  ;;  %v583_v31 = vadd.f32 %v5653_v17, %v551_v24  ;;  %v584_v32 = vadd.f32 %v5653_v17, %v552_v25  ;;  %v587_v62 = vadd.f32 %v5653_v17, %v555_v48  ;;  %v4318_v0 = vunpack.c.l.bf16 %v4455_v53  ;;  %v5450_v25 = vld [vmem:[%s6672_s3 + $0x10] sm:$0xff]  }
  0x1a   : > { %4897 = vmatprep.subr.bf16.mxu0 %v5435_v7  ;;  %v549_v36 = vmax.f32 %v547_v29, 0.0  ;;  %v550_v37 = vmax.f32 %v548_v30, 0.0  ;;  %v5702_v57 = vmax.f32 %v585_v44, 0.0  ;;  %v5704_v58 = vmax.f32 %v586_v45, 0.0  ;;  %v5449_v44 = vld [vmem:[%s6672_s3 + $0x158] sm:$0xff]  }
  0x1b   : > { %v5679_v42 = vmax.f32 %v583_v31, 0.0  ;;  %v5681_v43 = vmax.f32 %v584_v32, 0.0  ;;  %v588_v63 = vadd.f32 %v5653_v17, %v556_v49  ;;  %v4319_v3 = vunpack.c.h.bf16 %v4455_v53  ;;  %v4459_v31 = vld [vmem:[%s5636_s12 + $0x38] sm:$0xff]   ;;  %v5448_v32 = vld [vmem:[%s6672_s3 + $0x150] sm:$0xff]  }
  0x1c   : > { %4706 = vmatpush3.bf16.msra.mxu1 %v5434_v6  ;;  %v5685_v46 = vmul.f32 0.0, %v549_v36  ;;  %v5687_v47 = vmul.f32 0.0, %v550_v37  ;;  %v5717_v2 = vpack.c.bf16 %v5704_v58, %v5702_v57  ;;  %v5719_v4 = vmax.f32 %v587_v62, 0.0  ;;  %v5451_v62 = vld [vmem:[%s6672_s3 + $0x160] sm:$0xff]  }
  0x1d   : > { %4898 = vmatpush3.bf16.msra.mxu0 %v5435_v7  ;;  %4707 = vmatprep.subr.bf16.mxu1 %v5436_v8  ;;  %v705_v50 = vrot.slane %v5679_v42, 7  ;;  %v706_v51 = vrot.slane %v5681_v43, 7  ;;  %v952_v52 = vpack.c.bf16 %v5681_v43, %v5679_v42  ;;  %v5721_v5 = vmax.f32 %v588_v63, 0.0 }
  0x1e   : > { %4899 = vmatprep.subr.bf16.mxu0 %v5437_v9  ;;  %v951_v55 = vpack.c.bf16 %v5687_v47, %v5685_v46  ;;  %v557_v6 = vmul.f32 %v4318_v0, %v5644_v12  ;;  %v4322_v7 = vunpack.c.l.bf16 %v4456_v60  ;;  %v4327_v21 = vunpack.c.h.bf16 %v4457_v1 }
  0x1f   : > { %v707_v56 = vsel %vm701_vm0, %v705_v50, %v706_v51  ;;  %4907 = vmatprep.mubr.bf16.mxu0 %v952_v52  ;;  %v5731_v14 = vpack.c.bf16 %v5721_v5, %v5719_v4  ;;  %v4330_v26 = vunpack.c.l.bf16 %v4458_v11  ;;  %v4331_v27 = vunpack.c.h.bf16 %v4458_v11  ;;  %v4460_v51 = vld [vmem:[%s5636_s12 + $0x40] sm:$0xff]  }
  0x20   : > { %4708 = vmatpush3.bf16.msra.mxu1 %v5436_v8  ;;  %v5710_v61 = vpack.c.bf16 %v707_v56, %v705_v50  ;;  %4715 = vmatprep.mubr.bf16.mxu1 %v951_v55  ;;  %v558_v8 = vmul.f32 %v4319_v3, %v5644_v12  ;;  %v589_v15 = vadd.f32 %v5653_v17, %v557_v6  ;;  %v5453_v50 = vld [vmem:[%s6672_s3 + $0x18] sm:$0xff]   ;;  %v4338_v63 = vunpack.c.l.bf16 %v4460_v51 }
  0x21   : > { %4900 = vmatpush3.bf16.msra.mxu0 %v5437_v9  ;;  %4709 = vmatprep.subr.bf16.mxu1 %v5438_v10  ;;  %v4323_v9 = vunpack.c.h.bf16 %v4456_v60  ;;  %v559_v16 = vmul.f32 %v4322_v7, %v5644_v12  ;;  %v562_v30 = vmul.f32 %v4327_v21, %v5644_v12  ;;  %v563_v34 = vmul.f32 %v4330_v26, %v5644_v12  ;;  %v5458_v21 = vld [vmem:[%s6672_s3 + $0x28] sm:$0xff]  }
  0x22   : > { %4901 = vmatprep.subr.bf16.mxu0 %v5439_v13  ;;  %6693 = vst [vmem:[#allocation2_spill] sm:$0xff] %v5710_v61  ;;  %v590_v19 = vadd.f32 %v5653_v17, %v558_v8  ;;  %v564_v35 = vmul.f32 %v4331_v27, %v5644_v12  ;;  %v4339_v0 = vunpack.c.h.bf16 %v4460_v51  ;;  %v814_v11 = vrot.slane %v5679_v42, 1  ;;  %v5462_v51 = vld [vmem:[%s6672_s3 + $0x38] sm:$0xff]  }
  0x23   : > { %v560_v20 = vmul.f32 %v4323_v9, %v5644_v12  ;;  %v591_v24 = vadd.f32 %v5653_v17, %v559_v16  ;;  %v594_v39 = vadd.f32 %v5653_v17, %v562_v30  ;;  %v595_v48 = vadd.f32 %v5653_v17, %v563_v34 }
  0x24   : > { %4710 = vmatpush3.bf16.msra.mxu1 %v5438_v10  ;;  %v4326_v10 = vunpack.c.l.bf16 %v4457_v1  ;;  %v596_v49 = vadd.f32 %v5653_v17, %v564_v35  ;;  %v5456_v1 = vld [vmem:[%s6672_s3 + $0x20] sm:$0xff]   ;;  %v567_v16 = vmul.f32 %v4338_v63, %v5644_v12  ;;  %v817_v26 = vrot.slane %v5702_v57, 1 }
  0x25   : > { %4902 = vmatpush3.bf16.msra.mxu0 %v5439_v13  ;;  %4711 = vmatprep.subr.bf16.mxu1 %v5440_v23  ;;  %v5446_v13 = vld [vmem:[%s6672_s3 + $0x148] sm:$0xff]   ;;  %v592_v29 = vadd.f32 %v5653_v17, %v560_v20  ;;  %v5758_v33 = vmax.f32 %v591_v24, 0.0  ;;  %v818_v27 = vrot.slane %v5704_v58, 1 }
  0x26   : > { %4903 = vmatprep.subr.bf16.mxu0 %v5441_v28  ;;  %v561_v22 = vmul.f32 %v4326_v10, %v5644_v12  ;;  %v5796_v60 = vmax.f32 %v596_v49, 0.0 }
  0x27   : > { %v5762_v36 = vmax.f32 %v592_v29, 0.0  ;;  %v5454_v29 = vld [vmem:[%s6672_s3 + $0x170] sm:$0xff]  }
  0x28   : > { %4712 = vmatpush3.bf16.msra.mxu1 %v5440_v23  ;;  %v5742_v23 = vmax.f32 %v589_v15, 0.0  ;;  %v593_v37 = vadd.f32 %v5653_v17, %v561_v22  ;;  %v815_v15 = vrot.slane %v5681_v43, 1 }
  0x29   : > { %4904 = vmatpush3.bf16.msra.mxu0 %v5441_v28  ;;  %4713 = vmatprep.subr.bf16.mxu1 %v5442_v40  ;;  %v5749_v28 = vmax.f32 %v590_v19, 0.0  ;;  %v5775_v45 = vpack.c.bf16 %v5762_v36, %v5758_v33  ;;  %v568_v19 = vmul.f32 %v4339_v0, %v5644_v12 }
  0x2a   : > { %4905 = vmatprep.subr.bf16.mxu0 %v5443_v41  ;;  %v5787_v53 = vmax.f32 %v593_v37, 0.0  ;;  %v816_v30 = vsel %vm810_vm1, %v814_v11, %v815_v15 }
  0x2b   : > { %v5767_v38 = vpack.c.bf16 %v5749_v28, %v5742_v23  ;;  %v600_v34 = vadd.f32 %v5653_v17, %v568_v19  ;;  %v5856_v49 = vpack.c.bf16 %v815_v15, %v816_v30 }
  0x2c   : > { %4714 = vmatpush3.bf16.msra.mxu1 %v5442_v40  ;;  %v4334_v40 = vunpack.c.l.bf16 %v4459_v31 }
  0x2d   : > { %4906 = vmatpush3.bf16.msra.mxu0 %v5443_v41  ;;  %4747 = vmatprep.subr.bf16.mxu1 %v5444_v54  ;;  %v4335_v41 = vunpack.c.h.bf16 %v4459_v31 }
  0x2e   : > { %4939 = vmatprep.subr.bf16.mxu0 %v5445_v59  ;;  %v565_v55 = vmul.f32 %v4334_v40, %v5644_v12 }
  0x2f   : > { %4716 = vmatmul.mubr.bf16.vlgmr.msra.gmra.mrb[0].mxu1 %v952_v52  ;;  %v4461_v52 = vld [vmem:[%s5636_s12 + $0x48] sm:$0xff]   ;;  %v566_v56 = vmul.f32 %v4335_v41, %v5644_v12  ;;  %v5455_v41 = vld [vmem:[%s6672_s3 + $0x178] sm:$0xff]  }
  0x30   : > { %4908 = vmatmul.mubr.bf16.vlgmr.msra.gmra.mrb[0].mxu0 %v5717_v2  ;;  %4748 = vmatpush3.bf16.msra.mxu1 %v5444_v54  ;;  %v5789_v54 = vmax.f32 %v594_v39, 0.0  ;;  %v4342_v3 = vunpack.c.l.bf16 %v4461_v52  ;;  %v4343_v6 = vunpack.c.h.bf16 %v4461_v52  ;;  %v597_v8 = vadd.f32 %v5653_v17, %v565_v55  ;;  %v5460_v39 = vld [vmem:[%s6672_s3 + $0x30] sm:$0xff]  }
  0x31   : > { %4940 = vmatpush3.bf16.msra.mxu0 %v5445_v59  ;;  %4719 = vmatprep.mubr.bf16.mxu1 %v5717_v2  ;;  %v5794_v59 = vmax.f32 %v595_v48, 0.0  ;;  %v598_v9 = vadd.f32 %v5653_v17, %v566_v56  ;;  %v819_v52 = vsel %vm810_vm1, %v817_v26, %v818_v27  ;;  %v820_v56 = vrot.slane %v5719_v4, 1 }
  0x32   : > { %4941 = vmatprep.subr.bf16.mxu0 %v5446_v13  ;;  %4911 = vmatprep.mubr.bf16.mxu0 %v5731_v14  ;;  %v5806_v7 = vpack.c.bf16 %v5789_v54, %v5787_v53  ;;  %v569_v42 = vmul.f32 %v4342_v3, %v5644_v12  ;;  %v570_v20 = vmul.f32 %v4343_v6, %v5644_v12  ;;  %v5830_v43 = vmax.f32 %v597_v8, 0.0  ;;  %v5457_v8 = vld [vmem:[%s6672_s3 + $0x180] sm:$0xff]  }
  0x33   : > { %4749 = vmatprep.subr.bf16.mxu1 %v5447_v18  ;;  %v5812_v10 = vpack.c.bf16 %v5796_v60, %v5794_v59  ;;  %v5832_v22 = vmax.f32 %v598_v9, 0.0  ;;  %v5889_v15 = vpack.c.bf16 %v818_v27, %v819_v52  ;;  %v827_v52 = vrot.slane %v5762_v36, 1 }
  0x34   : > { %4750 = vmatpush3.bf16.msra.mxu1 %v5447_v18  ;;  %v4462_v18 = vld [vmem:[%s5636_s12 + $0x50] sm:$0xff]   ;;  %v601_v35 = vadd.f32 %v5653_v17, %v569_v42  ;;  %v602_v37 = vadd.f32 %v5653_v17, %v570_v20  ;;  %v823_v20 = vrot.slane %v5742_v23, 1 }
  0x35   : > { %4942 = vmatpush3.bf16.msra.mxu0 %v5446_v13  ;;  %4751 = vmatprep.subr.bf16.mxu1 %v5450_v25  ;;  %v5452_v13 = vld [vmem:[%s6672_s3 + $0x168] sm:$0xff]   ;;  %v4346_v24 = vunpack.c.l.bf16 %v4462_v18  ;;  %v4347_v31 = vunpack.c.h.bf16 %v4462_v18  ;;  %v5851_v40 = vpack.c.bf16 %v5832_v22, %v5830_v43 }
  0x36   : > { %4943 = vmatprep.subr.bf16.mxu0 %v5448_v32  ;;  %v5877_v3 = vmax.f32 %v601_v35, 0.0  ;;  %v5879_v6 = vmax.f32 %v602_v37, 0.0  ;;  %v4465_v18 = vld [vmem:[%s5636_s12 + $0x68] sm:$0xff]  }
  0x37   : > { %4720 = vmatmul.mubr.bf16.gmra.mrb[4].mxu1 %v5731_v14  ;;  %6694 = vst [vmem:[#allocation3_spill] sm:$0xff] %v5851_v40  ;;  %v572_v63 = vmul.f32 %v4347_v31, %v5644_v12 }
  0x38   : > { %4912 = vmatmul.mubr.bf16.gmra.mrb[4].mxu0 %v5767_v38  ;;  %4723 = vmatprep.mubr.bf16.mxu1 %v5767_v38 }
  0x39   : > { %4944 = vmatpush3.bf16.msra.mxu0 %v5448_v32  ;;  %4915 = vmatprep.mubr.bf16.mxu0 %v5775_v45  ;;  %v599_v32 = vadd.f32 %v5653_v17, %v567_v16  ;;  %v604_v42 = vadd.f32 %v5653_v17, %v572_v63 }
  0x3a   : > { %4945 = vmatprep.subr.bf16.mxu0 %v5449_v44  ;;  %4752 = vmatpush3.bf16.msra.mxu1 %v5450_v25  ;;  %v4463_v25 = vld [vmem:[%s5636_s12 + $0x58] sm:$0xff]  }
  0x3b   : > { %4753 = vmatprep.subr.bf16.mxu1 %v5453_v50  ;;  %v4351_v48 = vunpack.c.h.bf16 %v4463_v25  ;;  %v5873_v0 = vmax.f32 %v599_v32, 0.0  ;;  %v4358_v32 = vunpack.c.l.bf16 %v4465_v18 }
  0x3d   : > { %4946 = vmatpush3.bf16.msra.mxu0 %v5449_v44  ;;  %v4350_v44 = vunpack.c.l.bf16 %v4463_v25  ;;  %v574_v11 = vmul.f32 %v4351_v48, %v5644_v12  ;;  %v5906_v25 = vpack.c.bf16 %v5879_v6, %v5877_v3  ;;  %v5459_v48 = vld [vmem:[%s6672_s3 + $0x188] sm:$0xff]  }
  0x3e   : > { %4947 = vmatprep.subr.bf16.mxu0 %v5451_v62  ;;  %4754 = vmatpush3.bf16.msra.mxu1 %v5453_v50  ;;  %v571_v50 = vmul.f32 %v4346_v24, %v5644_v12 }
  0x3f   : > { %4724 = vmatmul.mubr.bf16.gmra.mrb[8].mxu1 %v5775_v45  ;;  %4755 = vmatprep.subr.bf16.mxu1 %v5456_v1  ;;  %v573_v9 = vmul.f32 %v4350_v44, %v5644_v12  ;;  %6698 = vst [vmem:[#allocation5_spill] sm:$0xff] %v5906_v25  ;;  %v606_v31 = vadd.f32 %v5653_v17, %v574_v11 }
  0x40   : > { %4916 = vmatmul.mubr.bf16.gmra.mrb[8].mxu0 %v5806_v7  ;;  %4727 = vmatprep.mubr.bf16.mxu1 %v5806_v7  ;;  %v603_v16 = vadd.f32 %v5653_v17, %v571_v50  ;;  %v826_v50 = vrot.slane %v5758_v33, 1 }
  0x41   : > { %4948 = vmatpush3.bf16.msra.mxu0 %v5451_v62  ;;  %4919 = vmatprep.mubr.bf16.mxu0 %v5812_v10  ;;  %v821_v62 = vrot.slane %v5721_v5, 1  ;;  %v605_v30 = vadd.f32 %v5653_v17, %v573_v9  ;;  %v5937_v63 = vmax.f32 %v606_v31, 0.0  ;;  %v577_v9 = vmul.f32 %v4358_v32, %v5644_v12 }
  0x42   : > { %4949 = vmatprep.subr.bf16.mxu0 %v5452_v13  ;;  %4756 = vmatpush3.bf16.msra.mxu1 %v5456_v1  ;;  %v5875_v1 = vmax.f32 %v600_v34, 0.0  ;;  %v4359_v34 = vunpack.c.h.bf16 %v4465_v18  ;;  %v5917_v37 = vmax.f32 %v603_v16, 0.0  ;;  %v829_v18 = vrot.slane %v5787_v53, 1 }
  0x43   : > { %4757 = vmatprep.subr.bf16.mxu1 %v5458_v21  ;;  %v822_v19 = vsel %vm810_vm1, %v820_v56, %v821_v62  ;;  %v609_v32 = vadd.f32 %v5653_v17, %v577_v9  ;;  %v833_v9 = vrot.slane %v5796_v60, 1 }
  0x44   : > { %v5902_v24 = vpack.c.bf16 %v5875_v1, %v5873_v0  ;;  %v5915_v35 = vpack.c.bf16 %v821_v62, %v822_v19  ;;  %v5935_v62 = vmax.f32 %v605_v30, 0.0  ;;  %v578_v11 = vmul.f32 %v4359_v34, %v5644_v12 }
  0x45   : > { %4950 = vmatpush3.bf16.msra.mxu0 %v5452_v13  ;;  %v4464_v13 = vld [vmem:[%s5636_s12 + $0x60] sm:$0xff]   ;;  %v711_v19 = vrot.slane %v5719_v4, 7 }
  0x46   : > { %4951 = vmatprep.subr.bf16.mxu0 %v5454_v29  ;;  %4758 = vmatpush3.bf16.msra.mxu1 %v5458_v21  ;;  %v824_v21 = vrot.slane %v5749_v28, 1  ;;  %6697 = vst [vmem:[#allocation4_spill] sm:$0xff] %v5902_v24  ;;  %v4354_v26 = vunpack.c.l.bf16 %v4464_v13  ;;  %v4355_v27 = vunpack.c.h.bf16 %v4464_v13  ;;  %v4466_v13 = vld [vmem:[%s5636_s12 + $0x70] sm:$0xff]   ;;  %v5963_v4 = vpack.c.bf16 %v5937_v63, %v5935_v62 }
  0x47   : > { %4728 = vmatmul.mubr.bf16.gmra.mrb[12].mxu1 %v5812_v10  ;;  %4759 = vmatprep.subr.bf16.mxu1 %v5460_v39  ;;  %v4362_v30 = vunpack.c.l.bf16 %v4466_v13  ;;  %v4363_v31 = vunpack.c.h.bf16 %v4466_v13  ;;  %v610_v34 = vadd.f32 %v5653_v17, %v578_v11  ;;  %v717_v13 = vrot.slane %v5758_v33, 7 }
  0x48   : > { %4920 = vmatmul.mubr.bf16.gmra.mrb[12].mxu0 %v5851_v40  ;;  %4731 = vmatprep.mubr.bf16.mxu1 %v5851_v40  ;;  %v825_v44 = vsel %vm810_vm1, %v823_v20, %v824_v21  ;;  %v576_v56 = vmul.f32 %v4355_v27, %v5644_v12  ;;  %v828_v20 = vsel %vm810_vm1, %v826_v50, %v827_v52  ;;  %v718_v11 = vrot.slane %v5762_v36, 7 }
  0x49   : > { %4952 = vmatpush3.bf16.msra.mxu0 %v5454_v29  ;;  %4955 = vmatprep.mubr.msk.bf16.mxu0 %vm5865_vm3, %v5856_v49  ;;  %v5911_v29 = vld [vmem:[%s6672_s3 + $0x80] sm:$0xff]   ;;  %v5948_v16 = vpack.c.bf16 %v824_v21, %v825_v44  ;;  %6700 = vst [vmem:[#allocation7_spill] sm:$0xff] %v5963_v4  ;;  %v5463_v44 = vld [vmem:[%s6672_s3 + $0x198] sm:$0xff]   ;;  %v5971_v50 = vpack.c.bf16 %v827_v52, %v828_v20  ;;  %v5993_v36 = vmax.f32 %v610_v34, 0.0 }
  0x4a   : > { %4953 = vmatprep.subr.bf16.mxu0 %v5455_v41  ;;  %4760 = vmatpush3.bf16.msra.mxu1 %v5460_v39  ;;  %v5919_v39 = vmax.f32 %v604_v42, 0.0  ;;  %v608_v21 = vadd.f32 %v5653_v17, %v576_v56  ;;  %v580_v52 = vmul.f32 %v4363_v31, %v5644_v12  ;;  %v719_v20 = vsel %vm701_vm0, %v717_v13, %v718_v11  ;;  %v5465_v31 = vld [vmem:[%s6672_s3 + $0x1a0] sm:$0xff]  }
  0x4b   : > { %4761 = vmatprep.subr.bf16.mxu1 %v5462_v51  ;;  %v836_v11 = vrot.slane %v5832_v22, 1 }
  0x4c   : > { %v5954_v42 = vpack.c.bf16 %v5919_v39, %v5917_v37 }
  0x4d   : > { %4954 = vmatpush3.bf16.msra.mxu0 %v5455_v41  ;;  %v575_v41 = vmul.f32 %v4354_v26, %v5644_v12  ;;  %v830_v26 = vrot.slane %v5789_v54, 1 }
  0x4e   : > { %4987 = vmatprep.subr.bf16.mxu0 %v5457_v8  ;;  %4762 = vmatpush3.bf16.msra.mxu1 %v5462_v51  ;;  %v5461_v51 = vld [vmem:[%s6672_s3 + $0x190] sm:$0xff]   ;;  %6699 = vst [vmem:[#allocation6_spill] sm:$0xff] %v5954_v42 }
  0x4f   : > { %4732 = vmatmul.mubr.bf16.gmra.mrb[16].mxu1 %v5902_v24  ;;  %4795 = vmatprep.subr.bf16.mxu1 %v5911_v29  ;;  %v607_v27 = vadd.f32 %v5653_v17, %v575_v41  ;;  %v832_v41 = vrot.slane %v5794_v59, 1  ;;  %v5982_v24 = vmax.f32 %v608_v21, 0.0  ;;  %v831_v33 = vsel %vm810_vm1, %v829_v18, %v830_v26 }
  0x50   : > { %4956 = vmatmul.mubr.msk.bf16.vlgmr.msra.gmra.mrb[0].mxu0 %vm5865_vm3, %v5889_v15  ;;  %4735 = vmatprep.mubr.bf16.mxu1 %v5906_v25  ;;  %v6001_v21 = vpack.c.bf16 %v719_v20, %v717_v13  ;;  %v612_v13 = vadd.f32 %v5653_v17, %v580_v52  ;;  %v838_v52 = vrot.slane %v5873_v0, 1 }
  0x51   : > { %4988 = vmatpush3.bf16.msra.mxu0 %v5457_v8  ;;  %4959 = vmatprep.mubr.msk.bf16.mxu0 %vm5865_vm3, %v5915_v35  ;;  %v712_v8 = vrot.slane %v5721_v5, 7  ;;  %v5980_v25 = vmax.f32 %v607_v27, 0.0  ;;  %v703_v27 = vrot.slane %v5687_v47, 7  ;;  %v834_v18 = vsel %vm810_vm1, %v832_v41, %v833_v9 }
  0x52   : > { %4989 = vmatprep.subr.bf16.mxu0 %v5459_v48  ;;  %v835_v41 = vrot.slane %v5830_v43, 1  ;;  %v6024_v20 = vpack.c.bf16 %v833_v9, %v834_v18  ;;  %v812_v18 = vrot.slane %v5687_v47, 1 }
  0x53   : > { %v713_v5 = vsel %vm701_vm0, %v711_v19, %v712_v8  ;;  %v702_v8 = vrot.slane %v5685_v46, 7  ;;  %v6011_v34 = vpack.c.bf16 %v5982_v24, %v5980_v25 }
  0x54   : > { %v5974_v56 = vpack.c.bf16 %v713_v5, %v711_v19  ;;  %v5991_v19 = vmax.f32 %v609_v32, 0.0  ;;  %v724_v32 = vrot.slane %v5796_v60, 7  ;;  %v6013_v5 = vpack.c.bf16 %v830_v26, %v831_v33  ;;  %v5467_v26 = vld [vmem:[%s6672_s3 + $0x1a8] sm:$0xff]  }
  0x55   : > { %4990 = vmatpush3.bf16.msra.mxu0 %v5459_v48  ;;  %v579_v48 = vmul.f32 %v4362_v30, %v5644_v12  ;;  %v723_v30 = vrot.slane %v5794_v59, 7  ;;  %6701 = vst [vmem:[#allocation8_spill] sm:$0xff] %v6011_v34  ;;  %v839_v33 = vrot.slane %v5875_v1, 1  ;;  %v704_v9 = vsel %vm701_vm0, %v702_v8, %v703_v27 }
  0x56   : > { %4991 = vmatprep.subr.bf16.mxu0 %v5461_v51  ;;  %v6019_v59 = vpack.c.bf16 %v5993_v36, %v5991_v19  ;;  %v3727_v47 = vpack.c.bf16 %v704_v9, %v702_v8  ;;  %v845_v8 = vrot.slane %v5919_v39, 1 }
  0x57   : > { %4736 = vmatmul.mubr.bf16.gmra.mrb[20].mxu1 %v5954_v42  ;;  %v725_v60 = vsel %vm701_vm0, %v723_v30, %v724_v32  ;;  %v6036_v42 = vmax.f32 %v612_v13, 0.0  ;;  %v840_v32 = vsel %vm810_vm1, %v838_v52, %v839_v33  ;;  %v841_v13 = vrot.slane %v5877_v3, 1 }
  0x58   : > { %4960 = vmatmul.mubr.msk.bf16.gmra.mrb[4].mxu0 %vm5865_vm3, %v5948_v16  ;;  %4739 = vmatprep.mubr.bf16.mxu1 %v5963_v4  ;;  %6702 = vst [vmem:[#allocation9_spill] sm:$0xff] %v6019_v59 }
  0x59   : > { %4963 = vmatprep.mubr.msk.bf16.mxu0 %vm5865_vm3, %v5971_v50  ;;  %4992 = vmatpush3.bf16.msra.mxu0 %v5461_v51  ;;  %v611_v51 = vadd.f32 %v5653_v17, %v579_v48  ;;  %v6029_v48 = vpack.c.bf16 %v725_v60, %v723_v30  ;;  %v811_v30 = vrot.slane %v5685_v46, 1  ;;  %v709_v60 = vrot.slane %v5704_v58, 7 }
  0x5a   : > { %4993 = vmatprep.subr.bf16.mxu0 %v5463_v44 }
  0x5b   : > { %v6034_v4 = vmax.f32 %v611_v51, 0.0  ;;  %v5469_v51 = vld [vmem:[%s6672_s3 + $0x1b0] sm:$0xff]  }
  0x5d   : > { %4994 = vmatpush3.bf16.msra.mxu0 %v5463_v44  ;;  %v837_v44 = vsel %vm810_vm1, %v835_v41, %v836_v11  ;;  %v6056_v27 = vpack.c.bf16 %v6036_v42, %v6034_v4  ;;  %v708_v41 = vrot.slane %v5702_v57, 7  ;;  %v5471_v57 = vld [vmem:[%s6672_s3 + $0x1b8] sm:$0xff]  }
  0x5e   : > { %4995 = vmatprep.subr.bf16.mxu0 %v5465_v31  ;;  %v6058_v46 = vpack.c.bf16 %v836_v11, %v837_v44  ;;  %v844_v11 = vrot.slane %v5917_v37, 1  ;;  %v813_v44 = vsel %vm810_vm1, %v811_v30, %v812_v18  ;;  %v4467_v30 = vld [vmem:[%s5636_s12 + $0x78] sm:$0xff]  }
  0x5f   : > { %4740 = vmatmul.mubr.bf16.gmra.mrb[24].mxu1 %v6011_v34  ;;  %6703 = vst [vmem:[#allocation10_spill] sm:$0xff] %v6056_v27  ;;  %v6077_v58 = vpack.c.bf16 %v812_v18, %v813_v44  ;;  %v6095_v18 = vld [vmem:[%s6672_s3 + $0x1c0] sm:$0xff]   ;;  %v847_v44 = vrot.slane %v5935_v62, 1  ;;  %v4367_v34 = vunpack.c.h.bf16 %v4467_v30 }
  0x60   : > { %4964 = vmatmul.mubr.msk.bf16.gmra.mrb[8].mxu0 %vm5865_vm3, %v6013_v5  ;;  %4743 = vmatprep.mubr.bf16.mxu1 %v6019_v59  ;;  %v6069_v59 = vpack.c.bf16 %v839_v33, %v840_v32  ;;  %v710_v33 = vsel %vm701_vm0, %v708_v41, %v709_v60  ;;  %v846_v9 = vsel %vm810_vm1, %v844_v11, %v845_v8  ;;  %v848_v60 = vrot.slane %v5937_v63, 1 }
  0x61   : > { %4967 = vmatprep.mubr.msk.bf16.mxu0 %vm5865_vm3, %v6024_v20  ;;  %4996 = vmatpush3.bf16.msra.mxu0 %v5465_v31  ;;  %v842_v31 = vrot.slane %v5879_v6, 1  ;;  %v714_v11 = vrot.slane %v5742_v23, 7 }
  0x62   : > { %4997 = vmatprep.subr.bf16.mxu0 %v5467_v26  ;;  %v849_v23 = vsel %vm810_vm1, %v847_v44, %v848_v60  ;;  %v853_v44 = vrot.slane %v5991_v19, 1 }
  0x65   : > { %4998 = vmatpush3.bf16.msra.mxu0 %v5467_v26  ;;  %v843_v26 = vsel %vm810_vm1, %v841_v13, %v842_v31  ;;  %v6101_v13 = vpack.c.bf16 %v845_v8, %v846_v9  ;;  %v851_v8 = vrot.slane %v5982_v24, 1  ;;  %v6134_v9 = vpack.c.bf16 %v848_v60, %v849_v23  ;;  %v5472_v23 = vld [vmem:[%s6672_s3 + $0xa0] sm:$0xff]  }
  0x66   : > { %4999 = vmatprep.subr.bf16.mxu0 %v5469_v51  ;;  %v6097_v32 = vpack.c.bf16 %v842_v31, %v843_v26  ;;  %v5466_v31 = vld [vmem:[%s6672_s3 + $0x88] sm:$0xff]   ;;  %v856_v60 = vrot.slane %v6034_v4, 1 }
  0x67   : > { %4744 = vmatmul.mubr.bf16.gmra.mrb[28].mxu1 %v6056_v27  ;;  %v4366_v27 = vunpack.c.l.bf16 %v4467_v30 }
  0x68   : > { %4968 = vmatmul.mubr.msk.bf16.gmra.mrb[12].mxu0 %vm5865_vm3, %v6058_v46  ;;  %4763 = vmatprep.mubr.msk.bf16.mxu1 %vm6065_vm5, %v3727_v47  ;;  %v6099_v47 = vpack.c.bf16 %v710_v33, %v708_v41  ;;  %v850_v41 = vrot.slane %v5980_v25, 1 }
  0x69   : > { %4971 = vmatprep.mubr.msk.bf16.mxu0 %vm5865_vm3, %v6069_v59  ;;  %5000 = vmatpush3.bf16.msra.mxu0 %v5469_v51  ;;  %v715_v51 = vrot.slane %v5749_v28, 7  ;;  %v581_v26 = vmul.f32 %v4366_v27, %v5644_v12  ;;  %v721_v27 = vrot.slane %v5789_v54, 7 }
  0x6a   : > { %5001 = vmatprep.subr.bf16.mxu0 %v5471_v57  ;;  %v852_v33 = vsel %vm810_vm1, %v850_v41, %v851_v8 }
  0x6b   : > { %v716_v28 = vsel %vm701_vm0, %v714_v11, %v715_v51  ;;  %v854_v51 = vrot.slane %v5993_v36, 1  ;;  %v6141_v40 = vpack.c.bf16 %v851_v8, %v852_v33 }
  0x6c   : > { %v6136_v30 = vpack.c.bf16 %v716_v28, %v714_v11  ;;  %v857_v11 = vrot.slane %v6036_v42, 1 }
  0x6d   : > { %5002 = vmatpush3.bf16.msra.mxu0 %v5471_v57  ;;  %v5468_v57 = vld [vmem:[%s6672_s3 + $0x90] sm:$0xff]  }
  0x6e   : > { %5035 = vmatprep.subr.bf16.mxu0 %v6095_v18  ;;  %v858_v8 = vsel %vm810_vm1, %v856_v60, %v857_v11 }
  0x6f   : > { %4764 = vmatmul.mubr.msk.bf16.vlgmr.msra.gmra.mrb[0].mxu1 %vm6065_vm5, %v5710_v61  ;;  %v720_v61 = vrot.slane %v5787_v53, 7 }
  0x70   : > { %4972 = vmatmul.mubr.msk.bf16.gmra.mrb[16].mxu0 %vm5865_vm3, %v6097_v32  ;;  %4796 = vmatpush3.bf16.msra.mxu1 %v5911_v29  ;;  %v582_v29 = vmul.f32 %v4367_v34, %v5644_v12  ;;  %v613_v12 = vadd.f32 %v5653_v17, %v581_v26 }
  0x71   : > { %4767 = vmatprep.mubr.msk.bf16.mxu1 %vm6065_vm5, %v6099_v47  ;;  %4975 = vmatprep.mubr.msk.bf16.mxu0 %vm5865_vm3, %v6101_v13  ;;  %v722_v53 = vsel %vm701_vm0, %v720_v61, %v721_v27  ;;  %v727_v27 = vrot.slane %v5832_v22, 7 }
  0x72   : > { %4797 = vmatprep.subr.bf16.mxu1 %v5466_v31  ;;  %v614_v34 = vadd.f32 %v5653_v17, %v582_v29  ;;  %v855_v17 = vsel %vm810_vm1, %v853_v44, %v854_v51  ;;  %v6165_v54 = vmax.f32 %v613_v12, 0.0  ;;  %v6175_v26 = vpack.c.bf16 %v722_v53, %v720_v61  ;;  %v5474_v12 = vld [vmem:[%s6672_s3 + $0xa8] sm:$0xff]  }
  0x73   : > { %v6173_v28 = vpack.c.bf16 %v854_v51, %v855_v17  ;;  %v726_v29 = vrot.slane %v5830_v43, 7  ;;  %v5476_v51 = vld [vmem:[%s6672_s3 + $0xb0] sm:$0xff]   ;;  %v732_v17 = vrot.slane %v5877_v3, 7  ;;  %v733_v53 = vrot.slane %v5879_v6, 7  ;;  %v6235_v3 = vld [vmem:[%s6672_s3 + $0xc0] sm:$0xff]  }
  0x74   : > { %4798 = vmatpush3.bf16.msra.mxu1 %v5466_v31  ;;  %v5470_v31 = vld [vmem:[%s6672_s3 + $0x98] sm:$0xff]   ;;  %v6167_v41 = vmax.f32 %v614_v34, 0.0  ;;  %v859_v33 = vrot.slane %v6165_v54, 1 }
  0x75   : > { %4799 = vmatprep.subr.bf16.mxu1 %v5468_v57  ;;  %v728_v22 = vsel %vm701_vm0, %v726_v29, %v727_v27  ;;  %v739_v27 = vrot.slane %v5937_v63, 7 }
  0x76   : > { %v860_v44 = vrot.slane %v6167_v41, 1  ;;  %v6197_v61 = vpack.c.bf16 %v6167_v41, %v6165_v54  ;;  %v6209_v60 = vpack.c.bf16 %v728_v22, %v726_v29  ;;  %v735_v29 = vrot.slane %v5917_v37, 7 }
  0x77   : > { %4768 = vmatmul.mubr.msk.bf16.gmra.mrb[4].mxu1 %vm6065_vm5, %v5974_v56  ;;  %v741_v22 = vrot.slane %v5980_v25, 7 }
  0x78   : > { %4976 = vmatmul.mubr.msk.bf16.gmra.mrb[20].mxu0 %vm5865_vm3, %v6134_v9  ;;  %4771 = vmatprep.mubr.msk.bf16.mxu1 %vm6065_vm5, %v6136_v30  ;;  %v861_v43 = vsel %vm810_vm1, %v859_v33, %v860_v44  ;;  %v736_v33 = vrot.slane %v5919_v39, 7 }
  0x79   : > { %4979 = vmatprep.mubr.msk.bf16.mxu0 %vm5865_vm3, %v6141_v40  ;;  %4800 = vmatpush3.bf16.msra.mxu1 %v5468_v57  ;;  %v6178_v57 = vpack.c.bf16 %v857_v11, %v858_v8  ;;  %v6207_v34 = vpack.c.bf16 %v860_v44, %v861_v43  ;;  %v729_v11 = vrot.slane %v5873_v0, 7  ;;  %v5478_v8 = vld [vmem:[%s6672_s3 + $0xb8] sm:$0xff]   ;;  %v738_v44 = vrot.slane %v5935_v62, 7  ;;  %v5477_v62 = vld [vmem:[%s6672_s3 + $0x1d0] sm:$0xff]  }
  0x7a   : > { %4801 = vmatprep.subr.bf16.mxu1 %v5470_v31  ;;  %v737_v37 = vsel %vm701_vm0, %v735_v29, %v736_v33  ;;  %v5487_v33 = vld [vmem:[%s6672_s3 + $0x1f8] sm:$0xff]  }
  0x7b   : > { %v740_v39 = vsel %vm701_vm0, %v738_v44, %v739_v27  ;;  %v6267_v63 = vpack.c.bf16 %v737_v37, %v735_v29  ;;  %v4369_v29 = vld [vmem:[%s438_s30] sm:$0xff]  }
  0x7c   : > { %v6269_v43 = vpack.c.bf16 %v740_v39, %v738_v44  ;;  %v4371_v44 = vunpack.c.h.bf16 %v4369_v29  ;;  %v4370_v27 = vunpack.c.l.bf16 %v4369_v29  ;;  %v5500_v37 = vld [vmem:[%s6673_s4] ss:$0 sm:$0xff] }
  0x7d   : > { %4802 = vmatpush3.bf16.msra.mxu1 %v5470_v31  ;;  %v730_v31 = vrot.slane %v5875_v1, 7  ;;  %v734_v1 = vsel %vm701_vm0, %v732_v17, %v733_v53  ;;  %v747_v53 = vrot.slane %v6034_v4, 7  ;;  %v5485_v4 = vld [vmem:[%s6672_s3 + $0x1f0] sm:$0xff]  }
  0x7e   : > { %4803 = vmatprep.subr.bf16.mxu1 %v5472_v23  ;;  %v647_v39 = vmul.f32 %v5500_v37, %v4370_v27  ;;  %v5494_v27 = vld [vmem:[%s6672_s3 + $0xf8] sm:$0xff]  }
  0x7f   : > { %4772 = vmatmul.mubr.msk.bf16.gmra.mrb[8].mxu1 %vm6065_vm5, %v6001_v21  ;;  %v731_v0 = vsel %vm701_vm0, %v729_v11, %v730_v31  ;;  %v5479_v31 = vld [vmem:[%s6672_s3 + $0x1d8] sm:$0xff]  }
  0x80   : > { %4980 = vmatmul.mubr.msk.bf16.gmra.mrb[24].mxu0 %vm5865_vm3, %v6173_v28  ;;  %4775 = vmatprep.mubr.msk.bf16.mxu1 %vm6065_vm5, %v6175_v26  ;;  %v6237_v6 = vpack.c.bf16 %v731_v0, %v729_v11  ;;  %v745_v11 = vrot.slane %v5993_v36, 7  ;;  %v5483_v0 = vld [vmem:[%s6672_s3 + $0x1e8] sm:$0xff]  }
  0x81   : > { %4983 = vmatprep.mubr.msk.bf16.mxu0 %vm5865_vm3, %v6178_v57  ;;  %4804 = vmatpush3.bf16.msra.mxu1 %v5472_v23  ;;  %v6239_v23 = vpack.c.bf16 %v734_v1, %v732_v17 }
  0x82   : > { %4805 = vmatprep.subr.bf16.mxu1 %v5474_v12 }
  0x85   : > { %4806 = vmatpush3.bf16.msra.mxu1 %v5474_v12  ;;  %v5475_v12 = vld [vmem:[%s6672_s3 + $0x1c8] sm:$0xff]  }
  0x86   : > { %4807 = vmatprep.subr.bf16.mxu1 %v5476_v51 }
  0x87   : > { %4776 = vmatmul.mubr.msk.bf16.gmra.mrb[12].mxu1 %vm6065_vm5, %v6029_v48 }
  0x88   : > { %4984 = vmatmul.mubr.msk.bf16.gmra.mrb[28].mxu0 %vm5865_vm3, %v6207_v34  ;;  %4779 = vmatprep.mubr.msk.bf16.mxu1 %vm6065_vm5, %v6209_v60 }
  0x89   : > { %5003 = vmatprep.mubr.msk.bf16.mxu0 %vm6065_vm5, %v6099_v47  ;;  %4808 = vmatpush3.bf16.msra.mxu1 %v5476_v51  ;;  %v742_v51 = vrot.slane %v5982_v24, 7 }
  0x8a   : > { %4809 = vmatprep.subr.bf16.mxu1 %v5478_v8 }
  0x8b   : > { %v743_v24 = vsel %vm701_vm0, %v741_v22, %v742_v51 }
  0x8c   : > { %v6295_v36 = vpack.c.bf16 %v743_v24, %v741_v22  ;;  %v5484_v22 = vld [vmem:[%s6672_s3 + $0xd0] sm:$0xff]   ;;  %v751_v24 = vrot.slane %v6167_v41, 7 }
  0x8d   : > { %4810 = vmatpush3.bf16.msra.mxu1 %v5478_v8  ;;  %v748_v8 = vrot.slane %v6036_v42, 7 }
  0x8e   : > { %4843 = vmatprep.subr.bf16.mxu1 %v6235_v3 }
  0x8f   : > { %4780 = vmatmul.mubr.msk.bf16.gmra.mrb[16].mxu1 %vm6065_vm5, %v6237_v6  ;;  %v749_v42 = vsel %vm701_vm0, %v747_v53, %v748_v8 }
  0x90   : > { %5004 = vmatmul.mubr.msk.bf16.vlgmr.msra.gmra.mrb[0].mxu0 %vm6065_vm5, %v5974_v56  ;;  %4783 = vmatprep.mubr.msk.bf16.mxu1 %vm6065_vm5, %v6239_v23  ;;  %v6324_v1 = vpack.c.bf16 %v749_v42, %v747_v53  ;;  %v5488_v53 = vld [vmem:[%s6672_s3 + $0xe0] sm:$0xff]  }
  0x91   : > { %5036 = vmatpush3.bf16.msra.mxu0 %v6095_v18  ;;  %5007 = vmatprep.mubr.msk.bf16.mxu0 %vm6065_vm5, %v6136_v30  ;;  %v744_v18 = vrot.slane %v5991_v19, 7  ;;  %v5481_v19 = vld [vmem:[%s6672_s3 + $0x1e0] sm:$0xff]  }
  0x92   : > { %5037 = vmatprep.subr.bf16.mxu0 %v5475_v12 }
  0x93   : > { %v746_v25 = vsel %vm701_vm0, %v744_v18, %v745_v11 }
  0x94   : > { %v6297_v17 = vpack.c.bf16 %v746_v25, %v744_v18  ;;  %v5486_v25 = vld [vmem:[%s6672_s3 + $0xd8] sm:$0xff]  }
  0x95   : > { %5038 = vmatpush3.bf16.msra.mxu0 %v5475_v12  ;;  %v6344_v12 = vld [vmem:[%s6672_s3 + $0x200] sm:$0xff]  }
  0x96   : > { %5039 = vmatprep.subr.bf16.mxu0 %v5477_v62 }
  0x97   : > { %4784 = vmatmul.mubr.msk.bf16.gmra.mrb[20].mxu1 %vm6065_vm5, %v6267_v63 }
  0x98   : > { %5008 = vmatmul.mubr.msk.bf16.gmra.mrb[4].mxu0 %vm6065_vm5, %v6001_v21  ;;  %4787 = vmatprep.mubr.msk.bf16.mxu1 %vm6065_vm5, %v6269_v43 }
  0x99   : > { %5011 = vmatprep.mubr.msk.bf16.mxu0 %vm6065_vm5, %v6175_v26  ;;  %5040 = vmatpush3.bf16.msra.mxu0 %v5477_v62  ;;  %v648_v62 = vmul.f32 %v5500_v37, %v4371_v44  ;;  %v5491_v37 = vld [vmem:[%s6672_s3 + $0x208] sm:$0xff]  }
  0x9a   : > { %5041 = vmatprep.subr.bf16.mxu0 %v5479_v31 }
  0x9d   : > { %5042 = vmatpush3.bf16.msra.mxu0 %v5479_v31  ;;  %v750_v31 = vrot.slane %v6165_v54, 7 }
  0x9e   : > { %5043 = vmatprep.subr.bf16.mxu0 %v5481_v19 }
  0x9f   : > { %4788 = vmatmul.mubr.msk.bf16.gmra.mrb[24].mxu1 %vm6065_vm5, %v6295_v36 }
  0xa0   : > { %5012 = vmatmul.mubr.msk.bf16.gmra.mrb[8].mxu0 %vm6065_vm5, %v6029_v48  ;;  %4791 = vmatprep.mubr.msk.bf16.mxu1 %vm6065_vm5, %v6297_v17 }
  0xa1   : > { %5015 = vmatprep.mubr.msk.bf16.mxu0 %vm6065_vm5, %v6209_v60  ;;  %5044 = vmatpush3.bf16.msra.mxu0 %v5481_v19  ;;  %v752_v19 = vsel %vm701_vm0, %v750_v31, %v751_v24 }
  0xa2   : > { %5045 = vmatprep.subr.bf16.mxu0 %v5483_v0  ;;  %v6397_v8 = vpack.c.bf16 %v752_v19, %v750_v31  ;;  %v5506_v31 = vld [vmem:[%s6672_s3 + $0x120] sm:$0xff]  }
  0xa5   : > { %5046 = vmatpush3.bf16.msra.mxu0 %v5483_v0 }
  0xa6   : > { %5047 = vmatprep.subr.bf16.mxu0 %v5485_v4 }
  0xa7   : > { %4792 = vmatmul.mubr.msk.bf16.gmra.mrb[28].mxu1 %vm6065_vm5, %v6324_v1 }
  0xa8   : > { %5016 = vmatmul.mubr.msk.bf16.gmra.mrb[12].mxu0 %vm6065_vm5, %v6237_v6  ;;  %4811 = vmatprep.mubr.msk.bf16.mxu1 %vm5865_vm3, %v6077_v58  ;;  %v5482_v58 = vld [vmem:[%s6672_s3 + $0xc8] sm:$0xff]  }
  0xa9   : > { %5019 = vmatprep.mubr.msk.bf16.mxu0 %vm6065_vm5, %v6239_v23  ;;  %5048 = vmatpush3.bf16.msra.mxu0 %v5485_v4  ;;  %v5490_v4 = vld [vmem:[%s6672_s3 + $0xe8] sm:$0xff]  }
  0xaa   : > { %5049 = vmatprep.subr.bf16.mxu0 %v5487_v33 }
  0xad   : > { %5050 = vmatpush3.bf16.msra.mxu0 %v5487_v33  ;;  %v5492_v33 = vld [vmem:[%s6672_s3 + $0xf0] sm:$0xff]  }
  0xae   : > { %5083 = vmatprep.subr.bf16.mxu0 %v6344_v12 }
  0xaf   : > { %4812 = vmatmul.mubr.msk.bf16.vlgmr.msra.gmra.mrb[0].mxu1 %vm5865_vm3, %v5856_v49  ;;  %v5501_v49 = vld [vmem:[%s6674_s5] ss:$0 sm:$0xff] }
  0xb0   : > { %5020 = vmatmul.mubr.msk.bf16.gmra.mrb[16].mxu0 %vm6065_vm5, %v6267_v63  ;;  %4844 = vmatpush3.bf16.msra.mxu1 %v6235_v3  ;;  %v649_v51 = vadd.f32 %v5501_v49, %v647_v39  ;;  %v650_v18 = vadd.f32 %v5501_v49, %v648_v62  ;;  %v5502_v39 = vld [vmem:[%s6672_s3 + $0x100] sm:$0xff]   ;;  %v5495_v62 = vld [vmem:[%s6672_s3 + $0x218] sm:$0xff]  }
  0xb1   : > { %4815 = vmatprep.mubr.msk.bf16.mxu1 %vm5865_vm3, %v5889_v15  ;;  %5023 = vmatprep.mubr.msk.bf16.mxu0 %vm6065_vm5, %v6269_v43  ;;  %v6710_v49 = vld [vmem:[#allocation6_spill] sm:$0xff] }
  0xb2   : > { %4845 = vmatprep.subr.bf16.mxu1 %v5482_v58  ;;  %v651_v3 = vmax.f32 %v649_v51, 0.0  ;;  %v652_v11 = vmax.f32 %v650_v18, 0.0  ;;  %v6711_v51 = vld [vmem:[#allocation7_spill] sm:$0xff] }
  0xb3   : > { %v5503_v18 = vld [vmem:[%s6672_s3 + $0x108] sm:$0xff]  }
  0xb4   : > { %4846 = vmatpush3.bf16.msra.mxu1 %v5482_v58  ;;  %v6389_v54 = vmul.f32 0.0, %v651_v3  ;;  %v6391_v41 = vmul.f32 0.0, %v652_v11  ;;  %v6708_v58 = vld [vmem:[#allocation2_spill] sm:$0xff]  ;;  %v5504_v3 = vld [vmem:[%s6672_s3 + $0x110] sm:$0xff]   ;;  %v5505_v11 = vld [vmem:[%s6672_s3 + $0x118] sm:$0xff]  }
  0xb5   : > { %4847 = vmatprep.subr.bf16.mxu1 %v5484_v22 }
  0xb6   : > { %v753_v0 = vrot.slane %v6389_v54, 7  ;;  %v754_v42 = vrot.slane %v6391_v41, 7  ;;  %v2712_v24 = vpack.c.bf16 %v6391_v41, %v6389_v54 }
  0xb7   : > { %4816 = vmatmul.mubr.msk.bf16.gmra.mrb[4].mxu1 %vm5865_vm3, %v5915_v35 }
  0xb8   : > { %5024 = vmatmul.mubr.msk.bf16.gmra.mrb[20].mxu0 %vm6065_vm5, %v6295_v36  ;;  %4819 = vmatprep.mubr.msk.bf16.mxu1 %vm5865_vm3, %v5948_v16  ;;  %v755_v29 = vsel %vm701_vm0, %v753_v0, %v754_v42 }
  0xb9   : > { %5027 = vmatprep.mubr.msk.bf16.mxu0 %vm6065_vm5, %v6297_v17  ;;  %4848 = vmatpush3.bf16.msra.mxu1 %v5484_v22  ;;  %v4131_v44 = vpack.c.bf16 %v755_v29, %v753_v0  ;;  %v6709_v22 = vld [vmem:[#allocation5_spill] sm:$0xff] }
  0xba   : > { %4849 = vmatprep.subr.bf16.mxu1 %v5486_v25 }
  0xbd   : > { %4850 = vmatpush3.bf16.msra.mxu1 %v5486_v25 }
  0xbe   : > { %4851 = vmatprep.subr.bf16.mxu1 %v5488_v53 }
  0xbf   : > { %4820 = vmatmul.mubr.msk.bf16.gmra.mrb[8].mxu1 %vm5865_vm3, %v5971_v50 }
  0xc0   : > { %5028 = vmatmul.mubr.msk.bf16.gmra.mrb[24].mxu0 %vm6065_vm5, %v6324_v1  ;;  %4823 = vmatprep.mubr.msk.bf16.mxu1 %vm5865_vm3, %v6013_v5 }
  0xc1   : > { %5031 = vmatprep.mubr.msk.bf16.mxu0 %vm6065_vm5, %v6397_v8  ;;  %4852 = vmatpush3.bf16.msra.mxu1 %v5488_v53 }
  0xc2   : > { %4853 = vmatprep.subr.bf16.mxu1 %v5490_v4 }
  0xc5   : > { %4854 = vmatpush3.bf16.msra.mxu1 %v5490_v4 }
  0xc6   : > { %4855 = vmatprep.subr.bf16.mxu1 %v5492_v33 }
  0xc7   : > { %4824 = vmatmul.mubr.msk.bf16.gmra.mrb[12].mxu1 %vm5865_vm3, %v6024_v20 }
  0xc8   : > { %5032 = vmatmul.mubr.msk.bf16.gmra.mrb[28].mxu0 %vm6065_vm5, %v4131_v44  ;;  %4827 = vmatprep.mubr.msk.bf16.mxu1 %vm5865_vm3, %v6058_v46 }
  0xc9   : > { %5051 = vmatprep.mubr.bf16.mxu0 %v5717_v2  ;;  %4856 = vmatpush3.bf16.msra.mxu1 %v5492_v33  ;;  %v5493_v2 = vld [vmem:[%s6672_s3 + $0x210] sm:$0xff]  }
  0xca   : > { %4857 = vmatprep.subr.bf16.mxu1 %v5494_v27 }
  0xcd   : > { %4858 = vmatpush3.bf16.msra.mxu1 %v5494_v27 }
  0xce   : > { %5131 = vmatprep.subr.bf16.mxu1 %v5502_v39 }
  0xcf   : > { %4828 = vmatmul.mubr.msk.bf16.gmra.mrb[16].mxu1 %vm5865_vm3, %v6069_v59 }
  0xd0   : > { %5052 = vmatmul.mubr.bf16.vlgmr.msra.gmra.mrb[0].mxu0 %v5731_v14  ;;  %4831 = vmatprep.mubr.msk.bf16.mxu1 %vm5865_vm3, %v6097_v32  ;;  %v5496_v14 = vld [vmem:[%s6672_s3 + $0x220] sm:$0xff]  }
  0xd1   : > { %5084 = vmatpush3.bf16.msra.mxu0 %v6344_v12  ;;  %5055 = vmatprep.mubr.bf16.mxu0 %v5767_v38  ;;  %v5497_v38 = vld [vmem:[%s6672_s3 + $0x228] sm:$0xff]   ;;  %v5499_v12 = vld [vmem:[%s6672_s3 + $0x238] sm:$0xff]  }
  0xd2   : > { %5085 = vmatprep.subr.bf16.mxu0 %v5491_v37 }
  0xd5   : > { %5086 = vmatpush3.bf16.msra.mxu0 %v5491_v37 }
  0xd6   : > { %5087 = vmatprep.subr.bf16.mxu0 %v5493_v2 }
  0xd7   : > { %4832 = vmatmul.mubr.msk.bf16.gmra.mrb[20].mxu1 %vm5865_vm3, %v6101_v13 }
  0xd8   : > { %5056 = vmatmul.mubr.bf16.gmra.mrb[4].mxu0 %v5775_v45  ;;  %4835 = vmatprep.mubr.msk.bf16.mxu1 %vm5865_vm3, %v6134_v9  ;;  %v6706_v45 = vld [vmem:[#allocation3_spill] sm:$0xff] }
  0xd9   : > { %5059 = vmatprep.mubr.bf16.mxu0 %v5806_v7  ;;  %5088 = vmatpush3.bf16.msra.mxu0 %v5493_v2  ;;  %v5498_v7 = vld [vmem:[%s6672_s3 + $0x230] sm:$0xff]  }
  0xda   : > { %5089 = vmatprep.subr.bf16.mxu0 %v5495_v62 }
  0xdd   : > { %5090 = vmatpush3.bf16.msra.mxu0 %v5495_v62 }
  0xde   : > { %5091 = vmatprep.subr.bf16.mxu0 %v5496_v14 }
  0xdf   : > { %4836 = vmatmul.mubr.msk.bf16.gmra.mrb[24].mxu1 %vm5865_vm3, %v6141_v40 }
  0xe0   : > { %5060 = vmatmul.mubr.bf16.gmra.mrb[8].mxu0 %v5812_v10  ;;  %4839 = vmatprep.mubr.msk.bf16.mxu1 %vm5865_vm3, %v6173_v28  ;;  %v6707_v10 = vld [vmem:[#allocation4_spill] sm:$0xff] }
  0xe1   : > { %5063 = vmatprep.mubr.bf16.mxu0 %v6706_v45  ;;  %5092 = vmatpush3.bf16.msra.mxu0 %v5496_v14 }
  0xe2   : > { %5093 = vmatprep.subr.bf16.mxu0 %v5497_v38 }
  0xe5   : > { %5094 = vmatpush3.bf16.msra.mxu0 %v5497_v38 }
  0xe6   : > { %5095 = vmatprep.subr.bf16.mxu0 %v5498_v7 }
  0xe7   : > { %4840 = vmatmul.mubr.msk.bf16.gmra.mrb[28].mxu1 %vm5865_vm3, %v6178_v57 }
  0xe8   : > { %5064 = vmatmul.mubr.bf16.gmra.mrb[12].mxu0 %v6707_v10  ;;  %4859 = vmatprep.mubr.msk.bf16.mxu1 %vm6065_vm5, %v6708_v58 }
  0xe9   : > { %5067 = vmatprep.mubr.bf16.mxu0 %v6709_v22  ;;  %5096 = vmatpush3.bf16.msra.mxu0 %v5498_v7 }
  0xea   : > { %5097 = vmatprep.subr.bf16.mxu0 %v5499_v12 }
  0xed   : > { %5098 = vmatpush3.bf16.msra.mxu0 %v5499_v12 }
  0xef   : > { %4860 = vmatmul.mubr.msk.bf16.vlgmr.msra.gmra.mrb[0].mxu1 %vm6065_vm5, %v6099_v47  ;;  %v6712_v47 = vld [vmem:[#allocation8_spill] sm:$0xff] }
  0xf0   : > { %5068 = vmatmul.mubr.bf16.gmra.mrb[16].mxu0 %v6710_v49  ;;  %5139 = vmatpush3.bf16.msra.mxu1 %v5502_v39 }
  0xf1   : > { %4863 = vmatprep.mubr.msk.bf16.mxu1 %vm6065_vm5, %v5974_v56  ;;  %5071 = vmatprep.mubr.bf16.mxu0 %v6711_v51  ;;  %v6713_v56 = vld [vmem:[#allocation9_spill] sm:$0xff] }
  0xf2   : > { %5132 = vmatprep.subr.bf16.mxu1 %v5503_v18 }
  0xf4   : > { %5140 = vmatpush3.bf16.msra.mxu1 %v5503_v18 }
  0xf5   : > { %5133 = vmatprep.subr.bf16.mxu1 %v5504_v3 }
  0xf7   : > { %4864 = vmatmul.mubr.msk.bf16.gmra.mrb[4].mxu1 %vm6065_vm5, %v6136_v30  ;;  %v6714_v30 = vld [vmem:[#allocation10_spill] sm:$0xff] }
  0xf8   : > { %5072 = vmatmul.mubr.bf16.gmra.mrb[20].mxu0 %v6712_v47  ;;  %4867 = vmatprep.mubr.msk.bf16.mxu1 %vm6065_vm5, %v6001_v21  ;;  %v5507_v21 = vld [vmem:[%s6672_s3 + $0x128] sm:$0xff]  }
  0xf9   : > { %5075 = vmatprep.mubr.bf16.mxu0 %v6713_v56  ;;  %5141 = vmatpush3.bf16.msra.mxu1 %v5504_v3 }
  0xfa   : > { %5134 = vmatprep.subr.bf16.mxu1 %v5505_v11 }
  0xfd   : > { %5142 = vmatpush3.bf16.msra.mxu1 %v5505_v11 }
  0xfe   : > { %5135 = vmatprep.subr.bf16.mxu1 %v5506_v31 }
  0xff   : > { %4868 = vmatmul.mubr.msk.bf16.gmra.mrb[8].mxu1 %vm6065_vm5, %v6175_v26  ;;  %v5508_v26 = vld [vmem:[%s6672_s3 + $0x130] sm:$0xff]  }
 0x100   : > { %5076 = vmatmul.mubr.bf16.gmra.mrb[24].mxu0 %v6714_v30  ;;  %4871 = vmatprep.mubr.msk.bf16.mxu1 %vm6065_vm5, %v6029_v48  ;;  %v5509_v48 = vld [vmem:[%s6672_s3 + $0x138] sm:$0xff]  }
 0x101   : > { %5079 = vmatprep.mubr.bf16.mxu0 %v6197_v61  ;;  %5143 = vmatpush3.bf16.msra.mxu1 %v5506_v31 }
 0x102   : > { %5136 = vmatprep.subr.bf16.mxu1 %v5507_v21 }
 0x105   : > { %5144 = vmatpush3.bf16.msra.mxu1 %v5507_v21 }
 0x106   : > { %5137 = vmatprep.subr.bf16.mxu1 %v5508_v26 }
 0x107   : > { %4872 = vmatmul.mubr.msk.bf16.gmra.mrb[12].mxu1 %vm6065_vm5, %v6209_v60 }
 0x108   : > { %5080 = vmatmul.mubr.bf16.gmra.mrb[28].mxu0 %v2712_v24  ;;  %4875 = vmatprep.mubr.msk.bf16.mxu1 %vm6065_vm5, %v6237_v6 }
 0x109   : > { %5099 = vmatprep.mubr.msk.bf16.mxu0 %vm5865_vm3, %v5889_v15  ;;  %5145 = vmatpush3.bf16.msra.mxu1 %v5508_v26  ;;  %v862_v15 = vrot.slane %v6389_v54, 1 }
 0x10a   : > { %5138 = vmatprep.subr.bf16.mxu1 %v5509_v48 }
 0x10d   : > { %5146 = vmatpush3.bf16.msra.mxu1 %v5509_v48 }
 0x10f   : > { %4876 = vmatmul.mubr.msk.bf16.gmra.mrb[16].mxu1 %vm6065_vm5, %v6239_v23 }
 0x110   : > { %5100 = vmatmul.mubr.msk.bf16.vlgmr.msra.gmra.mrb[0].mxu0 %vm5865_vm3, %v5915_v35  ;;  %4879 = vmatprep.mubr.msk.bf16.mxu1 %vm6065_vm5, %v6267_v63  ;;  %v863_v35 = vrot.slane %v6391_v41, 1 }
 0x111   : > { %5103 = vmatprep.mubr.msk.bf16.mxu0 %vm5865_vm3, %v5948_v16 }
 0x117   : > { %4880 = vmatmul.mubr.msk.bf16.gmra.mrb[20].mxu1 %vm6065_vm5, %v6269_v43 }
 0x118   : > { %5104 = vmatmul.mubr.msk.bf16.gmra.mrb[4].mxu0 %vm5865_vm3, %v5971_v50  ;;  %4883 = vmatprep.mubr.msk.bf16.mxu1 %vm6065_vm5, %v6295_v36 }
 0x119   : > { %5107 = vmatprep.mubr.msk.bf16.mxu0 %vm5865_vm3, %v6013_v5 }
 0x11f   : > { %4884 = vmatmul.mubr.msk.bf16.gmra.mrb[24].mxu1 %vm6065_vm5, %v6297_v17 }
 0x120   : > { %5108 = vmatmul.mubr.msk.bf16.gmra.mrb[8].mxu0 %vm5865_vm3, %v6024_v20  ;;  %4887 = vmatprep.mubr.msk.bf16.mxu1 %vm6065_vm5, %v6324_v1 }
 0x121   : > { %5111 = vmatprep.mubr.msk.bf16.mxu0 %vm5865_vm3, %v6058_v46 }
 0x127   : > { %4888 = vmatmul.mubr.msk.bf16.gmra.mrb[28].mxu1 %vm6065_vm5, %v6397_v8 }
 0x128   : > { %5112 = vmatmul.mubr.msk.bf16.gmra.mrb[12].mxu0 %vm5865_vm3, %v6069_v59  ;;  %4923 = vmatprep.mubr.bf16.mxu1 %v6707_v10 }
 0x129   : > { %5115 = vmatprep.mubr.msk.bf16.mxu0 %vm5865_vm3, %v6097_v32 }
 0x12f   : > { %4924 = vmatmul.mubr.bf16.vlgmr.msra.gmra.mrb[16].mxu1 %v6709_v22 }
 0x130   : > { %5116 = vmatmul.mubr.msk.bf16.gmra.mrb[16].mxu0 %vm5865_vm3, %v6101_v13  ;;  %4927 = vmatprep.mubr.bf16.mxu1 %v6710_v49 }
 0x131   : > { %5119 = vmatprep.mubr.msk.bf16.mxu0 %vm5865_vm3, %v6134_v9 }
 0x137   : > { %4928 = vmatmul.mubr.bf16.gmra.mrb[20].mxu1 %v6711_v51 }
 0x138   : > { %5120 = vmatmul.mubr.msk.bf16.gmra.mrb[20].mxu0 %vm5865_vm3, %v6141_v40  ;;  %4931 = vmatprep.mubr.bf16.mxu1 %v6712_v47  ;;  %v864_v40 = vsel %vm810_vm1, %v862_v15, %v863_v35 }
 0x139   : > { %5123 = vmatprep.mubr.msk.bf16.mxu0 %vm5865_vm3, %v6173_v28  ;;  %v4227_v16 = vpack.c.bf16 %v863_v35, %v864_v40 }
 0x13f   : > { %4932 = vmatmul.mubr.bf16.gmra.mrb[24].mxu1 %v6713_v56 }
 0x140   : > { %5124 = vmatmul.mubr.msk.bf16.gmra.mrb[24].mxu0 %vm5865_vm3, %v6178_v57  ;;  %4935 = vmatprep.mubr.bf16.mxu1 %v6714_v30 }
 0x141   : > { %5127 = vmatprep.mubr.msk.bf16.mxu0 %vm5865_vm3, %v6207_v34 }
 0x147   : > { %4936 = vmatmul.mubr.bf16.gmra.mrb[28].mxu1 %v6197_v61 }
 0x148   : > { %5128 = vmatmul.mubr.msk.bf16.gmra.mrb[28].mxu0 %vm5865_vm3, %v4227_v16 }
 0x1c2   : > { %v4861_v50 = vpop.f32.mrb[0].mxu1 }
 0x1c3   : > { %v1776_v5 = vpop.f32.mrb[1].mxu1 }
 0x1c4   : > { %v4862_v59 = vpop.f32.mrb[2].mxu1 }
 0x1c5   : > { %v1779_v20 = vpop.f32.mrb[3].mxu1 }
 0x1ca   : > { %v4865_v46 = vpop.f32.mrb[4].mxu1 }
 0x1cb   : > { %v1792_v52 = vpop.f32.mrb[5].mxu1 }
 0x1cc   : > { %v4866_v32 = vpop.f32.mrb[6].mxu1 }
 0x1cd   : > { %v1795_v13 = vpop.f32.mrb[7].mxu1 }
 0x1d2   : > { %v4869_v9 = vpop.f32.mrb[8].mxu1 }
 0x1d3   : > { %v1808_v28 = vpop.f32.mrb[9].mxu1 }
 0x1d4   : > { %v4870_v57 = vpop.f32.mrb[10].mxu1 }
 0x1d5   : > { %v1811_v34 = vpop.f32.mrb[11].mxu1 }
 0x1da   : > { %v6621_v60 = vpop.f32.mrb[12].mxu1 }
 0x1db   : > { %v6623_v6 = vpop.f32.mrb[13].mxu1 }
 0x1dc   : > { %v6625_v61 = vpop.f32.mrb[14].mxu1 }
 0x1dd   : > { %v6627_v55 = vpop.f32.mrb[15].mxu1 }
 0x1e3   : > { %v5101_v23 = vpop.f32.mrb[0].mxu0 }
 0x1e4   : > { %v5147_v63 = vadd.f32 %v5101_v23, %v4861_v50  ;;  %v3071_v43 = vpop.f32.mrb[1].mxu0 }
 0x1e5   : > { %v5148_v36 = vadd.f32 %v3071_v43, %v1776_v5  ;;  %v5102_v17 = vpop.f32.mrb[2].mxu0 }
 0x1e6   : > { %v5149_v1 = vadd.f32 %v5102_v17, %v4862_v59  ;;  %v3074_v25 = vpop.f32.mrb[3].mxu0  ;;  %v3429_v42 = vmul.f32 %v5147_v63, %v5147_v63 }
 0x1e7   : > { %v5150_v54 = vadd.f32 %v3074_v25, %v1779_v20  ;;  %v3427_v19 = vmul.f32 %v5148_v36, %v5148_v36 }
 0x1e8   : > { %v4380_v41 = vpack.c.bf16 %v5149_v1, %v5147_v63  ;;  %v3430_v37 = vmul.f32 %v5149_v1, %v5149_v1 }
 0x1e9   : > { %v4375_v53 = vpack.c.bf16 %v5150_v54, %v5148_v36  ;;  %v3390_v8 = vadd.f32 %v5150_v54, %v5148_v36  ;;  %v3428_v0 = vmul.f32 %v5150_v54, %v5150_v54 }
 0x1ea   : > { %4468 = vst [vmem:[%s6633_s8 + $0x8] sm:$0xff] %v4380_v41  }
 0x1eb   : > { %4376 = vst [vmem:[%s6633_s8] sm:$0xff] %v4375_v53   ;;  %v3391_v4 = vadd.f32 %v5147_v63, %v3390_v8  ;;  %v3459_v29 = vadd.f32 %v3428_v0, %v3427_v19  ;;  %v5105_v33 = vpop.f32.mrb[4].mxu0 }
 0x1ec   : > { %v5151_v44 = vadd.f32 %v5105_v33, %v4865_v46  ;;  %v3087_v27 = vpop.f32.mrb[5].mxu0 }
 0x1ed   : > { %v3460_v39 = vadd.f32 %v3459_v29, %v3429_v42  ;;  %v5152_v2 = vadd.f32 %v3087_v27, %v1792_v52  ;;  %v3392_v62 = vadd.f32 %v5149_v1, %v3391_v4  ;;  %v5106_v14 = vpop.f32.mrb[6].mxu0 }
 0x1ee   : > { %v5153_v38 = vadd.f32 %v5106_v14, %v4866_v32  ;;  %v3090_v45 = vpop.f32.mrb[7].mxu0  ;;  %v3433_v47 = vmul.f32 %v5151_v44, %v5151_v44 }
 0x1ef   : > { %v3393_v7 = vadd.f32 %v5152_v2, %v3392_v62  ;;  %v3431_v12 = vmul.f32 %v5152_v2, %v5152_v2  ;;  %v3461_v10 = vadd.f32 %v3460_v39, %v3430_v37  ;;  %v5154_v58 = vadd.f32 %v3090_v45, %v1795_v13 }
 0x1f0   : > { %v4390_v22 = vpack.c.bf16 %v5153_v38, %v5151_v44  ;;  %v3434_v24 = vmul.f32 %v5153_v38, %v5153_v38 }
 0x1f1   : > { %v3462_v49 = vadd.f32 %v3461_v10, %v3431_v12  ;;  %v4385_v51 = vpack.c.bf16 %v5154_v58, %v5152_v2  ;;  %v3394_v18 = vadd.f32 %v5154_v58, %v3393_v7  ;;  %v3432_v3 = vmul.f32 %v5154_v58, %v5154_v58 }
 0x1f2   : > { %4470 = vst [vmem:[%s6633_s8 + $0x18] sm:$0xff] %v4390_v22  }
 0x1f3   : > { %4469 = vst [vmem:[%s6633_s8 + $0x10] sm:$0xff] %v4385_v51   ;;  %v3395_v56 = vadd.f32 %v5151_v44, %v3394_v18  ;;  %v3463_v11 = vadd.f32 %v3462_v49, %v3432_v3  ;;  %v5109_v31 = vpop.f32.mrb[8].mxu0 }
 0x1f4   : > { %v5155_v30 = vadd.f32 %v5109_v31, %v4869_v9  ;;  %v3103_v21 = vpop.f32.mrb[9].mxu0 }
 0x1f5   : > { %v3464_v26 = vadd.f32 %v3463_v11, %v3433_v47  ;;  %v5156_v48 = vadd.f32 %v3103_v21, %v1808_v28  ;;  %v3396_v15 = vadd.f32 %v5153_v38, %v3395_v56  ;;  %v5110_v35 = vpop.f32.mrb[10].mxu0 }
 0x1f6   : > { %v5157_v40 = vadd.f32 %v5110_v35, %v4870_v57  ;;  %v3106_v16 = vpop.f32.mrb[11].mxu0  ;;  %v3437_v9 = vmul.f32 %v5155_v30, %v5155_v30 }
 0x1f7   : > { %v3397_v50 = vadd.f32 %v5156_v48, %v3396_v15  ;;  %v3435_v5 = vmul.f32 %v5156_v48, %v5156_v48  ;;  %v3465_v59 = vadd.f32 %v3464_v26, %v3434_v24  ;;  %v5158_v20 = vadd.f32 %v3106_v16, %v1811_v34 }
 0x1f8   : > { %v4400_v46 = vpack.c.bf16 %v5157_v40, %v5155_v30  ;;  %v3438_v57 = vmul.f32 %v5157_v40, %v5157_v40 }
 0x1f9   : > { %v3466_v52 = vadd.f32 %v3465_v59, %v3435_v5  ;;  %v4395_v32 = vpack.c.bf16 %v5158_v20, %v5156_v48  ;;  %v3398_v13 = vadd.f32 %v5158_v20, %v3397_v50  ;;  %v3436_v23 = vmul.f32 %v5158_v20, %v5158_v20 }
 0x1fa   : > { %4472 = vst [vmem:[%s6633_s8 + $0x28] sm:$0xff] %v4400_v46  }
 0x1fb   : > { %4471 = vst [vmem:[%s6633_s8 + $0x20] sm:$0xff] %v4395_v32   ;;  %v3399_v63 = vadd.f32 %v5155_v30, %v3398_v13  ;;  %v3467_v43 = vadd.f32 %v3466_v52, %v3436_v23  ;;  %v5113_v28 = vpop.f32.mrb[12].mxu0 }
 0x1fc   : > { %v5159_v36 = vadd.f32 %v5113_v28, %v6621_v60  ;;  %v3119_v17 = vpop.f32.mrb[13].mxu0 }
 0x1fd   : > { %v3468_v1 = vadd.f32 %v3467_v43, %v3437_v9  ;;  %v5160_v25 = vadd.f32 %v3119_v17, %v6623_v6  ;;  %v3400_v34 = vadd.f32 %v5157_v40, %v3399_v63  ;;  %v5114_v54 = vpop.f32.mrb[14].mxu0 }
 0x1fe   : > { %v5161_v41 = vadd.f32 %v5114_v54, %v6625_v61  ;;  %v3122_v19 = vpop.f32.mrb[15].mxu0  ;;  %v3441_v37 = vmul.f32 %v5159_v36, %v5159_v36 }
 0x1ff   : > { %v3401_v53 = vadd.f32 %v5160_v25, %v3400_v34  ;;  %v3439_v8 = vmul.f32 %v5160_v25, %v5160_v25  ;;  %v3469_v0 = vadd.f32 %v3468_v1, %v3438_v57  ;;  %v5162_v42 = vadd.f32 %v3122_v19, %v6627_v55 }
 0x200   : > { %v4410_v4 = vpack.c.bf16 %v5161_v41, %v5159_v36  ;;  %v3442_v45 = vmul.f32 %v5161_v41, %v5161_v41 }
 0x201   : > { %v3470_v29 = vadd.f32 %v3469_v0, %v3439_v8  ;;  %v4405_v60 = vpack.c.bf16 %v5162_v42, %v5160_v25  ;;  %v3402_v33 = vadd.f32 %v5162_v42, %v3401_v53  ;;  %v3440_v44 = vmul.f32 %v5162_v42, %v5162_v42 }
 0x202   : > { %4474 = vst [vmem:[%s6633_s8 + $0x38] sm:$0xff] %v4410_v4   ;;  %v4925_v27 = vpop.f32.mrb[16].mxu1 }
 0x203   : > { %4473 = vst [vmem:[%s6633_s8 + $0x30] sm:$0xff] %v4405_v60   ;;  %v3403_v6 = vadd.f32 %v5159_v36, %v3402_v33  ;;  %v3471_v39 = vadd.f32 %v3470_v29, %v3440_v44  ;;  %v5117_v2 = vpop.f32.mrb[16].mxu0  ;;  %v2099_v62 = vpop.f32.mrb[17].mxu1 }
 0x204   : > { %v5163_v61 = vadd.f32 %v5117_v2, %v4925_v27  ;;  %v3135_v14 = vpop.f32.mrb[17].mxu0  ;;  %v4926_v38 = vpop.f32.mrb[18].mxu1 }
 0x205   : > { %v3472_v7 = vadd.f32 %v3471_v39, %v3441_v37  ;;  %v5164_v55 = vadd.f32 %v3135_v14, %v2099_v62  ;;  %v3404_v12 = vadd.f32 %v5161_v41, %v3403_v6  ;;  %v5118_v10 = vpop.f32.mrb[18].mxu0  ;;  %v2102_v58 = vpop.f32.mrb[19].mxu1 }
 0x206   : > { %v5165_v22 = vadd.f32 %v5118_v10, %v4926_v38  ;;  %v3138_v49 = vpop.f32.mrb[19].mxu0  ;;  %v3445_v26 = vmul.f32 %v5163_v61, %v5163_v61 }
 0x207   : > { %v3405_v51 = vadd.f32 %v5164_v55, %v3404_v12  ;;  %v3443_v18 = vmul.f32 %v5164_v55, %v5164_v55  ;;  %v3473_v3 = vadd.f32 %v3472_v7, %v3442_v45  ;;  %v5166_v47 = vadd.f32 %v3138_v49, %v2102_v58 }
 0x208   : > { %v4420_v56 = vpack.c.bf16 %v5165_v22, %v5163_v61  ;;  %v3446_v59 = vmul.f32 %v5165_v22, %v5165_v22 }
 0x209   : > { %v3474_v11 = vadd.f32 %v3473_v3, %v3443_v18  ;;  %v4415_v31 = vpack.c.bf16 %v5166_v47, %v5164_v55  ;;  %v3406_v30 = vadd.f32 %v5166_v47, %v3405_v51  ;;  %v3444_v21 = vmul.f32 %v5166_v47, %v5166_v47 }
 0x20a   : > { %4476 = vst [vmem:[%s6633_s8 + $0x48] sm:$0xff] %v4420_v56   ;;  %v4929_v24 = vpop.f32.mrb[20].mxu1 }
 0x20b   : > { %4475 = vst [vmem:[%s6633_s8 + $0x40] sm:$0xff] %v4415_v31   ;;  %v3407_v48 = vadd.f32 %v5163_v61, %v3406_v30  ;;  %v3475_v15 = vadd.f32 %v3474_v11, %v3444_v21  ;;  %v5121_v35 = vpop.f32.mrb[20].mxu0  ;;  %v2115_v40 = vpop.f32.mrb[21].mxu1 }
 0x20c   : > { %v5167_v16 = vadd.f32 %v5121_v35, %v4929_v24  ;;  %v3151_v50 = vpop.f32.mrb[21].mxu0  ;;  %v4930_v5 = vpop.f32.mrb[22].mxu1 }
 0x20d   : > { %v3476_v20 = vadd.f32 %v3475_v15, %v3445_v26  ;;  %v5168_v46 = vadd.f32 %v3151_v50, %v2115_v40  ;;  %v3408_v52 = vadd.f32 %v5165_v22, %v3407_v48  ;;  %v5122_v32 = vpop.f32.mrb[22].mxu0  ;;  %v2118_v13 = vpop.f32.mrb[23].mxu1 }
 0x20e   : > { %v5169_v23 = vadd.f32 %v5122_v32, %v4930_v5  ;;  %v3154_v9 = vpop.f32.mrb[23].mxu0  ;;  %v3449_v41 = vmul.f32 %v5167_v16, %v5167_v16 }
 0x20f   : > { %v3409_v63 = vadd.f32 %v5168_v46, %v3408_v52  ;;  %v3447_v43 = vmul.f32 %v5168_v46, %v5168_v46  ;;  %v3477_v28 = vadd.f32 %v3476_v20, %v3446_v59  ;;  %v5170_v36 = vadd.f32 %v3154_v9, %v2118_v13 }
 0x210   : > { %v4430_v17 = vpack.c.bf16 %v5169_v23, %v5167_v16  ;;  %v3450_v60 = vmul.f32 %v5169_v23, %v5169_v23 }
 0x211   : > { %v3478_v57 = vadd.f32 %v3477_v28, %v3447_v43  ;;  %v4425_v1 = vpack.c.bf16 %v5170_v36, %v5168_v46  ;;  %v3410_v25 = vadd.f32 %v5170_v36, %v3409_v63  ;;  %v3448_v34 = vmul.f32 %v5170_v36, %v5170_v36 }
 0x212   : > { %4478 = vst [vmem:[%s6633_s8 + $0x58] sm:$0xff] %v4430_v17   ;;  %v4933_v54 = vpop.f32.mrb[24].mxu1 }
 0x213   : > { %4477 = vst [vmem:[%s6633_s8 + $0x50] sm:$0xff] %v4425_v1   ;;  %v3411_v19 = vadd.f32 %v5167_v16, %v3410_v25  ;;  %v3479_v53 = vadd.f32 %v3478_v57, %v3448_v34  ;;  %v5125_v8 = vpop.f32.mrb[24].mxu0  ;;  %v2131_v0 = vpop.f32.mrb[25].mxu1 }
 0x214   : > { %v5171_v42 = vadd.f32 %v5125_v8, %v4933_v54  ;;  %v3167_v4 = vpop.f32.mrb[25].mxu0  ;;  %v4934_v29 = vpop.f32.mrb[26].mxu1 }
 0x215   : > { %v3480_v33 = vadd.f32 %v3479_v53, %v3449_v41  ;;  %v5172_v44 = vadd.f32 %v3167_v4, %v2131_v0  ;;  %v3412_v27 = vadd.f32 %v5169_v23, %v3411_v19  ;;  %v5126_v37 = vpop.f32.mrb[26].mxu0  ;;  %v2134_v6 = vpop.f32.mrb[27].mxu1 }
 0x216   : > { %v5173_v39 = vadd.f32 %v5126_v37, %v4934_v29  ;;  %v3170_v2 = vpop.f32.mrb[27].mxu0  ;;  %v3453_v22 = vmul.f32 %v5171_v42, %v5171_v42 }
 0x217   : > { %v3413_v62 = vadd.f32 %v5172_v44, %v3412_v27  ;;  %v3451_v61 = vmul.f32 %v5172_v44, %v5172_v44  ;;  %v3481_v14 = vadd.f32 %v3480_v33, %v3450_v60  ;;  %v5174_v38 = vadd.f32 %v3170_v2, %v2134_v6 }
 0x218   : > { %v4440_v45 = vpack.c.bf16 %v5173_v39, %v5171_v42  ;;  %v3454_v31 = vmul.f32 %v5173_v39, %v5173_v39 }
 0x219   : > { %v3482_v7 = vadd.f32 %v3481_v14, %v3451_v61  ;;  %v4435_v55 = vpack.c.bf16 %v5174_v38, %v5172_v44  ;;  %v3414_v12 = vadd.f32 %v5174_v38, %v3413_v62  ;;  %v3452_v10 = vmul.f32 %v5174_v38, %v5174_v38 }
 0x21a   : > { %4480 = vst [vmem:[%s6633_s8 + $0x68] sm:$0xff] %v4440_v45   ;;  %v4937_v58 = vpop.f32.mrb[28].mxu1 }
 0x21b   : > { %4479 = vst [vmem:[%s6633_s8 + $0x60] sm:$0xff] %v4435_v55   ;;  %v3415_v49 = vadd.f32 %v5171_v42, %v3414_v12  ;;  %v3483_v51 = vadd.f32 %v3482_v7, %v3452_v10  ;;  %v5129_v18 = vpop.f32.mrb[28].mxu0  ;;  %v2147_v3 = vpop.f32.mrb[29].mxu1 }
 0x21c   : > { %v5175_v47 = vadd.f32 %v5129_v18, %v4937_v58  ;;  %v3183_v56 = vpop.f32.mrb[29].mxu0  ;;  %v4938_v11 = vpop.f32.mrb[30].mxu1 }
 0x21d   : > { %v3484_v30 = vadd.f32 %v3483_v51, %v3453_v22  ;;  %v5176_v21 = vadd.f32 %v3183_v56, %v2147_v3  ;;  %v3416_v24 = vadd.f32 %v5173_v39, %v3415_v49  ;;  %v5130_v26 = vpop.f32.mrb[30].mxu0  ;;  %v2150_v48 = vpop.f32.mrb[31].mxu1 }
 0x21e   : > { %v5177_v15 = vadd.f32 %v5130_v26, %v4938_v11  ;;  %v3186_v35 = vpop.f32.mrb[31].mxu0  ;;  %v3457_v13 = vmul.f32 %v5175_v47, %v5175_v47 }
 0x21f   : > { %v3417_v40 = vadd.f32 %v5176_v21, %v3416_v24  ;;  %v3455_v16 = vmul.f32 %v5176_v21, %v5176_v21  ;;  %v3485_v50 = vadd.f32 %v3484_v30, %v3454_v31  ;;  %v5178_v5 = vadd.f32 %v3186_v35, %v2150_v48 }
 0x220   : > { %v4450_v59 = vpack.c.bf16 %v5177_v15, %v5175_v47  ;;  %v3458_v63 = vmul.f32 %v5177_v15, %v5177_v15 }
 0x221   : > { %v3486_v20 = vadd.f32 %v3485_v50, %v3455_v16  ;;  %v4445_v46 = vpack.c.bf16 %v5178_v5, %v5176_v21  ;;  %v3418_v52 = vadd.f32 %v5178_v5, %v3417_v40  ;;  %v3456_v32 = vmul.f32 %v5178_v5, %v5178_v5 }
 0x222   : > { %4482 = vst [vmem:[%s6633_s8 + $0x78] sm:$0xff] %v4450_v59  }
 0x223   : > { %4481 = vst [vmem:[%s6633_s8 + $0x70] sm:$0xff] %v4445_v46   ;;  %v3419_v23 = vadd.f32 %v5175_v47, %v3418_v52  ;;  %v3487_v9 = vadd.f32 %v3486_v20, %v3456_v32 }
 0x225   : > { %v3420_v43 = vadd.f32 %v5177_v15, %v3419_v23  ;;  %v3488_v28 = vadd.f32 %v3487_v9, %v3457_v13 }
 0x227   : > { %v3421_v36 = vrot.slane %v3420_v43, 4  ;;  %v3489_v17 = vadd.f32 %v3488_v28, %v3458_v63 }
 0x229   : > { %v3422_v57 = vadd.f32 %v3421_v36, %v3420_v43  ;;  %v3490_v1 = vrot.slane %v3489_v17, 4 }
 0x22b   : > { %v3423_v25 = vrot.slane %v3422_v57, 2  ;;  %v3491_v34 = vadd.f32 %v3490_v1, %v3489_v17 }
 0x22d   : > { %v3424_v54 = vadd.f32 %v3423_v25, %v3422_v57  ;;  %v3492_v41 = vrot.slane %v3491_v34, 2 }
 0x22f   : > { %v3425_v19 = vrot.slane %v3424_v54, 1  ;;  %v3493_v53 = vadd.f32 %v3492_v41, %v3491_v34 }
 0x231   : > { %v3494_v8 = vrot.slane %v3493_v53, 1  ;;  %v3426_v0 = vadd.f32 %v3425_v19, %v3424_v54 }
 0x233   : > { %v3495_v42 = vadd.f32 %v3494_v8, %v3493_v53 }
 0x235   : > { %v3496_v4 = vsel %vm701_vm0, %v3426_v0, %v3495_v42 }
 0x236   : > { %3501 = vst [vmem:[%s457_s11] sm:$0x3] %v3496_v4 }
 0x237 PF: > { %s18_s26 = sadd.s32 1, %s5532_s26   ;;  %s6715_s24 = smov %s5528_s25 }
 0x238   : > { %p15_p5 = scmp.ge.s32.totalorder %s18_s26, 4   ;;  %s6716_s25 = smov %s6718_s27 }
 0x23a   :  { %17 = sbr.rel (!%p15_p5) target bundleno = 2 (0x2), region = 108 }

// kernel: double_conv_forward.3
= control target key start
LH: loop header
LB: loop body
LE: loop exit
PB: predicated region body
PF: predicated region fallthrough
CT: control target
= control target key end

     0   :  { %s5418_s24 = smov 0   ;;  %s5420_s25 = smov 0   ;;  %s6431_s0 = inlined_call_operand.vmem [shape: bf16[2,16,16,128], index: 0, kind: input, shape index: {}, may-alias: {0,1,2}]   ;;  %s6432_s1 = inlined_call_operand.vmem [shape: bf16[2,16,16,128], index: 1, kind: input, shape index: {}, may-alias: {0,1,2}]   ;;  %s6433_s2 = inlined_call_operand.vmem [shape: bf16[2,16,16,128], index: 2, kind: input, shape index: {}, may-alias: {0,1,2}]   ;;  %s6434_s3 = inlined_call_operand.vmem [shape: bf16[9,128,128], index: 3, kind: input, shape index: {}]   ;;  %s6435_s4 = inlined_call_operand.vmem [shape: f32[1,128], index: 4, kind: input, shape index: {}]   ;;  %s6436_s5 = inlined_call_operand.vmem [shape: f32[1,128], index: 5, kind: input, shape index: {}]   ;;  %s6437_s6 = inlined_call_operand.vmem [shape: bf16[2,16,16,128], index: 6, kind: output, shape index: {0}]   ;;  %s6438_s7 = inlined_call_operand.vmem [shape: f32[2,2,128], index: 7, kind: output, shape index: {1}]  }
   0x1   :  { %s5422_s26 = smov 0  }
   0x2 LB: > { %s30_s4 = sadd.s32 1, %s5371_s25  ;;  %p3559_p0 = scmp.ge.s32.totalorder %s5375_s26, 1  ;;  %s5375_s26 = sphi %s5422_s26, %s18_s26   ;;  %s5371_s25 = sphi %s5420_s25, %s6464_s25   ;;  %s5367_s24 = sphi %s5418_s24, %s6463_s24  }
   0x3   : > { %p32_p1 = scmp.ge.s32.totalorder %s30_s4, 2  ;;  %p326_p2 = scmp.lt.s32.totalorder %s5375_s26, 3 }
   0x5   : > { %s6466_s4 = smov (%p32_p1, %s30_s4), 0  ;;  %p327_p3 = pnand %p3559_p0, %p326_p2 }
   0x6   : > { %v5241_v0 = vld [vmem:[%s6434_s3 + $0x40] sm:$0xff] (!%p327_p3)   ;;  %v5243_v2 = vld [vmem:[%s6434_s3 + $0x48] sm:$0xff] (!%p327_p3)   ;;  %p402_p4 = scmp.lt.s32.totalorder (!%p327_p3), %s5367_s24, 1  ;;  %v5245_v4 = vld [vmem:[%s6434_s3 + $0x50] sm:$0xff] (!%p327_p3)   ;;  %vm579_vm0 = vcmask (!%p327_p3), 1040384   ;;  %vm688_vm1 = vcmask (!%p327_p3), 1046528  }
   0x7   : > { %330 = sbr.rel (%p327_p3) target bundleno = 559 (0x22f), region = 44  ;;  %v5242_v1 = vld [vmem:[%s6434_s3 + $0x100] sm:$0xff] (!%p327_p3)   ;;  %4512 = vmatprep.subr.bf16.mxu1 (!%p327_p3), %v5241_v0  ;;  %v5244_v3 = vld [vmem:[%s6434_s3 + $0x108] sm:$0xff] (!%p327_p3)   ;;  %v5246_v5 = vld [vmem:[%s6434_s3 + $0x110] sm:$0xff] (!%p327_p3)   ;;  %vm5377_vm2 = vmmov (!%p327_p3), 1  }
   0x8   : > { %4704 = vmatprep.subr.bf16.mxu0 (!%p327_p3), %v5242_v1  ;;  %4513 = vmatpush3.bf16.msra.mxu1 (!%p327_p3), %v5241_v0  ;;  %v5247_v6 = vld [vmem:[%s6434_s3 + $0x58] sm:$0xff] (!%p327_p3)   ;;  %v5249_v8 = vld [vmem:[%s6434_s3 + $0x60] sm:$0xff] (!%p327_p3)   ;;  %v5251_v10 = vld [vmem:[%s6434_s3 + $0x68] sm:$0xff] (!%p327_p3)  }
   0x9   : > { %4705 = vmatpush3.bf16.msra.mxu0 (!%p327_p3), %v5242_v1  ;;  %4514 = vmatprep.subr.bf16.mxu1 (!%p327_p3), %v5243_v2  ;;  %v5248_v7 = vld [vmem:[%s6434_s3 + $0x118] sm:$0xff] (!%p327_p3)   ;;  %v5250_v9 = vld [vmem:[%s6434_s3 + $0x120] sm:$0xff] (!%p327_p3)   ;;  %v5252_v13 = vld [vmem:[%s6434_s3 + $0x128] sm:$0xff] (!%p327_p3)  }
   0xa   : > { %4706 = vmatprep.subr.bf16.mxu0 (!%p327_p3), %v5244_v3  ;;  %v5253_v18 = vld [vmem:[%s6434_s3 + $0x70] sm:$0xff] (!%p327_p3)   ;;  %v5255_v21 = vld [vmem:[%s6434_s3 + $0x78] sm:$0xff] (!%p327_p3)   ;;  %v5258_v23 = vld [vmem:[%s6434_s3] sm:$0xff] (!%p327_p3)  }
   0xb   : > { %v5254_v19 = vld [vmem:[%s6434_s3 + $0x130] sm:$0xff] (!%p327_p3)   ;;  %v5256_v22 = vld [vmem:[%s6434_s3 + $0x138] sm:$0xff] (!%p327_p3)   ;;  %v5260_v25 = vld [vmem:[%s6434_s3 + $0x140] sm:$0xff] (!%p327_p3)  }
   0xc   : > { %4515 = vmatpush3.bf16.msra.mxu1 (!%p327_p3), %v5243_v2  ;;  %v5261_v27 = vld [vmem:[%s6434_s3 + $0x148] sm:$0xff] (!%p327_p3)   ;;  %v5268_v30 = vld [vmem:[%s6434_s3 + $0x10] sm:$0xff] (!%p327_p3)   ;;  %v5266_v35 = vld [vmem:[%s6434_s3 + $0x158] sm:$0xff] (!%p327_p3)  }
   0xd   : > { %4707 = vmatpush3.bf16.msra.mxu0 (!%p327_p3), %v5244_v3  ;;  %4516 = vmatprep.subr.bf16.mxu1 (!%p327_p3), %v5245_v4  ;;  %v5263_v28 = vld [vmem:[%s6434_s3 + $0x8] sm:$0xff] (!%p327_p3)   ;;  %v5265_v31 = vld [vmem:[%s6434_s3 + $0x150] sm:$0xff] (!%p327_p3)   ;;  %v5273_v36 = vld [vmem:[%s6434_s3 + $0x18] sm:$0xff] (!%p327_p3)  }
   0xe   : > { %s6468_s24 = smov (!%p402_p4, %s5367_s24), 1  ;;  %4708 = vmatprep.subr.bf16.mxu0 %v5246_v5  ;;  %v5270_v40 = vld [vmem:[%s6434_s3 + $0x160] sm:$0xff]   ;;  %v5271_v46 = vld [vmem:[%s6434_s3 + $0x168] sm:$0xff]   ;;  %v5275_v54 = vld [vmem:[%s6434_s3 + $0x170] sm:$0xff]  }
   0xf   : > { %s5463_s19 = sshll.u32 %s6468_s24, 7  ;;  %v5278_v43 = vld [vmem:[%s6434_s3 + $0x20] sm:$0xff]   ;;  %v5282_v48 = vld [vmem:[%s6434_s3 + $0x28] sm:$0xff]   ;;  %v5286_v56 = vld [vmem:[%s6434_s3 + $0x30] sm:$0xff]  }
  0x10   : > { %4517 = vmatpush3.bf16.msra.mxu1 %v5245_v4  ;;  %s410_s28 = scalar_lea.vmem %s6431_s0, %s5463_s19  ;;  %s5479_s8 = scalar_lea.vmem %s6432_s1, %s5463_s19  ;;  %vm5608_vm3 = vmpackc.low %vm688_vm1, %vm5377_vm2  ;;  %v5276_v63 = vld [vmem:[%s6434_s3 + $0x178] sm:$0xff]  }
  0x11   : > { %4709 = vmatpush3.bf16.msra.mxu0 %v5246_v5  ;;  %4518 = vmatprep.subr.bf16.mxu1 %v5247_v6  ;;  %v4193_v11 = vld [vmem:[%s410_s28] sm:$0xff]   ;;  %v5513_v24 = vld [vmem:[%s5479_s8 + $0x8] sm:$0xff]   ;;  %v5519_v26 = vld [vmem:[%s5479_s8 + $0x10] sm:$0xff]   ;;  %s4158_s30 = sadd.s32 120, %s5463_s19  ;;  %s6395_s18 = scalar_lea.vmem %s6437_s6, %s5463_s19 }
  0x12   : > { %4710 = vmatprep.subr.bf16.mxu0 %v5248_v7  ;;  %v5485_v12 = vld [vmem:[%s5479_s8] sm:$0xff]   ;;  %v4194_v14 = vunpack.c.l.bf16 %v4193_v11  ;;  %v4195_v15 = vunpack.c.h.bf16 %v4193_v11  ;;  %v5530_v29 = vld [vmem:[%s5479_s8 + $0x18] sm:$0xff]   ;;  %v5557_v38 = vld [vmem:[%s5479_s8 + $0x28] sm:$0xff]   ;;  %v497_v50 = vunpack.c.l.bf16 %v5513_v24  ;;  %v498_v51 = vunpack.c.h.bf16 %v5513_v24  ;;  %s438_s13 = scalar_lea.vmem %s6433_s2, %s4158_s30  ;;  %s3568_s19 = sshll.u32 %s6468_s24, 1 }
  0x13   : > { %4720 = vmatprep.mubr.bf16.mxu0 %v5485_v12  ;;  %v5541_v32 = vld [vmem:[%s5479_s8 + $0x20] sm:$0xff]   ;;  %v495_v37 = vunpack.c.l.bf16 %v5485_v12  ;;  %v496_v39 = vunpack.c.h.bf16 %v5485_v12  ;;  %v5564_v41 = vld [vmem:[%s5479_s8 + $0x30] sm:$0xff]   ;;  %v5586_v49 = vld [vmem:[%s5479_s8 + $0x38] sm:$0xff]   ;;  %v499_v52 = vunpack.c.l.bf16 %v5519_v26  ;;  %v500_v53 = vunpack.c.h.bf16 %v5519_v26  ;;  %s457_s22 = scalar_lea.vmem %s6438_s7, %s3568_s19 }
  0x14   : > { %4519 = vmatpush3.bf16.msra.mxu1 %v5247_v6  ;;  %v5490_v16 = vmul.f32 0.0, %v4194_v14  ;;  %v5492_v17 = vmul.f32 0.0, %v4195_v15  ;;  %v695_v57 = vrot.slane %v497_v50, 1  ;;  %v696_v58 = vrot.slane %v498_v51, 1  ;;  %v5290_v0 = vld [vmem:[%s6434_s3 + $0x38] sm:$0xff]   ;;  %v5628_v3 = vld [vmem:[%s5479_s8 + $0x40] sm:$0xff]   ;;  %vm3616_vm4 = vmneg %vm579_vm0 }
  0x15   : > { %4711 = vmatpush3.bf16.msra.mxu0 %v5248_v7  ;;  %4520 = vmatprep.subr.bf16.mxu1 %v5249_v8  ;;  %v692_v44 = vrot.slane %v495_v37, 1  ;;  %v693_v45 = vrot.slane %v496_v39, 1  ;;  %v698_v61 = vrot.slane %v499_v52, 1  ;;  %v699_v62 = vrot.slane %v500_v53, 1  ;;  %vm5773_vm5 = vmpackc.low %vm5377_vm2, %vm3616_vm4 }
  0x16   : > { %4712 = vmatprep.subr.bf16.mxu0 %v5250_v9  ;;  %v829_v20 = vpack.c.bf16 %v5492_v17, %v5490_v16  ;;  %v580_v33 = vrot.slane %v5490_v16, 7  ;;  %v581_v34 = vrot.slane %v5492_v17, 7  ;;  %v689_v1 = vrot.slane %v5490_v16, 1 }
  0x17   : > { %v694_v55 = vsel %vm688_vm1, %v692_v44, %v693_v45  ;;  %v501_v2 = vunpack.c.l.bf16 %v5530_v29  ;;  %v690_v4 = vrot.slane %v5492_v17, 1  ;;  %v697_v5 = vsel %vm688_vm1, %v695_v57, %v696_v58  ;;  %v5717_v57 = vld [vmem:[%s5479_s8 + $0x60] sm:$0xff]  }
  0x18   : > { %4521 = vmatpush3.bf16.msra.mxu1 %v5249_v8  ;;  %4528 = vmatprep.mubr.bf16.mxu1 %v829_v20  ;;  %v582_v42 = vsel %vm579_vm0, %v580_v33, %v581_v34  ;;  %v5604_v59 = vpack.c.bf16 %v693_v45, %v694_v55  ;;  %v502_v6 = vunpack.c.h.bf16 %v5530_v29  ;;  %v503_v7 = vunpack.c.l.bf16 %v5541_v32  ;;  %v5279_v8 = vld [vmem:[%s6434_s3 + $0x180] sm:$0xff]  }
  0x19   : > { %4713 = vmatpush3.bf16.msra.mxu0 %v5250_v9  ;;  %4522 = vmatprep.subr.bf16.mxu1 %v5251_v10  ;;  %v5577_v47 = vpack.c.bf16 %v582_v42, %v580_v33  ;;  %v5641_v9 = vld [vmem:[%s5479_s8 + $0x48] sm:$0xff]   ;;  %v700_v11 = vsel %vm688_vm1, %v698_v61, %v699_v62  ;;  %v5650_v14 = vpack.c.bf16 %v696_v58, %v697_v5  ;;  %v701_v15 = vrot.slane %v501_v2, 1 }
  0x1a   : > { %4714 = vmatprep.subr.bf16.mxu0 %v5252_v13  ;;  %v702_v16 = vrot.slane %v502_v6, 1  ;;  %v704_v17 = vrot.slane %v503_v7, 1  ;;  %v508_v33 = vunpack.c.h.bf16 %v5564_v41  ;;  %v509_v44 = vunpack.c.l.bf16 %v5586_v49 }
  0x1b   : > { %v511_v55 = vunpack.c.l.bf16 %v5628_v3 }
  0x1c   : > { %4523 = vmatpush3.bf16.msra.mxu1 %v5251_v10  ;;  %v504_v10 = vunpack.c.h.bf16 %v5541_v32  ;;  %v713_v58 = vrot.slane %v509_v44, 1 }
  0x1d   : > { %4715 = vmatpush3.bf16.msra.mxu0 %v5252_v13  ;;  %4524 = vmatprep.subr.bf16.mxu1 %v5253_v18  ;;  %v5648_v13 = vld [vmem:[%s6434_s3 + $0x80] sm:$0xff]  }
  0x1e   : > { %4716 = vmatprep.subr.bf16.mxu0 %v5254_v19  ;;  %v705_v20 = vrot.slane %v504_v10, 1 }
  0x20   : > { %4525 = vmatpush3.bf16.msra.mxu1 %v5253_v18  ;;  %v5658_v18 = vpack.c.bf16 %v699_v62, %v700_v11  ;;  %v706_v34 = vsel %vm688_vm1, %v704_v17, %v705_v20  ;;  %v5726_v62 = vld [vmem:[%s5479_s8 + $0x68] sm:$0xff]   ;;  %v513_v17 = vunpack.c.l.bf16 %v5641_v9 }
  0x21   : > { %4717 = vmatpush3.bf16.msra.mxu0 %v5254_v19  ;;  %4526 = vmatprep.subr.bf16.mxu1 %v5255_v21  ;;  %v691_v19 = vsel %vm688_vm1, %v689_v1, %v690_v4  ;;  %v5701_v45 = vpack.c.bf16 %v705_v20, %v706_v34  ;;  %v5293_v1 = vld [vmem:[%s6434_s3 + $0x1a0] sm:$0xff]   ;;  %v5295_v11 = vld [vmem:[%s6434_s3 + $0x1a8] sm:$0xff]  }
  0x22   : > { %4718 = vmatprep.subr.bf16.mxu0 %v5256_v22 }
  0x24   : > { %4527 = vmatpush3.bf16.msra.mxu1 %v5255_v21  ;;  %v5283_v21 = vld [vmem:[%s6434_s3 + $0x188] sm:$0xff]  }
  0x25   : > { %4719 = vmatpush3.bf16.msra.mxu0 %v5256_v22  ;;  %4560 = vmatprep.subr.bf16.mxu1 %v5258_v23  ;;  %v5666_v22 = vpack.c.bf16 %v690_v4, %v691_v19  ;;  %v716_v4 = vrot.slane %v511_v55, 1  ;;  %v6445_v19 = vunpack.c.h.bf16 %v5641_v9 }
  0x26   : > { %4752 = vmatprep.subr.bf16.mxu0 %v5260_v25 }
  0x27   : > { %4529 = vmatmul.mubr.bf16.vlgmr.msra.gmra.mrb[0].mxu1 %v5485_v12  ;;  %v586_v12 = vrot.slane %v497_v50, 7 }
  0x28   : > { %4721 = vmatmul.mubr.bf16.vlgmr.msra.gmra.mrb[0].mxu0 %v5513_v24  ;;  %4561 = vmatpush3.bf16.msra.mxu1 %v5258_v23  ;;  %v505_v23 = vunpack.c.l.bf16 %v5557_v38 }
  0x29   : > { %4753 = vmatpush3.bf16.msra.mxu0 %v5260_v25  ;;  %4532 = vmatprep.mubr.bf16.mxu1 %v5513_v24  ;;  %v5676_v25 = vld [vmem:[%s5479_s8 + $0x50] sm:$0xff]  }
  0x2a   : > { %4754 = vmatprep.subr.bf16.mxu0 %v5261_v27  ;;  %4724 = vmatprep.mubr.bf16.mxu0 %v5519_v26 }
  0x2b   : > { %4562 = vmatprep.subr.bf16.mxu1 %v5263_v28 }
  0x2c   : > { %4563 = vmatpush3.bf16.msra.mxu1 %v5263_v28  ;;  %v507_v28 = vunpack.c.l.bf16 %v5564_v41 }
  0x2d   : > { %4755 = vmatpush3.bf16.msra.mxu0 %v5261_v27  ;;  %4564 = vmatprep.subr.bf16.mxu1 %v5268_v30  ;;  %v506_v27 = vunpack.c.h.bf16 %v5557_v38 }
  0x2e   : > { %4756 = vmatprep.subr.bf16.mxu0 %v5265_v31 }
  0x2f   : > { %4533 = vmatmul.mubr.bf16.gmra.mrb[4].mxu1 %v5519_v26  ;;  %v708_v42 = vrot.slane %v506_v27, 1 }
  0x30   : > { %4725 = vmatmul.mubr.bf16.gmra.mrb[4].mxu0 %v5530_v29  ;;  %4536 = vmatprep.mubr.bf16.mxu1 %v5530_v29 }
  0x31   : > { %4757 = vmatpush3.bf16.msra.mxu0 %v5265_v31  ;;  %4728 = vmatprep.mubr.bf16.mxu0 %v5541_v32  ;;  %v5685_v31 = vld [vmem:[%s5479_s8 + $0x58] sm:$0xff]  }
  0x32   : > { %4758 = vmatprep.subr.bf16.mxu0 %v5266_v35  ;;  %4565 = vmatpush3.bf16.msra.mxu1 %v5268_v30  ;;  %v703_v30 = vsel %vm688_vm1, %v701_v15, %v702_v16  ;;  %v6444_v50 = vunpack.c.l.bf16 %v5685_v31 }
  0x33   : > { %4566 = vmatprep.subr.bf16.mxu1 %v5273_v36 }
  0x35   : > { %4759 = vmatpush3.bf16.msra.mxu0 %v5266_v35  ;;  %v5287_v35 = vld [vmem:[%s6434_s3 + $0x190] sm:$0xff]  }
  0x36   : > { %4760 = vmatprep.subr.bf16.mxu0 %v5270_v40  ;;  %4567 = vmatpush3.bf16.msra.mxu1 %v5273_v36  ;;  %v707_v36 = vrot.slane %v505_v23, 1 }
  0x37   : > { %4537 = vmatmul.mubr.bf16.gmra.mrb[8].mxu1 %v5541_v32  ;;  %4568 = vmatprep.subr.bf16.mxu1 %v5278_v43 }
  0x38   : > { %4729 = vmatmul.mubr.bf16.gmra.mrb[8].mxu0 %v5557_v38  ;;  %4540 = vmatprep.mubr.bf16.mxu1 %v5557_v38  ;;  %v709_v61 = vsel %vm688_vm1, %v707_v36, %v708_v42  ;;  %v583_v36 = vrot.slane %v495_v37, 7  ;;  %v587_v37 = vrot.slane %v498_v51, 7  ;;  %v6443_v51 = vunpack.c.h.bf16 %v5685_v31 }
  0x39   : > { %4761 = vmatpush3.bf16.msra.mxu0 %v5270_v40  ;;  %4732 = vmatprep.mubr.bf16.mxu0 %v5564_v41  ;;  %v5694_v40 = vpack.c.bf16 %v702_v16, %v703_v30  ;;  %v5751_v16 = vld [vmem:[%s5479_s8 + $0x70] sm:$0xff]   ;;  %v6439_v30 = vunpack.c.h.bf16 %v5676_v25 }
  0x3a   : > { %4762 = vmatprep.subr.bf16.mxu0 %v5271_v46  ;;  %4569 = vmatpush3.bf16.msra.mxu1 %v5278_v43  ;;  %v710_v43 = vrot.slane %v507_v28, 1 }
  0x3b   : > { %4570 = vmatprep.subr.bf16.mxu1 %v5282_v48 }
  0x3d   : > { %4763 = vmatpush3.bf16.msra.mxu0 %v5271_v46  ;;  %v711_v46 = vrot.slane %v508_v33, 1 }
  0x3e   : > { %4764 = vmatprep.subr.bf16.mxu0 %v5275_v54  ;;  %4571 = vmatpush3.bf16.msra.mxu1 %v5282_v48  ;;  %v510_v48 = vunpack.c.h.bf16 %v5586_v49 }
  0x3f   : > { %4541 = vmatmul.mubr.bf16.gmra.mrb[12].mxu1 %v5564_v41  ;;  %4572 = vmatprep.subr.bf16.mxu1 %v5286_v56 }
  0x40   : > { %4733 = vmatmul.mubr.bf16.gmra.mrb[12].mxu0 %v5586_v49  ;;  %4544 = vmatprep.mubr.bf16.mxu1 %v5586_v49 }
  0x41   : > { %4765 = vmatpush3.bf16.msra.mxu0 %v5275_v54  ;;  %4768 = vmatprep.mubr.msk.bf16.mxu0 %vm5608_vm3, %v5604_v59  ;;  %v5291_v54 = vld [vmem:[%s6434_s3 + $0x198] sm:$0xff]  }
  0x42   : > { %4766 = vmatprep.subr.bf16.mxu0 %v5276_v63  ;;  %4573 = vmatpush3.bf16.msra.mxu1 %v5286_v56  ;;  %v512_v56 = vunpack.c.h.bf16 %v5628_v3 }
  0x43   : > { %4574 = vmatprep.subr.bf16.mxu1 %v5290_v0 }
  0x44   : > { %v717_v5 = vrot.slane %v512_v56, 1 }
  0x45   : > { %4767 = vmatpush3.bf16.msra.mxu0 %v5276_v63  ;;  %v714_v63 = vrot.slane %v510_v48, 1 }
  0x46   : > { %4800 = vmatprep.subr.bf16.mxu0 %v5279_v8  ;;  %4575 = vmatpush3.bf16.msra.mxu1 %v5290_v0  ;;  %v712_v0 = vsel %vm688_vm1, %v710_v43, %v711_v46  ;;  %v718_v34 = vsel %vm688_vm1, %v716_v4, %v717_v5 }
  0x47   : > { %4545 = vmatmul.mubr.bf16.gmra.mrb[16].mxu1 %v5628_v3  ;;  %4608 = vmatprep.subr.bf16.mxu1 %v5648_v13  ;;  %v5743_v15 = vpack.c.bf16 %v711_v46, %v712_v0  ;;  %v715_v20 = vsel %vm688_vm1, %v713_v58, %v714_v63  ;;  %v720_v58 = vrot.slane %v6445_v19, 1  ;;  %v5299_v0 = vld [vmem:[%s6434_s3 + $0x1b8] sm:$0xff]  }
  0x48   : > { %4769 = vmatmul.mubr.msk.bf16.vlgmr.msra.gmra.mrb[0].mxu0 %vm5608_vm3, %v5650_v14  ;;  %4548 = vmatprep.mubr.bf16.mxu1 %v5641_v9  ;;  %v5770_v43 = vpack.c.bf16 %v714_v63, %v715_v20  ;;  %v723_v63 = vrot.slane %v6439_v30, 1  ;;  %v588_v20 = vsel %vm579_vm0, %v586_v12, %v587_v37  ;;  %v592_v30 = vrot.slane %v501_v2, 7 }
  0x49   : > { %4801 = vmatpush3.bf16.msra.mxu0 %v5279_v8  ;;  %4772 = vmatprep.mubr.msk.bf16.mxu0 %vm5608_vm3, %v5658_v18  ;;  %v5738_v8 = vpack.c.bf16 %v708_v42, %v709_v61  ;;  %v584_v42 = vrot.slane %v496_v39, 7  ;;  %v5781_v61 = vpack.c.bf16 %v717_v5, %v718_v34  ;;  %v6442_v5 = vunpack.c.l.bf16 %v5717_v57 }
  0x4a   : > { %4802 = vmatprep.subr.bf16.mxu0 %v5283_v21  ;;  %v593_v37 = vrot.slane %v502_v6, 7  ;;  %v5294_v6 = vld [vmem:[%s6434_s3 + $0x88] sm:$0xff]  }
  0x4d   : > { %4803 = vmatpush3.bf16.msra.mxu0 %v5283_v21  ;;  %v6440_v21 = vunpack.c.l.bf16 %v5676_v25 }
  0x4e   : > { %4804 = vmatprep.subr.bf16.mxu0 %v5287_v35 }
  0x4f   : > { %4549 = vmatmul.mubr.bf16.gmra.mrb[20].mxu1 %v5676_v25  ;;  %v722_v39 = vrot.slane %v6440_v21, 1  ;;  %v725_v21 = vrot.slane %v6444_v50, 1 }
  0x50   : > { %4773 = vmatmul.mubr.msk.bf16.gmra.mrb[4].mxu0 %vm5608_vm3, %v5694_v40  ;;  %4552 = vmatprep.mubr.bf16.mxu1 %v5685_v31 }
  0x51   : > { %4776 = vmatprep.mubr.msk.bf16.mxu0 %vm5608_vm3, %v5701_v45  ;;  %4805 = vmatpush3.bf16.msra.mxu0 %v5287_v35  ;;  %v5297_v35 = vld [vmem:[%s6434_s3 + $0x1b0] sm:$0xff]   ;;  %v724_v34 = vsel %vm688_vm1, %v722_v39, %v723_v63 }
  0x52   : > { %4806 = vmatprep.subr.bf16.mxu0 %v5291_v54 }
  0x55   : > { %4807 = vmatpush3.bf16.msra.mxu0 %v5291_v54  ;;  %v719_v54 = vrot.slane %v513_v17, 1 }
  0x56   : > { %4808 = vmatprep.subr.bf16.mxu0 %v5293_v1 }
  0x57   : > { %4553 = vmatmul.mubr.bf16.gmra.mrb[24].mxu1 %v5717_v57  ;;  %v721_v4 = vsel %vm688_vm1, %v719_v54, %v720_v58  ;;  %v589_v54 = vrot.slane %v499_v52, 7  ;;  %v5835_v52 = vpack.c.bf16 %v723_v63, %v724_v34  ;;  %v6448_v63 = vunpack.c.h.bf16 %v5726_v62 }
  0x58   : > { %4777 = vmatmul.mubr.msk.bf16.gmra.mrb[8].mxu0 %vm5608_vm3, %v5738_v8  ;;  %4556 = vmatprep.mubr.bf16.mxu1 %v5726_v62  ;;  %v5827_v39 = vpack.c.bf16 %v720_v58, %v721_v4  ;;  %v594_v4 = vsel %vm579_vm0, %v592_v30, %v593_v37  ;;  %v6446_v34 = vunpack.c.h.bf16 %v5751_v16  ;;  %v598_v37 = vrot.slane %v505_v23, 7 }
  0x59   : > { %4780 = vmatprep.mubr.msk.bf16.mxu0 %vm5608_vm3, %v5743_v15  ;;  %4809 = vmatpush3.bf16.msra.mxu0 %v5293_v1  ;;  %v585_v1 = vsel %vm579_vm0, %v583_v36, %v584_v42  ;;  %v5879_v50 = vpack.c.bf16 %v594_v4, %v592_v30  ;;  %v5298_v30 = vld [vmem:[%s6434_s3 + $0x98] sm:$0xff]  }
  0x5a   : > { %4810 = vmatprep.subr.bf16.mxu0 %v5295_v11  ;;  %v5817_v42 = vpack.c.bf16 %v585_v1, %v583_v36  ;;  %v726_v36 = vrot.slane %v6443_v51, 1  ;;  %v5833_v1 = vpack.c.bf16 %v588_v20, %v586_v12  ;;  %v521_v12 = vunpack.c.l.bf16 %v5726_v62 }
  0x5b   : > { %v6447_v20 = vunpack.c.l.bf16 %v5751_v16  ;;  %v735_v23 = vrot.slane %v6446_v34, 1 }
  0x5c   : > { %v731_v19 = vrot.slane %v521_v12, 1 }
  0x5d   : > { %4811 = vmatpush3.bf16.msra.mxu0 %v5295_v11  ;;  %v6441_v11 = vunpack.c.h.bf16 %v5717_v57 }
  0x5e   : > { %4812 = vmatprep.subr.bf16.mxu0 %v5297_v35 }
  0x5f   : > { %4557 = vmatmul.mubr.bf16.gmra.mrb[28].mxu1 %v5751_v16  ;;  %v729_v2 = vrot.slane %v6441_v11, 1  ;;  %v595_v11 = vrot.slane %v503_v7, 7  ;;  %v732_v7 = vrot.slane %v6448_v63, 1 }
  0x60   : > { %4781 = vmatmul.mubr.msk.bf16.gmra.mrb[12].mxu0 %vm5608_vm3, %v5770_v43  ;;  %4576 = vmatprep.mubr.msk.bf16.mxu1 %vm5773_vm5, %v5577_v47  ;;  %v5815_v47 = vld [vmem:[%s6434_s3 + $0x1c0] sm:$0xff]  }
  0x61   : > { %4784 = vmatprep.mubr.msk.bf16.mxu0 %vm5608_vm3, %v5781_v61  ;;  %4813 = vmatpush3.bf16.msra.mxu0 %v5297_v35  ;;  %v590_v35 = vrot.slane %v500_v53, 7  ;;  %v728_v53 = vrot.slane %v6442_v5, 1 }
  0x62   : > { %4814 = vmatprep.subr.bf16.mxu0 %v5299_v0 }
  0x63   : > { %v591_v58 = vsel %vm579_vm0, %v589_v54, %v590_v35  ;;  %v730_v35 = vsel %vm688_vm1, %v728_v53, %v729_v2  ;;  %v599_v53 = vrot.slane %v506_v27, 7  ;;  %v5897_v27 = vld [vmem:[%s5479_s8 + $0x78] sm:$0xff]  }
  0x64   : > { %v5871_v5 = vpack.c.bf16 %v591_v58, %v589_v54  ;;  %v5887_v54 = vpack.c.bf16 %v729_v2, %v730_v35  ;;  %v733_v2 = vsel %vm688_vm1, %v731_v19, %v732_v7  ;;  %v525_v58 = vunpack.c.l.bf16 %v5897_v27  ;;  %v5300_v35 = vld [vmem:[%s6434_s3 + $0xa0] sm:$0xff]  }
  0x65   : > { %4815 = vmatpush3.bf16.msra.mxu0 %v5299_v0  ;;  %v727_v0 = vsel %vm688_vm1, %v725_v21, %v726_v36  ;;  %v596_v21 = vrot.slane %v504_v10, 7  ;;  %v734_v10 = vrot.slane %v6447_v20, 1  ;;  %v602_v19 = vrot.slane %v508_v33, 7  ;;  %v5302_v33 = vld [vmem:[%s6434_s3 + $0xa8] sm:$0xff]  }
  0x66   : > { %4848 = vmatprep.subr.bf16.mxu0 %v5815_v47  ;;  %v5877_v51 = vpack.c.bf16 %v726_v36, %v727_v0  ;;  %v526_v0 = vunpack.c.h.bf16 %v5897_v27 }
  0x67   : > { %4577 = vmatmul.mubr.msk.bf16.vlgmr.msra.gmra.mrb[0].mxu1 %vm5773_vm5, %v5817_v42  ;;  %v597_v36 = vsel %vm579_vm0, %v595_v11, %v596_v21  ;;  %v736_v4 = vsel %vm688_vm1, %v734_v10, %v735_v23  ;;  %v601_v21 = vrot.slane %v507_v28, 7  ;;  %v605_v10 = vrot.slane %v510_v48, 7 }
  0x68   : > { %4785 = vmatmul.mubr.msk.bf16.gmra.mrb[16].mxu0 %vm5608_vm3, %v5827_v39  ;;  %4609 = vmatpush3.bf16.msra.mxu1 %v5648_v13  ;;  %v5296_v13 = vld [vmem:[%s6434_s3 + $0x90] sm:$0xff]   ;;  %v5922_v34 = vpack.c.bf16 %v597_v36, %v595_v11  ;;  %v5934_v63 = vpack.c.bf16 %v735_v23, %v736_v4  ;;  %v737_v28 = vrot.slane %v525_v58, 1  ;;  %v738_v11 = vrot.slane %v526_v0, 1 }
  0x69   : > { %4580 = vmatprep.mubr.msk.bf16.mxu1 %vm5773_vm5, %v5833_v1  ;;  %4788 = vmatprep.mubr.msk.bf16.mxu0 %vm5608_vm3, %v5835_v52  ;;  %v608_v36 = vrot.slane %v512_v56, 7  ;;  %v610_v4 = vrot.slane %v513_v17, 7  ;;  %v5995_v17 = vld [vmem:[%s6434_s3 + $0xc0] sm:$0xff]  }
  0x6a   : > { %4610 = vmatprep.subr.bf16.mxu1 %v5294_v6  ;;  %v739_v48 = vsel %vm688_vm1, %v737_v28, %v738_v11 }
  0x6c   : > { %4611 = vmatpush3.bf16.msra.mxu1 %v5294_v6  ;;  %v600_v6 = vsel %vm579_vm0, %v598_v37, %v599_v53  ;;  %v5928_v53 = vpack.c.bf16 %v732_v7, %v733_v2  ;;  %v5304_v7 = vld [vmem:[%s6434_s3 + $0xb0] sm:$0xff]   ;;  %v5967_v2 = vpack.c.bf16 %v738_v11, %v739_v48  ;;  %v6455_v11 = vunpack.c.h.bf16 %v5676_v25 }
  0x6d   : > { %4612 = vmatprep.subr.bf16.mxu1 %v5296_v13  ;;  %v5930_v20 = vpack.c.bf16 %v600_v6, %v598_v37  ;;  %v6456_v48 = vunpack.c.l.bf16 %v5685_v31 }
  0x6f   : > { %4581 = vmatmul.mubr.msk.bf16.gmra.mrb[4].mxu1 %vm5773_vm5, %v5871_v5 }
  0x70   : > { %4789 = vmatmul.mubr.msk.bf16.gmra.mrb[20].mxu0 %vm5608_vm3, %v5877_v51  ;;  %4584 = vmatprep.mubr.msk.bf16.mxu1 %vm5773_vm5, %v5879_v50 }
  0x71   : > { %4792 = vmatprep.mubr.msk.bf16.mxu0 %vm5608_vm3, %v5887_v54  ;;  %4613 = vmatpush3.bf16.msra.mxu1 %v5296_v13  ;;  %v604_v13 = vrot.slane %v509_v44, 7  ;;  %v603_v44 = vsel %vm579_vm0, %v601_v21, %v602_v19 }
  0x72   : > { %4614 = vmatprep.subr.bf16.mxu1 %v5298_v30  ;;  %v5961_v23 = vpack.c.bf16 %v603_v44, %v601_v21  ;;  %v5306_v21 = vld [vmem:[%s6434_s3 + $0xb8] sm:$0xff]  }
  0x73   : > { %v606_v37 = vsel %vm579_vm0, %v604_v13, %v605_v10  ;;  %v6454_v10 = vunpack.c.l.bf16 %v5676_v25 }
  0x74   : > { %v5969_v6 = vpack.c.bf16 %v606_v37, %v604_v13  ;;  %v616_v37 = vrot.slane %v6456_v48, 7  ;;  %v6460_v48 = vunpack.c.h.bf16 %v5726_v62 }
  0x75   : > { %4615 = vmatpush3.bf16.msra.mxu1 %v5298_v30  ;;  %v607_v30 = vrot.slane %v511_v55, 7  ;;  %v613_v28 = vrot.slane %v6454_v10, 7  ;;  %v6459_v10 = vunpack.c.h.bf16 %v5717_v57 }
  0x76   : > { %4616 = vmatprep.subr.bf16.mxu1 %v5300_v35 }
  0x77   : > { %4585 = vmatmul.mubr.msk.bf16.gmra.mrb[8].mxu1 %vm5773_vm5, %v5922_v34  ;;  %v609_v55 = vsel %vm579_vm0, %v607_v30, %v608_v36 }
  0x78   : > { %4793 = vmatmul.mubr.msk.bf16.gmra.mrb[24].mxu0 %vm5608_vm3, %v5928_v53  ;;  %4588 = vmatprep.mubr.msk.bf16.mxu1 %vm5773_vm5, %v5930_v20  ;;  %v5997_v13 = vpack.c.bf16 %v609_v55, %v607_v30  ;;  %v5303_v30 = vld [vmem:[%s6434_s3 + $0x1c8] sm:$0xff]   ;;  %v6458_v55 = vunpack.c.l.bf16 %v5717_v57 }
  0x79   : > { %4796 = vmatprep.mubr.msk.bf16.mxu0 %vm5608_vm3, %v5934_v63  ;;  %4617 = vmatpush3.bf16.msra.mxu1 %v5300_v35  ;;  %v6453_v35 = vunpack.c.h.bf16 %v5641_v9 }
  0x7a   : > { %4618 = vmatprep.subr.bf16.mxu1 %v5302_v33 }
  0x7b   : > { %v611_v19 = vrot.slane %v6453_v35, 7 }
  0x7d   : > { %4619 = vmatpush3.bf16.msra.mxu1 %v5302_v33  ;;  %v612_v56 = vsel %vm579_vm0, %v610_v4, %v611_v19  ;;  %v614_v33 = vrot.slane %v6455_v11, 7  ;;  %v5305_v19 = vld [vmem:[%s6434_s3 + $0x1d0] sm:$0xff]   ;;  %v620_v11 = vrot.slane %v6459_v10, 7 }
  0x7e   : > { %4620 = vmatprep.subr.bf16.mxu1 %v5304_v7  ;;  %v6003_v44 = vpack.c.bf16 %v612_v56, %v610_v4  ;;  %v619_v56 = vrot.slane %v6458_v55, 7  ;;  %v6462_v55 = vunpack.c.h.bf16 %v5751_v16 }
  0x7f   : > { %4589 = vmatmul.mubr.msk.bf16.gmra.mrb[12].mxu1 %vm5773_vm5, %v5961_v23  ;;  %v615_v4 = vsel %vm579_vm0, %v613_v28, %v614_v33  ;;  %v622_v33 = vrot.slane %v521_v12, 7 }
  0x80   : > { %4797 = vmatmul.mubr.msk.bf16.gmra.mrb[28].mxu0 %vm5608_vm3, %v5967_v2  ;;  %4592 = vmatprep.mubr.msk.bf16.mxu1 %vm5773_vm5, %v5969_v6  ;;  %v621_v12 = vsel %vm579_vm0, %v619_v56, %v620_v11  ;;  %v626_v10 = vrot.slane %v6462_v55, 7 }
  0x81   : > { %4816 = vmatprep.mubr.msk.bf16.mxu0 %vm5773_vm5, %v5833_v1  ;;  %4621 = vmatpush3.bf16.msra.mxu1 %v5304_v7  ;;  %v6457_v7 = vunpack.c.h.bf16 %v5685_v31 }
  0x82   : > { %4622 = vmatprep.subr.bf16.mxu1 %v5306_v21 }
  0x83   : > { %v617_v36 = vrot.slane %v6457_v7, 7  ;;  %v623_v7 = vrot.slane %v6460_v48, 7 }
  0x85   : > { %4623 = vmatpush3.bf16.msra.mxu1 %v5306_v21  ;;  %v618_v35 = vsel %vm579_vm0, %v616_v37, %v617_v36  ;;  %v6031_v21 = vpack.c.bf16 %v615_v4, %v613_v28  ;;  %v5307_v28 = vld [vmem:[%s6434_s3 + $0x1d8] sm:$0xff]   ;;  %v5309_v36 = vld [vmem:[%s6434_s3 + $0x1e0] sm:$0xff]   ;;  %v6461_v4 = vunpack.c.l.bf16 %v5751_v16 }
  0x86   : > { %4656 = vmatprep.subr.bf16.mxu1 %v5995_v17 }
  0x87   : > { %4593 = vmatmul.mubr.msk.bf16.gmra.mrb[16].mxu1 %vm5773_vm5, %v5997_v13 }
  0x88   : > { %4817 = vmatmul.mubr.msk.bf16.vlgmr.msra.gmra.mrb[0].mxu0 %vm5773_vm5, %v5871_v5  ;;  %4596 = vmatprep.mubr.msk.bf16.mxu1 %vm5773_vm5, %v6003_v44 }
  0x89   : > { %4849 = vmatpush3.bf16.msra.mxu0 %v5815_v47  ;;  %4820 = vmatprep.mubr.msk.bf16.mxu0 %vm5773_vm5, %v5879_v50  ;;  %v6037_v47 = vpack.c.bf16 %v618_v35, %v616_v37  ;;  %v624_v37 = vsel %vm579_vm0, %v622_v33, %v623_v7  ;;  %v625_v35 = vrot.slane %v6461_v4, 7  ;;  %v5315_v7 = vld [vmem:[%s6434_s3 + $0x1f8] sm:$0xff]   ;;  %v629_v4 = vrot.slane %v526_v0, 7 }
  0x8a   : > { %4850 = vmatprep.subr.bf16.mxu0 %v5303_v30  ;;  %v6069_v11 = vpack.c.bf16 %v624_v37, %v622_v33  ;;  %v5313_v33 = vld [vmem:[%s6434_s3 + $0x1f0] sm:$0xff]   ;;  %v4197_v37 = vld [vmem:[%s438_s13] sm:$0xff]  }
  0x8d   : > { %4851 = vmatpush3.bf16.msra.mxu0 %v5303_v30  ;;  %v6063_v30 = vpack.c.bf16 %v621_v12, %v619_v56  ;;  %v627_v56 = vsel %vm579_vm0, %v625_v35, %v626_v10  ;;  %v5310_v12 = vld [vmem:[%s6434_s3 + $0xc8] sm:$0xff]   ;;  %v5316_v10 = vld [vmem:[%s6434_s3 + $0xe0] sm:$0xff]  }
  0x8e   : > { %4852 = vmatprep.subr.bf16.mxu0 %v5305_v19  ;;  %v6090_v48 = vpack.c.bf16 %v627_v56, %v625_v35  ;;  %v5314_v35 = vld [vmem:[%s6434_s3 + $0xd8] sm:$0xff]  }
  0x8f   : > { %4597 = vmatmul.mubr.msk.bf16.gmra.mrb[20].mxu1 %vm5773_vm5, %v6031_v21 }
  0x90   : > { %4821 = vmatmul.mubr.msk.bf16.gmra.mrb[4].mxu0 %vm5773_vm5, %v5922_v34  ;;  %4600 = vmatprep.mubr.msk.bf16.mxu1 %vm5773_vm5, %v6037_v47 }
  0x91   : > { %4824 = vmatprep.mubr.msk.bf16.mxu0 %vm5773_vm5, %v5930_v20  ;;  %4853 = vmatpush3.bf16.msra.mxu0 %v5305_v19  ;;  %v5311_v19 = vld [vmem:[%s6434_s3 + $0x1e8] sm:$0xff]  }
  0x92   : > { %4854 = vmatprep.subr.bf16.mxu0 %v5307_v28 }
  0x95   : > { %4855 = vmatpush3.bf16.msra.mxu0 %v5307_v28  ;;  %v5317_v28 = vld [vmem:[%s6434_s3 + $0x200] sm:$0xff]  }
  0x96   : > { %4856 = vmatprep.subr.bf16.mxu0 %v5309_v36 }
  0x97   : > { %4601 = vmatmul.mubr.msk.bf16.gmra.mrb[24].mxu1 %vm5773_vm5, %v6063_v30 }
  0x98   : > { %4825 = vmatmul.mubr.msk.bf16.gmra.mrb[8].mxu0 %vm5773_vm5, %v5961_v23  ;;  %4604 = vmatprep.mubr.msk.bf16.mxu1 %vm5773_vm5, %v6069_v11 }
  0x99   : > { %4828 = vmatprep.mubr.msk.bf16.mxu0 %vm5773_vm5, %v5969_v6  ;;  %4857 = vmatpush3.bf16.msra.mxu0 %v5309_v36  ;;  %v4198_v36 = vunpack.c.l.bf16 %v4197_v37 }
  0x9a   : > { %4858 = vmatprep.subr.bf16.mxu0 %v5311_v19 }
  0x9b   : > { %v6154_v0 = vmul.f32 0.0, %v4198_v36  ;;  %v5319_v36 = vld [vmem:[%s6434_s3 + $0x208] sm:$0xff]  }
  0x9d   : > { %4859 = vmatpush3.bf16.msra.mxu0 %v5311_v19  ;;  %v631_v56 = vrot.slane %v6154_v0, 7 }
  0x9e   : > { %4860 = vmatprep.subr.bf16.mxu0 %v5313_v33 }
  0x9f   : > { %4605 = vmatmul.mubr.msk.bf16.gmra.mrb[28].mxu1 %vm5773_vm5, %v6090_v48 }
  0xa0   : > { %4829 = vmatmul.mubr.msk.bf16.gmra.mrb[12].mxu0 %vm5773_vm5, %v5997_v13  ;;  %4624 = vmatprep.mubr.msk.bf16.mxu1 %vm5608_vm3, %v5666_v22  ;;  %v5312_v22 = vld [vmem:[%s6434_s3 + $0xd0] sm:$0xff]  }
  0xa1   : > { %4832 = vmatprep.mubr.msk.bf16.mxu0 %vm5773_vm5, %v6003_v44  ;;  %4861 = vmatpush3.bf16.msra.mxu0 %v5313_v33 }
  0xa2   : > { %4862 = vmatprep.subr.bf16.mxu0 %v5315_v7 }
  0xa5   : > { %4863 = vmatpush3.bf16.msra.mxu0 %v5315_v7  ;;  %v5318_v7 = vld [vmem:[%s6434_s3 + $0xe8] sm:$0xff]  }
  0xa6   : > { %4896 = vmatprep.subr.bf16.mxu0 %v5317_v28 }
  0xa7   : > { %4625 = vmatmul.mubr.msk.bf16.vlgmr.msra.gmra.mrb[0].mxu1 %vm5608_vm3, %v5604_v59  ;;  %v4199_v59 = vunpack.c.h.bf16 %v4197_v37 }
  0xa8   : > { %4833 = vmatmul.mubr.msk.bf16.gmra.mrb[16].mxu0 %vm5773_vm5, %v6031_v21  ;;  %4657 = vmatpush3.bf16.msra.mxu1 %v5995_v17  ;;  %v628_v17 = vrot.slane %v525_v58, 7 }
  0xa9   : > { %4628 = vmatprep.mubr.msk.bf16.mxu1 %vm5608_vm3, %v5650_v14  ;;  %4836 = vmatprep.mubr.msk.bf16.mxu0 %vm5773_vm5, %v6037_v47  ;;  %v6149_v58 = vmul.f32 0.0, %v4199_v59  ;;  %v5322_v59 = vld [vmem:[%s6434_s3 + $0xf8] sm:$0xff]  }
  0xaa   : > { %4658 = vmatprep.subr.bf16.mxu1 %v5310_v12  ;;  %v630_v55 = vsel %vm579_vm0, %v628_v17, %v629_v4  ;;  %v5323_v4 = vld [vmem:[%s6434_s3 + $0x218] sm:$0xff]  }
  0xab   : > { %v6160_v19 = vpack.c.bf16 %v630_v55, %v628_v17  ;;  %v632_v33 = vrot.slane %v6149_v58, 7  ;;  %v5345_v17 = vld [vmem:[%s6434_s3 + $0x100] sm:$0xff]  }
  0xac   : > { %4659 = vmatpush3.bf16.msra.mxu1 %v5310_v12 }
  0xad   : > { %4660 = vmatprep.subr.bf16.mxu1 %v5312_v22  ;;  %v633_v12 = vsel %vm579_vm0, %v631_v56, %v632_v33 }
  0xae   : > { %v4023_v37 = vpack.c.bf16 %v633_v12, %v631_v56 }
  0xaf   : > { %4629 = vmatmul.mubr.msk.bf16.gmra.mrb[4].mxu1 %vm5608_vm3, %v5658_v18 }
  0xb0   : > { %4837 = vmatmul.mubr.msk.bf16.gmra.mrb[20].mxu0 %vm5773_vm5, %v6063_v30  ;;  %4632 = vmatprep.mubr.msk.bf16.mxu1 %vm5608_vm3, %v5694_v40 }
  0xb1   : > { %4840 = vmatprep.mubr.msk.bf16.mxu0 %vm5773_vm5, %v6069_v11  ;;  %4661 = vmatpush3.bf16.msra.mxu1 %v5312_v22  ;;  %v5320_v22 = vld [vmem:[%s6434_s3 + $0xf0] sm:$0xff]  }
  0xb2   : > { %4662 = vmatprep.subr.bf16.mxu1 %v5314_v35 }
  0xb5   : > { %4663 = vmatpush3.bf16.msra.mxu1 %v5314_v35 }
  0xb6   : > { %4664 = vmatprep.subr.bf16.mxu1 %v5316_v10 }
  0xb7   : > { %4633 = vmatmul.mubr.msk.bf16.gmra.mrb[8].mxu1 %vm5608_vm3, %v5701_v45 }
  0xb8   : > { %4841 = vmatmul.mubr.msk.bf16.gmra.mrb[24].mxu0 %vm5773_vm5, %v6090_v48  ;;  %4636 = vmatprep.mubr.msk.bf16.mxu1 %vm5608_vm3, %v5738_v8 }
  0xb9   : > { %4844 = vmatprep.mubr.msk.bf16.mxu0 %vm5773_vm5, %v6160_v19  ;;  %4665 = vmatpush3.bf16.msra.mxu1 %v5316_v10 }
  0xba   : > { %4666 = vmatprep.subr.bf16.mxu1 %v5318_v7 }
  0xbd   : > { %4667 = vmatpush3.bf16.msra.mxu1 %v5318_v7 }
  0xbe   : > { %4668 = vmatprep.subr.bf16.mxu1 %v5320_v22 }
  0xbf   : > { %4637 = vmatmul.mubr.msk.bf16.gmra.mrb[12].mxu1 %vm5608_vm3, %v5743_v15 }
  0xc0   : > { %4845 = vmatmul.mubr.msk.bf16.gmra.mrb[28].mxu0 %vm5773_vm5, %v4023_v37  ;;  %4640 = vmatprep.mubr.msk.bf16.mxu1 %vm5608_vm3, %v5770_v43 }
  0xc1   : > { %4864 = vmatprep.mubr.bf16.mxu0 %v5513_v24  ;;  %4669 = vmatpush3.bf16.msra.mxu1 %v5320_v22  ;;  %v5321_v24 = vld [vmem:[%s6434_s3 + $0x210] sm:$0xff]  }
  0xc2   : > { %4670 = vmatprep.subr.bf16.mxu1 %v5322_v59 }
  0xc5   : > { %4671 = vmatpush3.bf16.msra.mxu1 %v5322_v59 }
  0xc6   : > { %4944 = vmatprep.subr.bf16.mxu1 %v5345_v17 }
  0xc7   : > { %4641 = vmatmul.mubr.msk.bf16.gmra.mrb[16].mxu1 %vm5608_vm3, %v5781_v61 }
  0xc8   : > { %4865 = vmatmul.mubr.bf16.vlgmr.msra.gmra.mrb[0].mxu0 %v5519_v26  ;;  %4644 = vmatprep.mubr.msk.bf16.mxu1 %vm5608_vm3, %v5827_v39  ;;  %v5324_v26 = vld [vmem:[%s6434_s3 + $0x220] sm:$0xff]  }
  0xc9   : > { %4897 = vmatpush3.bf16.msra.mxu0 %v5317_v28  ;;  %4868 = vmatprep.mubr.bf16.mxu0 %v5530_v29  ;;  %v5325_v29 = vld [vmem:[%s6434_s3 + $0x228] sm:$0xff]  }
  0xca   : > { %4898 = vmatprep.subr.bf16.mxu0 %v5319_v36 }
  0xcd   : > { %4899 = vmatpush3.bf16.msra.mxu0 %v5319_v36 }
  0xce   : > { %4900 = vmatprep.subr.bf16.mxu0 %v5321_v24 }
  0xcf   : > { %4645 = vmatmul.mubr.msk.bf16.gmra.mrb[20].mxu1 %vm5608_vm3, %v5835_v52 }
  0xd0   : > { %4869 = vmatmul.mubr.bf16.gmra.mrb[4].mxu0 %v5541_v32  ;;  %4648 = vmatprep.mubr.msk.bf16.mxu1 %vm5608_vm3, %v5877_v51  ;;  %v5326_v32 = vld [vmem:[%s6434_s3 + $0x230] sm:$0xff]  }
  0xd1   : > { %4872 = vmatprep.mubr.bf16.mxu0 %v5557_v38  ;;  %4901 = vmatpush3.bf16.msra.mxu0 %v5321_v24  ;;  %v5328_v38 = vld [vmem:[%s6434_s3 + $0x238] sm:$0xff]  }
  0xd2   : > { %4902 = vmatprep.subr.bf16.mxu0 %v5323_v4 }
  0xd5   : > { %4903 = vmatpush3.bf16.msra.mxu0 %v5323_v4 }
  0xd6   : > { %4904 = vmatprep.subr.bf16.mxu0 %v5324_v26 }
  0xd7   : > { %4649 = vmatmul.mubr.msk.bf16.gmra.mrb[24].mxu1 %vm5608_vm3, %v5887_v54 }
  0xd8   : > { %4873 = vmatmul.mubr.bf16.gmra.mrb[8].mxu0 %v5564_v41  ;;  %4652 = vmatprep.mubr.msk.bf16.mxu1 %vm5608_vm3, %v5928_v53  ;;  %v5346_v41 = vld [vmem:[%s6434_s3 + $0x108] sm:$0xff]  }
  0xd9   : > { %4876 = vmatprep.mubr.bf16.mxu0 %v5586_v49  ;;  %4905 = vmatpush3.bf16.msra.mxu0 %v5324_v26  ;;  %v5347_v49 = vld [vmem:[%s6434_s3 + $0x110] sm:$0xff]  }
  0xda   : > { %4906 = vmatprep.subr.bf16.mxu0 %v5325_v29 }
  0xdd   : > { %4907 = vmatpush3.bf16.msra.mxu0 %v5325_v29 }
  0xde   : > { %4908 = vmatprep.subr.bf16.mxu0 %v5326_v32 }
  0xdf   : > { %4653 = vmatmul.mubr.msk.bf16.gmra.mrb[28].mxu1 %vm5608_vm3, %v5934_v63 }
  0xe0   : > { %4877 = vmatmul.mubr.bf16.gmra.mrb[12].mxu0 %v5628_v3  ;;  %4672 = vmatprep.mubr.msk.bf16.mxu1 %vm5773_vm5, %v5817_v42  ;;  %v5349_v42 = vld [vmem:[%s6434_s3 + $0x120] sm:$0xff]  }
  0xe1   : > { %4880 = vmatprep.mubr.bf16.mxu0 %v5641_v9  ;;  %4909 = vmatpush3.bf16.msra.mxu0 %v5326_v32 }
  0xe2   : > { %4910 = vmatprep.subr.bf16.mxu0 %v5328_v38 }
  0xe5   : > { %4911 = vmatpush3.bf16.msra.mxu0 %v5328_v38 }
  0xe7   : > { %4673 = vmatmul.mubr.msk.bf16.vlgmr.msra.gmra.mrb[0].mxu1 %vm5773_vm5, %v5833_v1  ;;  %v2590_v1 = vpack.c.bf16 %v6149_v58, %v6154_v0 }
  0xe8   : > { %4881 = vmatmul.mubr.bf16.gmra.mrb[16].mxu0 %v5676_v25  ;;  %4952 = vmatpush3.bf16.msra.mxu1 %v5345_v17 }
  0xe9   : > { %4676 = vmatprep.mubr.msk.bf16.mxu1 %vm5773_vm5, %v5871_v5  ;;  %4884 = vmatprep.mubr.bf16.mxu0 %v5685_v31  ;;  %v5348_v5 = vld [vmem:[%s6434_s3 + $0x118] sm:$0xff]  }
  0xea   : > { %4945 = vmatprep.subr.bf16.mxu1 %v5346_v41 }
  0xec   : > { %4953 = vmatpush3.bf16.msra.mxu1 %v5346_v41 }
  0xed   : > { %4946 = vmatprep.subr.bf16.mxu1 %v5347_v49 }
  0xef   : > { %4677 = vmatmul.mubr.msk.bf16.gmra.mrb[4].mxu1 %vm5773_vm5, %v5879_v50  ;;  %v5350_v50 = vld [vmem:[%s6434_s3 + $0x128] sm:$0xff]  }
  0xf0   : > { %4885 = vmatmul.mubr.bf16.gmra.mrb[20].mxu0 %v5717_v57  ;;  %4680 = vmatprep.mubr.msk.bf16.mxu1 %vm5773_vm5, %v5922_v34  ;;  %v5352_v34 = vld [vmem:[%s6434_s3 + $0x138] sm:$0xff]  }
  0xf1   : > { %4888 = vmatprep.mubr.bf16.mxu0 %v5726_v62  ;;  %4954 = vmatpush3.bf16.msra.mxu1 %v5347_v49 }
  0xf2   : > { %4947 = vmatprep.subr.bf16.mxu1 %v5348_v5 }
  0xf5   : > { %4955 = vmatpush3.bf16.msra.mxu1 %v5348_v5 }
  0xf6   : > { %4948 = vmatprep.subr.bf16.mxu1 %v5349_v42 }
  0xf7   : > { %4681 = vmatmul.mubr.msk.bf16.gmra.mrb[8].mxu1 %vm5773_vm5, %v5930_v20  ;;  %v5351_v20 = vld [vmem:[%s6434_s3 + $0x130] sm:$0xff]  }
  0xf8   : > { %4889 = vmatmul.mubr.bf16.gmra.mrb[24].mxu0 %v5751_v16  ;;  %4684 = vmatprep.mubr.msk.bf16.mxu1 %vm5773_vm5, %v5961_v23 }
  0xf9   : > { %4892 = vmatprep.mubr.bf16.mxu0 %v5897_v27  ;;  %4956 = vmatpush3.bf16.msra.mxu1 %v5349_v42 }
  0xfa   : > { %4949 = vmatprep.subr.bf16.mxu1 %v5350_v50 }
  0xfd   : > { %4957 = vmatpush3.bf16.msra.mxu1 %v5350_v50 }
  0xfe   : > { %4950 = vmatprep.subr.bf16.mxu1 %v5351_v20 }
  0xff   : > { %4685 = vmatmul.mubr.msk.bf16.gmra.mrb[12].mxu1 %vm5773_vm5, %v5969_v6 }
 0x100   : > { %4893 = vmatmul.mubr.bf16.gmra.mrb[28].mxu0 %v2590_v1  ;;  %4688 = vmatprep.mubr.msk.bf16.mxu1 %vm5773_vm5, %v5997_v13 }
 0x101   : > { %4912 = vmatprep.mubr.msk.bf16.mxu0 %vm5608_vm3, %v5650_v14  ;;  %4958 = vmatpush3.bf16.msra.mxu1 %v5351_v20 }
 0x102   : > { %4951 = vmatprep.subr.bf16.mxu1 %v5352_v34 }
 0x105   : > { %4959 = vmatpush3.bf16.msra.mxu1 %v5352_v34 }
 0x107   : > { %4689 = vmatmul.mubr.msk.bf16.gmra.mrb[16].mxu1 %vm5773_vm5, %v6003_v44 }
 0x108   : > { %4913 = vmatmul.mubr.msk.bf16.vlgmr.msra.gmra.mrb[0].mxu0 %vm5608_vm3, %v5658_v18  ;;  %4692 = vmatprep.mubr.msk.bf16.mxu1 %vm5773_vm5, %v6031_v21 }
 0x109   : > { %4916 = vmatprep.mubr.msk.bf16.mxu0 %vm5608_vm3, %v5694_v40 }
 0x10f   : > { %4693 = vmatmul.mubr.msk.bf16.gmra.mrb[20].mxu1 %vm5773_vm5, %v6037_v47 }
 0x110   : > { %4917 = vmatmul.mubr.msk.bf16.gmra.mrb[4].mxu0 %vm5608_vm3, %v5701_v45  ;;  %4696 = vmatprep.mubr.msk.bf16.mxu1 %vm5773_vm5, %v6063_v30 }
 0x111   : > { %4920 = vmatprep.mubr.msk.bf16.mxu0 %vm5608_vm3, %v5738_v8 }
 0x117   : > { %4697 = vmatmul.mubr.msk.bf16.gmra.mrb[24].mxu1 %vm5773_vm5, %v6069_v11 }
 0x118   : > { %4921 = vmatmul.mubr.msk.bf16.gmra.mrb[8].mxu0 %vm5608_vm3, %v5743_v15  ;;  %4700 = vmatprep.mubr.msk.bf16.mxu1 %vm5773_vm5, %v6090_v48 }
 0x119   : > { %4924 = vmatprep.mubr.msk.bf16.mxu0 %vm5608_vm3, %v5770_v43 }
 0x11f   : > { %4701 = vmatmul.mubr.msk.bf16.gmra.mrb[28].mxu1 %vm5773_vm5, %v6160_v19 }
 0x120   : > { %4925 = vmatmul.mubr.msk.bf16.gmra.mrb[12].mxu0 %vm5608_vm3, %v5781_v61  ;;  %4736 = vmatprep.mubr.bf16.mxu1 %v5628_v3  ;;  %v740_v3 = vrot.slane %v6154_v0, 1 }
 0x121   : > { %4928 = vmatprep.mubr.msk.bf16.mxu0 %vm5608_vm3, %v5827_v39 }
 0x127   : > { %4737 = vmatmul.mubr.bf16.vlgmr.msra.gmra.mrb[16].mxu1 %v5641_v9  ;;  %v741_v9 = vrot.slane %v6149_v58, 1 }
 0x128   : > { %4929 = vmatmul.mubr.msk.bf16.gmra.mrb[16].mxu0 %vm5608_vm3, %v5835_v52  ;;  %4740 = vmatprep.mubr.bf16.mxu1 %v5676_v25 }
 0x129   : > { %4932 = vmatprep.mubr.msk.bf16.mxu0 %vm5608_vm3, %v5877_v51  ;;  %v742_v14 = vsel %vm688_vm1, %v740_v3, %v741_v9 }
 0x12a   : > { %v4119_v18 = vpack.c.bf16 %v741_v9, %v742_v14 }
 0x12f   : > { %4741 = vmatmul.mubr.bf16.gmra.mrb[20].mxu1 %v5685_v31 }
 0x130   : > { %4933 = vmatmul.mubr.msk.bf16.gmra.mrb[20].mxu0 %vm5608_vm3, %v5887_v54  ;;  %4744 = vmatprep.mubr.bf16.mxu1 %v5717_v57 }
 0x131   : > { %4936 = vmatprep.mubr.msk.bf16.mxu0 %vm5608_vm3, %v5928_v53 }
 0x137   : > { %4745 = vmatmul.mubr.bf16.gmra.mrb[24].mxu1 %v5726_v62 }
 0x138   : > { %4937 = vmatmul.mubr.msk.bf16.gmra.mrb[24].mxu0 %vm5608_vm3, %v5934_v63  ;;  %4748 = vmatprep.mubr.bf16.mxu1 %v5751_v16 }
 0x139   : > { %4940 = vmatprep.mubr.msk.bf16.mxu0 %vm5608_vm3, %v5967_v2 }
 0x13f   : > { %4749 = vmatmul.mubr.bf16.gmra.mrb[28].mxu1 %v5897_v27 }
 0x140   : > { %4941 = vmatmul.mubr.msk.bf16.gmra.mrb[28].mxu0 %vm5608_vm3, %v4119_v18 }
 0x1ba   : > { %v4674_v25 = vpop.f32.mrb[0].mxu1 }
 0x1bb   : > { %v1654_v31 = vpop.f32.mrb[1].mxu1 }
 0x1bc   : > { %v4675_v40 = vpop.f32.mrb[2].mxu1 }
 0x1bd   : > { %v1657_v45 = vpop.f32.mrb[3].mxu1 }
 0x1c2   : > { %v4678_v57 = vpop.f32.mrb[4].mxu1 }
 0x1c3   : > { %v1670_v62 = vpop.f32.mrb[5].mxu1 }
 0x1c4   : > { %v4679_v8 = vpop.f32.mrb[6].mxu1 }
 0x1c5   : > { %v1673_v15 = vpop.f32.mrb[7].mxu1 }
 0x1ca   : > { %v4682_v16 = vpop.f32.mrb[8].mxu1 }
 0x1cb   : > { %v1686_v43 = vpop.f32.mrb[9].mxu1 }
 0x1cc   : > { %v4683_v46 = vpop.f32.mrb[10].mxu1 }
 0x1cd   : > { %v1689_v61 = vpop.f32.mrb[11].mxu1 }
 0x1d2   : > { %v6383_v51 = vpop.f32.mrb[12].mxu1 }
 0x1d3   : > { %v6385_v39 = vpop.f32.mrb[13].mxu1 }
 0x1d4   : > { %v6387_v52 = vpop.f32.mrb[14].mxu1 }
 0x1d5   : > { %v6389_v60 = vpop.f32.mrb[15].mxu1 }
 0x1db   : > { %v4914_v63 = vpop.f32.mrb[0].mxu0 }
 0x1dc   : > { %v4960_v54 = vadd.f32 %v4914_v63, %v4674_v25  ;;  %v2949_v27 = vpop.f32.mrb[1].mxu0 }
 0x1dd   : > { %v4961_v53 = vadd.f32 %v2949_v27, %v1654_v31  ;;  %v4915_v23 = vpop.f32.mrb[2].mxu0 }
 0x1de   : > { %v4962_v2 = vadd.f32 %v4915_v23, %v4675_v40  ;;  %v2952_v6 = vpop.f32.mrb[3].mxu0  ;;  %v3307_v48 = vmul.f32 %v4960_v54, %v4960_v54 }
 0x1df   : > { %v4963_v13 = vadd.f32 %v2952_v6, %v1657_v45  ;;  %v3305_v21 = vmul.f32 %v4961_v53, %v4961_v53 }
 0x1e0   : > { %v4208_v44 = vpack.c.bf16 %v4962_v2, %v4960_v54  ;;  %v3308_v10 = vmul.f32 %v4962_v2, %v4962_v2 }
 0x1e1   : > { %v4203_v47 = vpack.c.bf16 %v4963_v13, %v4961_v53  ;;  %v3268_v30 = vadd.f32 %v4963_v13, %v4961_v53  ;;  %v3306_v11 = vmul.f32 %v4963_v13, %v4963_v13 }
 0x1e2   : > { %4281 = vst [vmem:[%s6395_s18 + $0x8] sm:$0xff] %v4208_v44  }
 0x1e3   : > { %4204 = vst [vmem:[%s6395_s18] sm:$0xff] %v4203_v47   ;;  %v3269_v28 = vadd.f32 %v4960_v54, %v3268_v30  ;;  %v3337_v35 = vadd.f32 %v3306_v11, %v3305_v21  ;;  %v4918_v58 = vpop.f32.mrb[4].mxu0 }
 0x1e4   : > { %v4964_v0 = vadd.f32 %v4918_v58, %v4678_v57  ;;  %v2965_v55 = vpop.f32.mrb[5].mxu0 }
 0x1e5   : > { %v3338_v19 = vadd.f32 %v3337_v35, %v3307_v48  ;;  %v4965_v56 = vadd.f32 %v2965_v55, %v1670_v62  ;;  %v3270_v33 = vadd.f32 %v4962_v2, %v3269_v28  ;;  %v4919_v7 = vpop.f32.mrb[6].mxu0 }
 0x1e6   : > { %v4966_v12 = vadd.f32 %v4919_v7, %v4679_v8  ;;  %v2968_v22 = vpop.f32.mrb[7].mxu0  ;;  %v3311_v38 = vmul.f32 %v4964_v0, %v4964_v0 }
 0x1e7   : > { %v3271_v37 = vadd.f32 %v4965_v56, %v3270_v33  ;;  %v3309_v59 = vmul.f32 %v4965_v56, %v4965_v56  ;;  %v3339_v36 = vadd.f32 %v3338_v19, %v3308_v10  ;;  %v4967_v17 = vadd.f32 %v2968_v22, %v1673_v15 }
 0x1e8   : > { %v4218_v24 = vpack.c.bf16 %v4966_v12, %v4964_v0  ;;  %v3312_v1 = vmul.f32 %v4966_v12, %v4966_v12 }
 0x1e9   : > { %v3340_v4 = vadd.f32 %v3339_v36, %v3309_v59  ;;  %v4213_v26 = vpack.c.bf16 %v4967_v17, %v4965_v56  ;;  %v3272_v29 = vadd.f32 %v4967_v17, %v3271_v37  ;;  %v3310_v32 = vmul.f32 %v4967_v17, %v4967_v17 }
 0x1ea   : > { %4283 = vst [vmem:[%s6395_s18 + $0x18] sm:$0xff] %v4218_v24  }
 0x1eb   : > { %4282 = vst [vmem:[%s6395_s18 + $0x10] sm:$0xff] %v4213_v26   ;;  %v3273_v41 = vadd.f32 %v4964_v0, %v3272_v29  ;;  %v3341_v49 = vadd.f32 %v3340_v4, %v3310_v32  ;;  %v4922_v5 = vpop.f32.mrb[8].mxu0 }
 0x1ec   : > { %v4968_v42 = vadd.f32 %v4922_v5, %v4682_v16  ;;  %v2981_v50 = vpop.f32.mrb[9].mxu0 }
 0x1ed   : > { %v3342_v20 = vadd.f32 %v3341_v49, %v3311_v38  ;;  %v4969_v34 = vadd.f32 %v2981_v50, %v1686_v43  ;;  %v3274_v3 = vadd.f32 %v4966_v12, %v3273_v41  ;;  %v4923_v9 = vpop.f32.mrb[10].mxu0 }
 0x1ee   : > { %v4970_v14 = vadd.f32 %v4923_v9, %v4683_v46  ;;  %v2984_v18 = vpop.f32.mrb[11].mxu0  ;;  %v3315_v16 = vmul.f32 %v4968_v42, %v4968_v42 }
 0x1ef   : > { %v3275_v25 = vadd.f32 %v4969_v34, %v3274_v3  ;;  %v3313_v31 = vmul.f32 %v4969_v34, %v4969_v34  ;;  %v3343_v40 = vadd.f32 %v3342_v20, %v3312_v1  ;;  %v4971_v45 = vadd.f32 %v2984_v18, %v1689_v61 }
 0x1f0   : > { %v4228_v57 = vpack.c.bf16 %v4970_v14, %v4968_v42  ;;  %v3316_v46 = vmul.f32 %v4970_v14, %v4970_v14 }
 0x1f1   : > { %v3344_v62 = vadd.f32 %v3343_v40, %v3313_v31  ;;  %v4223_v8 = vpack.c.bf16 %v4971_v45, %v4969_v34  ;;  %v3276_v15 = vadd.f32 %v4971_v45, %v3275_v25  ;;  %v3314_v63 = vmul.f32 %v4971_v45, %v4971_v45 }
 0x1f2   : > { %4285 = vst [vmem:[%s6395_s18 + $0x28] sm:$0xff] %v4228_v57  }
 0x1f3   : > { %4284 = vst [vmem:[%s6395_s18 + $0x20] sm:$0xff] %v4223_v8   ;;  %v3277_v54 = vadd.f32 %v4968_v42, %v3276_v15  ;;  %v3345_v27 = vadd.f32 %v3344_v62, %v3314_v63  ;;  %v4926_v43 = vpop.f32.mrb[12].mxu0 }
 0x1f4   : > { %v4972_v53 = vadd.f32 %v4926_v43, %v6383_v51  ;;  %v2997_v23 = vpop.f32.mrb[13].mxu0 }
 0x1f5   : > { %v3346_v2 = vadd.f32 %v3345_v27, %v3315_v16  ;;  %v4973_v6 = vadd.f32 %v2997_v23, %v6385_v39  ;;  %v3278_v61 = vadd.f32 %v4970_v14, %v3277_v54  ;;  %v4927_v13 = vpop.f32.mrb[14].mxu0 }
 0x1f6   : > { %v4974_v44 = vadd.f32 %v4927_v13, %v6387_v52  ;;  %v3000_v21 = vpop.f32.mrb[15].mxu0  ;;  %v3319_v10 = vmul.f32 %v4972_v53, %v4972_v53 }
 0x1f7   : > { %v3279_v47 = vadd.f32 %v4973_v6, %v3278_v61  ;;  %v3317_v30 = vmul.f32 %v4973_v6, %v4973_v6  ;;  %v3347_v11 = vadd.f32 %v3346_v2, %v3316_v46  ;;  %v4975_v48 = vadd.f32 %v3000_v21, %v6389_v60 }
 0x1f8   : > { %v4238_v28 = vpack.c.bf16 %v4974_v44, %v4972_v53  ;;  %v3320_v22 = vmul.f32 %v4974_v44, %v4974_v44 }
 0x1f9   : > { %v3348_v35 = vadd.f32 %v3347_v11, %v3317_v30  ;;  %v4233_v51 = vpack.c.bf16 %v4975_v48, %v4973_v6  ;;  %v3280_v58 = vadd.f32 %v4975_v48, %v3279_v47  ;;  %v3318_v0 = vmul.f32 %v4975_v48, %v4975_v48 }
 0x1fa   : > { %4287 = vst [vmem:[%s6395_s18 + $0x38] sm:$0xff] %v4238_v28   ;;  %v4738_v55 = vpop.f32.mrb[16].mxu1 }
 0x1fb   : > { %4286 = vst [vmem:[%s6395_s18 + $0x30] sm:$0xff] %v4233_v51   ;;  %v3281_v39 = vadd.f32 %v4972_v53, %v3280_v58  ;;  %v3349_v19 = vadd.f32 %v3348_v35, %v3318_v0  ;;  %v4930_v56 = vpop.f32.mrb[16].mxu0  ;;  %v1977_v33 = vpop.f32.mrb[17].mxu1 }
 0x1fc   : > { %v4976_v52 = vadd.f32 %v4930_v56, %v4738_v55  ;;  %v3013_v7 = vpop.f32.mrb[17].mxu0  ;;  %v4739_v12 = vpop.f32.mrb[18].mxu1 }
 0x1fd   : > { %v3350_v37 = vadd.f32 %v3349_v19, %v3319_v10  ;;  %v4977_v60 = vadd.f32 %v3013_v7, %v1977_v33  ;;  %v3282_v59 = vadd.f32 %v4974_v44, %v3281_v39  ;;  %v4931_v36 = vpop.f32.mrb[18].mxu0  ;;  %v1980_v17 = vpop.f32.mrb[19].mxu1 }
 0x1fe   : > { %v4978_v24 = vadd.f32 %v4931_v36, %v4739_v12  ;;  %v3016_v4 = vpop.f32.mrb[19].mxu0  ;;  %v3323_v20 = vmul.f32 %v4976_v52, %v4976_v52 }
 0x1ff   : > { %v3283_v26 = vadd.f32 %v4977_v60, %v3282_v59  ;;  %v3321_v29 = vmul.f32 %v4977_v60, %v4977_v60  ;;  %v3351_v32 = vadd.f32 %v3350_v37, %v3320_v22  ;;  %v4979_v38 = vadd.f32 %v3016_v4, %v1980_v17 }
 0x200   : > { %v4248_v41 = vpack.c.bf16 %v4978_v24, %v4976_v52  ;;  %v3324_v40 = vmul.f32 %v4978_v24, %v4978_v24 }
 0x201   : > { %v3352_v49 = vadd.f32 %v3351_v32, %v3321_v29  ;;  %v4243_v5 = vpack.c.bf16 %v4979_v38, %v4977_v60  ;;  %v3284_v42 = vadd.f32 %v4979_v38, %v3283_v26  ;;  %v3322_v50 = vmul.f32 %v4979_v38, %v4979_v38 }
 0x202   : > { %4289 = vst [vmem:[%s6395_s18 + $0x48] sm:$0xff] %v4248_v41   ;;  %v4742_v1 = vpop.f32.mrb[20].mxu1 }
 0x203   : > { %4288 = vst [vmem:[%s6395_s18 + $0x40] sm:$0xff] %v4243_v5   ;;  %v3285_v34 = vadd.f32 %v4976_v52, %v3284_v42  ;;  %v3353_v3 = vadd.f32 %v3352_v49, %v3322_v50  ;;  %v4934_v9 = vpop.f32.mrb[20].mxu0  ;;  %v1993_v14 = vpop.f32.mrb[21].mxu1 }
 0x204   : > { %v4980_v18 = vadd.f32 %v4934_v9, %v4742_v1  ;;  %v3029_v25 = vpop.f32.mrb[21].mxu0  ;;  %v4743_v31 = vpop.f32.mrb[22].mxu1 }
 0x205   : > { %v3354_v45 = vadd.f32 %v3353_v3, %v3323_v20  ;;  %v4981_v57 = vadd.f32 %v3029_v25, %v1993_v14  ;;  %v3286_v62 = vadd.f32 %v4978_v24, %v3285_v34  ;;  %v4935_v8 = vpop.f32.mrb[22].mxu0  ;;  %v1996_v15 = vpop.f32.mrb[23].mxu1 }
 0x206   : > { %v4982_v63 = vadd.f32 %v4935_v8, %v4743_v31  ;;  %v3032_v16 = vpop.f32.mrb[23].mxu0  ;;  %v3327_v44 = vmul.f32 %v4980_v18, %v4980_v18 }
 0x207   : > { %v3287_v54 = vadd.f32 %v4981_v57, %v3286_v62  ;;  %v3325_v27 = vmul.f32 %v4981_v57, %v4981_v57  ;;  %v3355_v43 = vadd.f32 %v3354_v45, %v3324_v40  ;;  %v4983_v53 = vadd.f32 %v3032_v16, %v1996_v15 }
 0x208   : > { %v4258_v23 = vpack.c.bf16 %v4982_v63, %v4980_v18  ;;  %v3328_v51 = vmul.f32 %v4982_v63, %v4982_v63 }
 0x209   : > { %v3356_v46 = vadd.f32 %v3355_v43, %v3325_v27  ;;  %v4253_v2 = vpack.c.bf16 %v4983_v53, %v4981_v57  ;;  %v3288_v6 = vadd.f32 %v4983_v53, %v3287_v54  ;;  %v3326_v61 = vmul.f32 %v4983_v53, %v4983_v53 }
 0x20a   : > { %4291 = vst [vmem:[%s6395_s18 + $0x58] sm:$0xff] %v4258_v23   ;;  %v4746_v13 = vpop.f32.mrb[24].mxu1 }
 0x20b   : > { %4290 = vst [vmem:[%s6395_s18 + $0x50] sm:$0xff] %v4253_v2   ;;  %v3289_v21 = vadd.f32 %v4980_v18, %v3288_v6  ;;  %v3357_v47 = vadd.f32 %v3356_v46, %v3326_v61  ;;  %v4938_v30 = vpop.f32.mrb[24].mxu0  ;;  %v2009_v11 = vpop.f32.mrb[25].mxu1 }
 0x20c   : > { %v4984_v48 = vadd.f32 %v4938_v30, %v4746_v13  ;;  %v3045_v28 = vpop.f32.mrb[25].mxu0  ;;  %v4747_v35 = vpop.f32.mrb[26].mxu1 }
 0x20d   : > { %v3358_v58 = vadd.f32 %v3357_v47, %v3327_v44  ;;  %v4985_v0 = vadd.f32 %v3045_v28, %v2009_v11  ;;  %v3290_v55 = vadd.f32 %v4982_v63, %v3289_v21  ;;  %v4939_v10 = vpop.f32.mrb[26].mxu0  ;;  %v2012_v39 = vpop.f32.mrb[27].mxu1 }
 0x20e   : > { %v4986_v19 = vadd.f32 %v4939_v10, %v4747_v35  ;;  %v3048_v56 = vpop.f32.mrb[27].mxu0  ;;  %v3331_v24 = vmul.f32 %v4984_v48, %v4984_v48 }
 0x20f   : > { %v3291_v33 = vadd.f32 %v4985_v0, %v3290_v55  ;;  %v3329_v52 = vmul.f32 %v4985_v0, %v4985_v0  ;;  %v3359_v7 = vadd.f32 %v3358_v58, %v3328_v51  ;;  %v4987_v12 = vadd.f32 %v3048_v56, %v2012_v39 }
 0x210   : > { %v4268_v22 = vpack.c.bf16 %v4986_v19, %v4984_v48  ;;  %v3332_v5 = vmul.f32 %v4986_v19, %v4986_v19 }
 0x211   : > { %v3360_v37 = vadd.f32 %v3359_v7, %v3329_v52  ;;  %v4263_v60 = vpack.c.bf16 %v4987_v12, %v4985_v0  ;;  %v3292_v59 = vadd.f32 %v4987_v12, %v3291_v33  ;;  %v3330_v36 = vmul.f32 %v4987_v12, %v4987_v12 }
 0x212   : > { %4293 = vst [vmem:[%s6395_s18 + $0x68] sm:$0xff] %v4268_v22   ;;  %v4750_v17 = vpop.f32.mrb[28].mxu1 }
 0x213   : > { %4292 = vst [vmem:[%s6395_s18 + $0x60] sm:$0xff] %v4263_v60   ;;  %v3293_v4 = vadd.f32 %v4984_v48, %v3292_v59  ;;  %v3361_v26 = vadd.f32 %v3360_v37, %v3330_v36  ;;  %v4942_v29 = vpop.f32.mrb[28].mxu0  ;;  %v2025_v32 = vpop.f32.mrb[29].mxu1 }
 0x214   : > { %v4988_v38 = vadd.f32 %v4942_v29, %v4750_v17  ;;  %v3061_v41 = vpop.f32.mrb[29].mxu0  ;;  %v4751_v49 = vpop.f32.mrb[30].mxu1 }
 0x215   : > { %v3362_v42 = vadd.f32 %v3361_v26, %v3331_v24  ;;  %v4989_v50 = vadd.f32 %v3061_v41, %v2025_v32  ;;  %v3294_v1 = vadd.f32 %v4986_v19, %v3293_v4  ;;  %v4943_v20 = vpop.f32.mrb[30].mxu0  ;;  %v2028_v34 = vpop.f32.mrb[31].mxu1 }
 0x216   : > { %v4990_v3 = vadd.f32 %v4943_v20, %v4751_v49  ;;  %v3064_v9 = vpop.f32.mrb[31].mxu0  ;;  %v3335_v15 = vmul.f32 %v4988_v38, %v4988_v38 }
 0x217   : > { %v3295_v14 = vadd.f32 %v4989_v50, %v3294_v1  ;;  %v3333_v18 = vmul.f32 %v4989_v50, %v4989_v50  ;;  %v3363_v25 = vadd.f32 %v3362_v42, %v3332_v5  ;;  %v4991_v31 = vadd.f32 %v3064_v9, %v2028_v34 }
 0x218   : > { %v4278_v40 = vpack.c.bf16 %v4990_v3, %v4988_v38  ;;  %v3336_v54 = vmul.f32 %v4990_v3, %v4990_v3 }
 0x219   : > { %v3364_v45 = vadd.f32 %v3363_v25, %v3333_v18  ;;  %v4273_v57 = vpack.c.bf16 %v4991_v31, %v4989_v50  ;;  %v3296_v62 = vadd.f32 %v4991_v31, %v3295_v14  ;;  %v3334_v8 = vmul.f32 %v4991_v31, %v4991_v31 }
 0x21a   : > { %4295 = vst [vmem:[%s6395_s18 + $0x78] sm:$0xff] %v4278_v40  }
 0x21b   : > { %4294 = vst [vmem:[%s6395_s18 + $0x70] sm:$0xff] %v4273_v57   ;;  %v3297_v63 = vadd.f32 %v4988_v38, %v3296_v62  ;;  %v3365_v16 = vadd.f32 %v3364_v45, %v3334_v8 }
 0x21d   : > { %v3298_v27 = vadd.f32 %v4990_v3, %v3297_v63  ;;  %v3366_v43 = vadd.f32 %v3365_v16, %v3335_v15 }
 0x21f   : > { %v3299_v53 = vrot.slane %v3298_v27, 4  ;;  %v3367_v23 = vadd.f32 %v3366_v43, %v3336_v54 }
 0x221   : > { %v3300_v46 = vadd.f32 %v3299_v53, %v3298_v27  ;;  %v3368_v2 = vrot.slane %v3367_v23, 4 }
 0x223   : > { %v3301_v6 = vrot.slane %v3300_v46, 2  ;;  %v3369_v61 = vadd.f32 %v3368_v2, %v3367_v23 }
 0x225   : > { %v3302_v13 = vadd.f32 %v3301_v6, %v3300_v46  ;;  %v3370_v44 = vrot.slane %v3369_v61, 2 }
 0x227   : > { %v3303_v21 = vrot.slane %v3302_v13, 1  ;;  %v3371_v47 = vadd.f32 %v3370_v44, %v3369_v61 }
 0x229   : > { %v3372_v30 = vrot.slane %v3371_v47, 1  ;;  %v3304_v11 = vadd.f32 %v3303_v21, %v3302_v13 }
 0x22b   : > { %v3373_v48 = vadd.f32 %v3372_v30, %v3371_v47 }
 0x22d   : > { %v3374_v28 = vsel %vm579_vm0, %v3304_v11, %v3373_v48 }
 0x22e   : > { %3379 = vst [vmem:[%s457_s22] sm:$0x3] %v3374_v28 }
 0x22f PF: > { %s18_s26 = sadd.s32 1, %s5375_s26   ;;  %s6463_s24 = smov %s5371_s25 }
 0x230   : > { %p15_p5 = scmp.ge.s32.totalorder %s18_s26, 4   ;;  %s6464_s25 = smov %s6466_s4 }
 0x232   :  { %17 = sbr.rel (!%p15_p5) target bundleno = 2 (0x2), region = 108 }

</bundles_post_ra>
